<compile_context>
chip_gen: v7x
topology: tpu7x:2x2x1
jax: 0.10.0
libtpu: 0.0.40
codegen_flags: <defaults>
</compile_context>

<pallas_src>
import functools

import jax
import jax.numpy as jnp
from jax.experimental import pallas as pl
from jax.experimental.pallas import tpu as pltpu


def _tpu_vmem_capacity_bytes():
    try:
        return int(pltpu.get_tpu_info().vmem_capacity_bytes)
    except Exception:
        return 64 * 1024 * 1024            # conservative (v7x-sized) fallback


_VMEM_CAP = _tpu_vmem_capacity_bytes()
_VMEM_LIMIT_BYTES = min((_VMEM_CAP * 3) // 4, 100 * 1024 * 1024)   # ~96 MiB on 128 MiB parts, 48 MiB on v7x
_VMEM_TILE_BUDGET = (_VMEM_CAP * 2) // 5                            # ~51 MiB / ~25 MiB per-tile working set


def _wsilu(x):
    return jax.nn.sigmoid(4.0 * x) * x


# -----------------------------------------------------------------------------
# Kernel 1: SubpelConv2x's 1x1 conv (in_ch -> 4*out_ch), row-tiled, bf16 matmul.
# Weight columns are pre-permuted to plane-major order (i, j, c); the kernel writes the two
# i-parity planes into an (N, H, 2, W, 2C) array so PixelShuffle becomes a free XLA reshape.
# -----------------------------------------------------------------------------
def _upconv_kernel(x_ref, w_ref, b_ref, o_ref):
    _, TB, W, Cin = x_ref.shape
    C2 = o_ref.shape[4]                                  # 2*C: one (j, c) plane pair
    xf = x_ref[0].reshape(TB * W, Cin)                   # bf16
    y = jnp.dot(xf, w_ref[...], preferred_element_type=jnp.float32) + b_ref[...]
    y = y.astype(o_ref.dtype)                            # (TB*W, 4C), columns ordered (i, j, c)
    o_ref[0, :, 0, :, :] = y[:, :C2].reshape(TB, W, C2)  # output row parity i = 0
    o_ref[0, :, 1, :, :] = y[:, C2:].reshape(TB, W, C2)  # output row parity i = 1


# -----------------------------------------------------------------------------
# Kernel 2: DepthConvBlock(out_ch, out_ch, shortcut=True), row-tiled with a 1-row halo.
#   dc : 1x1 -> WSiLU -> depthwise 3x3 (pad=1) -> 1x1, + residual
#   ffn: 1x1 (4C) -> WSiLU -> chunk(2)+add -> 1x1,  + residual;  then + input (shortcut)
# Halo rows arrive via two clamped single-row BlockSpecs; conv1+WSiLU is recomputed on them
# and they are zeroed at image borders (= the conv's zero padding of t).
# -----------------------------------------------------------------------------
def _depth_conv_block_kernel(xm_ref, xt_ref, xb_ref,
                             w1, b1, kdw, bdw, w3, b3, w4, b4, w5, b5,
                             o_ref, t_scr):
    _, TH2, W2, C = xm_ref.shape
    R = TH2 * W2
    C2 = 2 * C
    f32 = jnp.float32
    bf16 = jnp.bfloat16

    g = pl.program_id(1)
    top_ok = (g > 0).astype(f32)                          # zero halos at the image borders
    bot_ok = (g < pl.num_programs(1) - 1).astype(f32)

    xm = xm_ref[0].reshape(R, C)                          # bf16 main tile, (rows, C)
    x0 = xm.astype(f32)                                   # residual base (f32)

    w1v = w1[...]
    b1v = b1[...]

    def conv1_silu(v_bf16):
        return _wsilu(jnp.dot(v_bf16, w1v, preferred_element_type=f32) + b1v)

    t_main = conv1_silu(xm)                               # (R, C)  f32
    t_top = conv1_silu(xt_ref[0, 0]) * top_ok             # (W2, C) halo row (recomputed)
    t_bot = conv1_silu(xb_ref[0, 0]) * bot_ok

    # Flat halo scratch: [top halo W2][main R][bottom halo W2]; all store offsets are
    # multiples of W2 (sublane-aligned whenever W2 % 8 == 0).
    t_scr[0:W2, :] = t_top
    t_scr[W2:W2 + R, :] = t_main
    t_scr[W2 + R:2 * W2 + R, :] = t_bot

    # Edge masks on the output w-coordinate (hoisted out of the tap loop).
    wi = jax.lax.broadcasted_iota(jnp.int32, (TH2, W2, 1), 1).reshape(R, 1)
    not_left = (wi > 0).astype(f32)
    not_right = (wi < W2 - 1).astype(f32)

    # Depthwise 3x3 (padding=1): 3 aligned slab loads (one per dh) + XLU rolls for dw=+-1.
    # Rolled wrap-around rows are exactly the masked (border) rows.
    kv = kdw[...]                                         # (9, C), rows ordered kh*3 + kw
    acc = jnp.zeros((R, C), f32)
    for dh in (-1, 0, 1):
        base = (dh + 1) * W2
        slab = t_scr[base:base + R, :]                    # aligned (R, C) load
        for dw in (-1, 0, 1):
            idx = (dh + 1) * 3 + (dw + 1)
            if dw == 0:
                tap = slab
            elif dw == -1:
                tap = pltpu.roll(slab, 1, axis=0) * not_left      # tap[r] = slab[r-1]
            else:
                tap = pltpu.roll(slab, R - 1, axis=0) * not_right  # tap[r] = slab[r+1]
            acc = acc + tap * kv[idx:idx + 1, :]
    d = acc + bdw[...]

    # dc tail: 1x1 conv + residual.
    out1 = jnp.dot(d.astype(bf16), w3[...], preferred_element_type=f32) + b3[...] + x0

    # ffn: one merged (C,4C) matmul, WSiLU, chunk(2)+add via lane slices, 1x1, residual.
    u = _wsilu(jnp.dot(out1.astype(bf16), w4[...], preferred_element_type=f32) + b4[...])
    v = u[:, :C2] + u[:, C2:]
    out2 = jnp.dot(v.astype(bf16), w5[...], preferred_element_type=f32) + b5[...] + out1

    o_ref[0] = (out2 + x0).astype(o_ref.dtype).reshape(TH2, W2, C)   # + shortcut, bf16 out


# -----------------------------------------------------------------------------
# Tile sizing: largest divisor of H whose explicit per-step VMEM footprint fits the budget.
# -----------------------------------------------------------------------------
def _pick_tile_rows(H, bytes_per_tb, budget, forced):
    if forced is not None:
        if H % forced != 0:
            raise ValueError(f"tile_rows={forced} must divide H={H}")
        return forced
    best = 1
    for tb in range(1, H + 1):
        if H % tb == 0 and bytes_per_tb(tb) <= budget:
            best = tb
    return best   # tb=1 kept even if over budget (may fail at compile for huge W*C)


# -----------------------------------------------------------------------------
# Wrapper (NCHW in / NCHW out, matching the PyTorch module interface).
# -----------------------------------------------------------------------------
@functools.partial(jax.jit, static_argnames=("tile_rows",))
def residual_block_upsample(x_nchw, params, tile_rows=None):
    N, Cin, H, W = x_nchw.shape
    C4 = params["w_up"].shape[1]
    C = C4 // 4
    H2, W2 = 2 * H, 2 * W
    bf16 = jnp.bfloat16

    # Single-pass input staging: NCHW -> NHWC, straight to bf16.
    xb = jnp.transpose(x_nchw, (0, 2, 3, 1)).astype(bf16)

    # Permute upconv output channels from torch/PixelShuffle order (c*4 + 2i + j) to
    # plane-major order (i*2C + j*C + c): the shuffle then becomes a pure reshape.
    q = jnp.arange(C4)
    perm = (q % C) * 4 + (q // (2 * C)) * 2 + (q // C) % 2
    w_up = params["w_up"][:, perm].astype(bf16)
    b_up = params["b_up"][:, perm]

    # ---- kernel 1: 1x1 upconv, row-tiled ------------------------------------------------
    def k1_bytes(tb):
        r = tb * W
        return 4 * r * Cin + 16 * r * C + 40 * r * C      # in/out double buffers + temps

    TB1 = _pick_tile_rows(H, k1_bytes, _VMEM_TILE_BUDGET, None)

    up = pl.pallas_call(
        _upconv_kernel,
        out_shape=jax.ShapeDtypeStruct((N, H, 2, W, 2 * C), bf16),
        grid=(N, H // TB1),
        in_specs=[
            pl.BlockSpec((1, TB1, W, Cin), lambda n, g: (n, g, 0, 0)),
            pl.BlockSpec((Cin, C4), lambda n, g: (0, 0)),
            pl.BlockSpec((1, C4), lambda n, g: (0, 0)),
        ],
        out_specs=pl.BlockSpec((1, TB1, 2, W, 2 * C), lambda n, g: (n, g, 0, 0, 0)),
        compiler_params=pltpu.CompilerParams(
            dimension_semantics=("parallel", "parallel"),
            vmem_limit_bytes=_VMEM_LIMIT_BYTES),
    )(xb, w_up, b_up)

    # PixelShuffle(2): zero-copy (row-major order already is the shuffled one).
    x0 = up.reshape(N, H2, W2, C)

    # ---- kernel 2: DepthConvBlock, row-tiled with 1-row halo ----------------------------
    def k2_bytes(tb):
        r = 2 * tb * W2
        # bf16 in/out double buffers + f32 t scratch + ~12 live f32 (R,C)-sized temps.
        return 8 * r * C + (r + 2 * W2) * C * 4 + 48 * r * C

    TB = _pick_tile_rows(H, k2_bytes, _VMEM_TILE_BUDGET, tile_rows)
    TH2 = 2 * TB

    weight_args = (params["w1"].astype(bf16), params["b1"],
                   params["kdw"], params["bdw"],
                   params["w3"].astype(bf16), params["b3"],
                   params["w4"].astype(bf16), params["b4"],
                   params["w5"].astype(bf16), params["b5"])

    def wspec(arr):
        return pl.BlockSpec(arr.shape, lambda n, g: (0, 0))

    out = pl.pallas_call(
        _depth_conv_block_kernel,
        out_shape=jax.ShapeDtypeStruct((N, H2, W2, C), bf16),
        grid=(N, H // TB),
        in_specs=[
            pl.BlockSpec((1, TH2, W2, C), lambda n, g: (n, g, 0, 0)),
            # 1-row halos: clamped at the image borders, zeroed in-kernel via program_id masks.
            pl.BlockSpec((1, 1, W2, C),
                         lambda n, g: (n, jnp.maximum(g * TH2 - 1, 0), 0, 0)),
            pl.BlockSpec((1, 1, W2, C),
                         lambda n, g: (n, jnp.minimum((g + 1) * TH2, H2 - 1), 0, 0)),
        ] + [wspec(a) for a in weight_args],
        out_specs=pl.BlockSpec((1, TH2, W2, C), lambda n, g: (n, g, 0, 0)),
        scratch_shapes=[pltpu.VMEM((TH2 * W2 + 2 * W2, C), jnp.float32)],
        compiler_params=pltpu.CompilerParams(
            dimension_semantics=("parallel", "parallel"),
            vmem_limit_bytes=_VMEM_LIMIT_BYTES),
    )(x0, x0, x0, *weight_args)

    # bf16 NHWC -> f32 NCHW in one fused XLA pass (transpose + upcast).
    return jnp.transpose(out, (0, 3, 1, 2)).astype(jnp.float32)


# -----------------------------------------------------------------------------
# Deterministic parameter init (shapes dictated by the module __init__), f32.
# -----------------------------------------------------------------------------
def init_params(key, in_ch, out_ch, scale=0.2):
    C = out_ch
    ks = jax.random.split(key, 12)
    w = lambda k, s: scale * jax.random.normal(k, s, jnp.float32)
    return {
        "w_up": w(ks[0], (in_ch, 4 * C)), "b_up": w(ks[1], (1, 4 * C)),   # SubpelConv2x conv
        "w1":   w(ks[2], (C, C)),         "b1":   w(ks[3], (1, C)),       # dc[0] 1x1
        "kdw":  w(ks[4], (9, C)),         "bdw":  w(ks[5], (1, C)),       # dc[2] depthwise 3x3
        "w3":   w(ks[6], (C, C)),         "b3":   w(ks[7], (1, C)),       # dc[3] 1x1
        "w4":   w(ks[8], (C, 4 * C)),     "b4":   w(ks[9], (1, 4 * C)),   # ffn[0] 1x1
        "w5":   w(ks[10], (2 * C, C)),    "b5":   w(ks[11], (1, C)),      # ffn[2] 1x1
    }


# -----------------------------------------------------------------------------
# Pure-JAX reference mirroring the PyTorch forward (torch-order PixelShuffle) with the same
# bf16-operand / f32-accumulate matmuls and bf16 upconv intermediate the kernels use.
# -----------------------------------------------------------------------------
def _mm(a, w):
    return jnp.dot(a.astype(jnp.bfloat16), w.astype(jnp.bfloat16),
                   preferred_element_type=jnp.float32)


def reference(x_nchw, p):
    x = jnp.transpose(x_nchw, (0, 2, 3, 1)).astype(jnp.float32)
    N, H, W, Cin = x.shape
    C = p["w1"].shape[0]
    H2, W2 = 2 * H, 2 * W

    y = _mm(x.reshape(N * H * W, Cin), p["w_up"]) + p["b_up"]
    y = y.astype(jnp.bfloat16).astype(jnp.float32)            # kernel 1 writes bf16
    y = y.reshape(N, H, W, C, 2, 2)
    x0 = jnp.transpose(y, (0, 1, 4, 2, 5, 3)).reshape(N, H2, W2, C)
    x0f = x0.reshape(N * H2 * W2, C)

    t = _wsilu(_mm(x0f, p["w1"]) + p["b1"]).reshape(N, H2, W2, C)
    tp = jnp.pad(t, ((0, 0), (1, 1), (1, 1), (0, 0)))
    acc = jnp.zeros_like(t)
    for kh in range(3):
        for kw in range(3):
            acc = acc + tp[:, kh:kh + H2, kw:kw + W2, :] * p["kdw"][kh * 3 + kw]
    d = (acc + p["bdw"][0]).reshape(N * H2 * W2, C)
    out1 = _mm(d, p["w3"]) + p["b3"] + x0f

    u = _wsilu(_mm(out1, p["w4"]) + p["b4"])
    v = u[:, :2 * C] + u[:, 2 * C:]
    out2 = _mm(v, p["w5"]) + p["b5"] + out1

    out = (out2 + x0f).reshape(N, H2, W2, C)
    return jnp.transpose(out, (0, 3, 1, 2))


if __name__ == "__main__":
    key = jax.random.PRNGKey(0)
    kx, kp = jax.random.split(key)
    in_ch, out_ch = 4, 8
    x = jax.random.normal(kx, (2, in_ch, 16, 16), jnp.float32)   # NCHW, like PyTorch
    params = init_params(kp, in_ch, out_ch)

    ref = jax.block_until_ready(reference(x, params))

    # tile_rows=4 exercises multi-tile halos (top / interior / bottom); None uses auto tiling.
    for tr in (4, None):
        out = jax.block_until_ready(residual_block_upsample(x, params, tile_rows=tr))
        assert out.shape == (2, out_ch, 32, 32), out.shape
        assert out.dtype == jnp.float32, out.dtype
        max_err = float(jnp.max(jnp.abs(out - ref)))
        # Kernel 2 emits bf16 (then upcasts); tolerance covers that final rounding.
        assert jnp.allclose(out, ref, atol=1e-2, rtol=1e-2), \
            f"tile_rows={tr} max_err={max_err}"

    print("KERNEL_OK")
</pallas_src>

<mosaic_0001>
module attributes {stable_mosaic.version = 11 : i64} {
  func.func @_upconv_kernel(%arg0: i32, %arg1: i32, %arg2: memref<1x16x16x4xbf16, #tpu.memory_space<vmem>>, %arg3: memref<4x32xbf16, #tpu.memory_space<vmem>>, %arg4: memref<1x32xf32, #tpu.memory_space<vmem>>, %arg5: memref<1x16x2x16x16xbf16, #tpu.memory_space<vmem>>) attributes {dimension_semantics = [#tpu.dimension_semantics<parallel>, #tpu.dimension_semantics<parallel>], iteration_bounds = array<i64: 2, 1>, scalar_prefetch = 0 : i64, scratch_operands = 0 : i64, tpu.core_type = #tpu.core_type<tc>, window_params = [{transform_indices = @transform_0, window_bounds = array<i64: 1, 16, 16, 4>}, {pipeline_mode = #tpu.pipeline_mode<synchronous>, transform_indices = @transform_1, window_bounds = array<i64: 4, 32>}, {pipeline_mode = #tpu.pipeline_mode<synchronous>, transform_indices = @transform_2, window_bounds = array<i64: 1, 32>}, {transform_indices = @transform_3, window_bounds = array<i64: 1, 16, 2, 16, 16>}]} {
    %c0 = arith.constant 0 : index
    %c0_0 = arith.constant 0 : index
    %c0_1 = arith.constant 0 : index
    %c0_2 = arith.constant 0 : index
    %0 = vector.load %arg2[%c0, %c0_0, %c0_1, %c0_2] : memref<1x16x16x4xbf16, #tpu.memory_space<vmem>>, vector<1x16x16x4xbf16>
    %1 = vector.shape_cast %0 : vector<1x16x16x4xbf16> to vector<16x16x4xbf16>
    %2 = vector.shape_cast %1 : vector<16x16x4xbf16> to vector<256x4xbf16>
    %c0_3 = arith.constant 0 : index
    %c0_4 = arith.constant 0 : index
    %3 = vector.load %arg3[%c0_3, %c0_4] : memref<4x32xbf16, #tpu.memory_space<vmem>>, vector<4x32xbf16>
    %cst = arith.constant dense<0.000000e+00> : vector<256x32xf32>
    %4 = tpu.matmul %2, %3, %cst {dimension_numbers = #tpu.dot_dimension_numbers<[1], [0], [0], [1], [0, 0, 1, 1], [], []>} : vector<256x4xbf16>, vector<4x32xbf16>, vector<256x32xf32> -> vector<256x32xf32>
    %c0_5 = arith.constant 0 : index
    %c0_6 = arith.constant 0 : index
    %5 = vector.load %arg4[%c0_5, %c0_6] : memref<1x32xf32, #tpu.memory_space<vmem>>, vector<1x32xf32>
    %6 = vector.broadcast %5 : vector<1x32xf32> to vector<256x32xf32>
    %7 = arith.addf %4, %6 : vector<256x32xf32>
    %8 = arith.truncf %7 : vector<256x32xf32> to vector<256x32xbf16>
    %9 = vector.extract_strided_slice %8 {offsets = [0, 0], sizes = [256, 16], strides = [1, 1]} : vector<256x32xbf16> to vector<256x16xbf16>
    %10 = vector.shape_cast %9 : vector<256x16xbf16> to vector<16x16x16xbf16>
    %c0_7 = arith.constant 0 : index
    %c0_8 = arith.constant 0 : index
    %c0_9 = arith.constant 0 : index
    %c0_10 = arith.constant 0 : index
    %c0_11 = arith.constant 0 : index
    %11 = vector.load %arg5[%c0_7, %c0_8, %c0_9, %c0_10, %c0_11] : memref<1x16x2x16x16xbf16, #tpu.memory_space<vmem>>, vector<1x16x1x16x16xbf16>
    %12 = vector.shape_cast %11 : vector<1x16x1x16x16xbf16> to vector<16x16x16xbf16>
    %13 = vector.shape_cast %10 : vector<16x16x16xbf16> to vector<1x16x1x16x16xbf16>
    tpu.vector_store %arg5[%c0_7, %c0_8, %c0_9, %c0_10, %c0_11], %13 {strides = array<i32>} : memref<1x16x2x16x16xbf16, #tpu.memory_space<vmem>>, vector<1x16x1x16x16xbf16>,
    %14 = vector.extract_strided_slice %8 {offsets = [0, 16], sizes = [256, 16], strides = [1, 1]} : vector<256x32xbf16> to vector<256x16xbf16>
    %15 = vector.shape_cast %14 : vector<256x16xbf16> to vector<16x16x16xbf16>
    %c0_12 = arith.constant 0 : index
    %c0_13 = arith.constant 0 : index
    %c1 = arith.constant 1 : index
    %c0_14 = arith.constant 0 : index
    %c0_15 = arith.constant 0 : index
    %16 = vector.load %arg5[%c0_12, %c0_13, %c1, %c0_14, %c0_15] : memref<1x16x2x16x16xbf16, #tpu.memory_space<vmem>>, vector<1x16x1x16x16xbf16>
    %17 = vector.shape_cast %16 : vector<1x16x1x16x16xbf16> to vector<16x16x16xbf16>
    %18 = vector.shape_cast %15 : vector<16x16x16xbf16> to vector<1x16x1x16x16xbf16>
    tpu.vector_store %arg5[%c0_12, %c0_13, %c1, %c0_14, %c0_15], %18 {strides = array<i32>} : memref<1x16x2x16x16xbf16, #tpu.memory_space<vmem>>, vector<1x16x1x16x16xbf16>,
    return
  }
  func.func @transform_0(%arg0: i32, %arg1: i32) -> (i32, i32, i32, i32) {
    %c0_i32 = arith.constant 0 : i32
    %c0_i32_0 = arith.constant 0 : i32
    %c0_i32_1 = arith.constant 0 : i32
    return %arg0, %arg1, %c0_i32, %c0_i32_0 : i32, i32, i32, i32
  }
  func.func @transform_1(%arg0: i32, %arg1: i32) -> (i32, i32) {
    %c0_i32 = arith.constant 0 : i32
    %c0_i32_0 = arith.constant 0 : i32
    %c0_i32_1 = arith.constant 0 : i32
    return %c0_i32, %c0_i32_0 : i32, i32
  }
  func.func @transform_2(%arg0: i32, %arg1: i32) -> (i32, i32) {
    %c0_i32 = arith.constant 0 : i32
    %c0_i32_0 = arith.constant 0 : i32
    %c0_i32_1 = arith.constant 0 : i32
    return %c0_i32, %c0_i32_0 : i32, i32
  }
  func.func @transform_3(%arg0: i32, %arg1: i32) -> (i32, i32, i32, i32, i32) {
    %c0_i32 = arith.constant 0 : i32
    %c0_i32_0 = arith.constant 0 : i32
    %c0_i32_1 = arith.constant 0 : i32
    %c0_i32_2 = arith.constant 0 : i32
    return %arg0, %arg1, %c0_i32, %c0_i32_0, %c0_i32_1 : i32, i32, i32, i32, i32
  }
}

module attributes {stable_mosaic.version = 11 : i64} {
  func.func @_depth_conv_block_kernel(%arg0: i32, %arg1: i32, %arg2: memref<1x8x32x8xbf16, #tpu.memory_space<vmem>>, %arg3: memref<1x1x32x8xbf16, #tpu.memory_space<vmem>>, %arg4: memref<1x1x32x8xbf16, #tpu.memory_space<vmem>>, %arg5: memref<8x8xbf16, #tpu.memory_space<vmem>>, %arg6: memref<1x8xf32, #tpu.memory_space<vmem>>, %arg7: memref<9x8xf32, #tpu.memory_space<vmem>>, %arg8: memref<1x8xf32, #tpu.memory_space<vmem>>, %arg9: memref<8x8xbf16, #tpu.memory_space<vmem>>, %arg10: memref<1x8xf32, #tpu.memory_space<vmem>>, %arg11: memref<8x32xbf16, #tpu.memory_space<vmem>>, %arg12: memref<1x32xf32, #tpu.memory_space<vmem>>, %arg13: memref<16x8xbf16, #tpu.memory_space<vmem>>, %arg14: memref<1x8xf32, #tpu.memory_space<vmem>>, %arg15: memref<1x8x32x8xbf16, #tpu.memory_space<vmem>>, %arg16: memref<320x8xf32, #tpu.memory_space<vmem>>) attributes {dimension_semantics = [#tpu.dimension_semantics<parallel>, #tpu.dimension_semantics<parallel>], iteration_bounds = array<i64: 2, 4>, scalar_prefetch = 0 : i64, scratch_operands = 1 : i64, tpu.core_type = #tpu.core_type<tc>, window_params = [{transform_indices = @transform_0, window_bounds = array<i64: 1, 8, 32, 8>}, {transform_indices = @transform_1, window_bounds = array<i64: 1, 1, 32, 8>}, {transform_indices = @transform_2, window_bounds = array<i64: 1, 1, 32, 8>}, {pipeline_mode = #tpu.pipeline_mode<synchronous>, transform_indices = @transform_3, window_bounds = array<i64: 8, 8>}, {pipeline_mode = #tpu.pipeline_mode<synchronous>, transform_indices = @transform_4, window_bounds = array<i64: 1, 8>}, {pipeline_mode = #tpu.pipeline_mode<synchronous>, transform_indices = @transform_5, window_bounds = array<i64: 9, 8>}, {pipeline_mode = #tpu.pipeline_mode<synchronous>, transform_indices = @transform_6, window_bounds = array<i64: 1, 8>}, {pipeline_mode = #tpu.pipeline_mode<synchronous>, transform_indices = @transform_7, window_bounds = array<i64: 8, 8>}, {pipeline_mode = #tpu.pipeline_mode<synchronous>, transform_indices = @transform_8, window_bounds = array<i64: 1, 8>}, {pipeline_mode = #tpu.pipeline_mode<synchronous>, transform_indices = @transform_9, window_bounds = array<i64: 8, 32>}, {pipeline_mode = #tpu.pipeline_mode<synchronous>, transform_indices = @transform_10, window_bounds = array<i64: 1, 32>}, {pipeline_mode = #tpu.pipeline_mode<synchronous>, transform_indices = @transform_11, window_bounds = array<i64: 16, 8>}, {pipeline_mode = #tpu.pipeline_mode<synchronous>, transform_indices = @transform_12, window_bounds = array<i64: 1, 8>}, {transform_indices = @transform_13, window_bounds = array<i64: 1, 8, 32, 8>}]} {
    %c0_i32 = arith.constant 0 : i32
    %0 = arith.cmpi sgt, %arg1, %c0_i32 : i32
    %1 = arith.extui %0 : i1 to i32
    %2 = arith.sitofp %1 : i32 to f32
    %c3_i32 = arith.constant 3 : i32
    %3 = arith.cmpi slt, %arg1, %c3_i32 : i32
    %4 = arith.extui %3 : i1 to i32
    %5 = arith.sitofp %4 : i32 to f32
    %c0 = arith.constant 0 : index
    %c0_0 = arith.constant 0 : index
    %c0_1 = arith.constant 0 : index
    %c0_2 = arith.constant 0 : index
    %6 = vector.load %arg2[%c0, %c0_0, %c0_1, %c0_2] : memref<1x8x32x8xbf16, #tpu.memory_space<vmem>>, vector<1x8x32x8xbf16>
    %7 = vector.shape_cast %6 : vector<1x8x32x8xbf16> to vector<8x32x8xbf16>
    %8 = vector.shape_cast %7 : vector<8x32x8xbf16> to vector<256x8xbf16>
    %9 = arith.extf %8 : vector<256x8xbf16> to vector<256x8xf32>
    %c0_3 = arith.constant 0 : index
    %c0_4 = arith.constant 0 : index
    %10 = vector.load %arg5[%c0_3, %c0_4] : memref<8x8xbf16, #tpu.memory_space<vmem>>, vector<8x8xbf16>
    %c0_5 = arith.constant 0 : index
    %c0_6 = arith.constant 0 : index
    %11 = vector.load %arg6[%c0_5, %c0_6] : memref<1x8xf32, #tpu.memory_space<vmem>>, vector<1x8xf32>
    %cst = arith.constant dense<0.000000e+00> : vector<256x8xf32>
    %12 = tpu.matmul %8, %10, %cst {dimension_numbers = #tpu.dot_dimension_numbers<[1], [0], [0], [1], [0, 0, 1, 1], [], []>} : vector<256x8xbf16>, vector<8x8xbf16>, vector<256x8xf32> -> vector<256x8xf32>
    %13 = vector.broadcast %11 : vector<1x8xf32> to vector<256x8xf32>
    %14 = arith.addf %12, %13 : vector<256x8xf32>
    %cst_7 = arith.constant 4.000000e+00 : f32
    %15 = vector.broadcast %cst_7 : f32 to vector<256x8xf32>
    %16 = arith.mulf %15, %14 : vector<256x8xf32>
    %17 = arith.negf %16 : vector<256x8xf32>
    %18 = math.exp %17 : vector<256x8xf32>
    %cst_8 = arith.constant 1.000000e+00 : f32
    %19 = vector.broadcast %cst_8 : f32 to vector<256x8xf32>
    %20 = arith.addf %19, %18 : vector<256x8xf32>
    %21 = arith.divf %19, %20 : vector<256x8xf32>
    %22 = arith.mulf %21, %14 : vector<256x8xf32>
    %c0_9 = arith.constant 0 : index
    %c0_10 = arith.constant 0 : index
    %c0_11 = arith.constant 0 : index
    %c0_12 = arith.constant 0 : index
    %23 = vector.load %arg3[%c0_9, %c0_10, %c0_11, %c0_12] : memref<1x1x32x8xbf16, #tpu.memory_space<vmem>>, vector<1x1x32x8xbf16>
    %24 = vector.shape_cast %23 : vector<1x1x32x8xbf16> to vector<32x8xbf16>
    %cst_13 = arith.constant dense<0.000000e+00> : vector<32x8xf32>
    %25 = tpu.matmul %24, %10, %cst_13 {dimension_numbers = #tpu.dot_dimension_numbers<[1], [0], [0], [1], [0, 0, 1, 1], [], []>} : vector<32x8xbf16>, vector<8x8xbf16>, vector<32x8xf32> -> vector<32x8xf32>
    %26 = vector.broadcast %11 : vector<1x8xf32> to vector<32x8xf32>
    %27 = arith.addf %25, %26 : vector<32x8xf32>
    %cst_14 = arith.constant 4.000000e+00 : f32
    %28 = vector.broadcast %cst_14 : f32 to vector<32x8xf32>
    %29 = arith.mulf %28, %27 : vector<32x8xf32>
    %30 = arith.negf %29 : vector<32x8xf32>
    %31 = math.exp %30 : vector<32x8xf32>
    %cst_15 = arith.constant 1.000000e+00 : f32
    %32 = vector.broadcast %cst_15 : f32 to vector<32x8xf32>
    %33 = arith.addf %32, %31 : vector<32x8xf32>
    %34 = arith.divf %32, %33 : vector<32x8xf32>
    %35 = arith.mulf %34, %27 : vector<32x8xf32>
    %36 = vector.broadcast %2 : f32 to vector<32x8xf32>
    %37 = arith.mulf %35, %36 : vector<32x8xf32>
    %c0_16 = arith.constant 0 : index
    %c0_17 = arith.constant 0 : index
    %c0_18 = arith.constant 0 : index
    %c0_19 = arith.constant 0 : index
    %38 = vector.load %arg4[%c0_16, %c0_17, %c0_18, %c0_19] : memref<1x1x32x8xbf16, #tpu.memory_space<vmem>>, vector<1x1x32x8xbf16>
    %39 = vector.shape_cast %38 : vector<1x1x32x8xbf16> to vector<32x8xbf16>
    %cst_20 = arith.constant dense<0.000000e+00> : vector<32x8xf32>
    %40 = tpu.matmul %39, %10, %cst_20 {dimension_numbers = #tpu.dot_dimension_numbers<[1], [0], [0], [1], [0, 0, 1, 1], [], []>} : vector<32x8xbf16>, vector<8x8xbf16>, vector<32x8xf32> -> vector<32x8xf32>
    %41 = vector.broadcast %11 : vector<1x8xf32> to vector<32x8xf32>
    %42 = arith.addf %40, %41 : vector<32x8xf32>
    %cst_21 = arith.constant 4.000000e+00 : f32
    %43 = vector.broadcast %cst_21 : f32 to vector<32x8xf32>
    %44 = arith.mulf %43, %42 : vector<32x8xf32>
    %45 = arith.negf %44 : vector<32x8xf32>
    %46 = math.exp %45 : vector<32x8xf32>
    %cst_22 = arith.constant 1.000000e+00 : f32
    %47 = vector.broadcast %cst_22 : f32 to vector<32x8xf32>
    %48 = arith.addf %47, %46 : vector<32x8xf32>
    %49 = arith.divf %47, %48 : vector<32x8xf32>
    %50 = arith.mulf %49, %42 : vector<32x8xf32>
    %51 = vector.broadcast %5 : f32 to vector<32x8xf32>
    %52 = arith.mulf %50, %51 : vector<32x8xf32>
    %c0_23 = arith.constant 0 : index
    %c0_24 = arith.constant 0 : index
    %53 = vector.load %arg16[%c0_23, %c0_24] : memref<320x8xf32, #tpu.memory_space<vmem>>, vector<32x8xf32>
    tpu.vector_store %arg16[%c0_23, %c0_24], %37 {strides = array<i32>} : memref<320x8xf32, #tpu.memory_space<vmem>>, vector<32x8xf32>,
    %c32 = arith.constant 32 : index
    %c0_25 = arith.constant 0 : index
    %54 = vector.load %arg16[%c32, %c0_25] : memref<320x8xf32, #tpu.memory_space<vmem>>, vector<256x8xf32>
    tpu.vector_store %arg16[%c32, %c0_25], %22 {strides = array<i32>} : memref<320x8xf32, #tpu.memory_space<vmem>>, vector<256x8xf32>,
    %c288 = arith.constant 288 : index
    %c0_26 = arith.constant 0 : index
    %55 = vector.load %arg16[%c288, %c0_26] : memref<320x8xf32, #tpu.memory_space<vmem>>, vector<32x8xf32>
    tpu.vector_store %arg16[%c288, %c0_26], %52 {strides = array<i32>} : memref<320x8xf32, #tpu.memory_space<vmem>>, vector<32x8xf32>,
    %56 = tpu.iota {dimensions = array<i32: 1>} : vector<8x32x1xi32>
    %57 = vector.shape_cast %56 : vector<8x32x1xi32> to vector<256x1xi32>
    %c0_i32_27 = arith.constant 0 : i32
    %58 = vector.broadcast %c0_i32_27 : i32 to vector<256x1xi32>
    %59 = arith.cmpi sgt, %57, %58 : vector<256x1xi32>
    %60 = arith.extui %59 : vector<256x1xi1> to vector<256x1xi32>
    %61 = arith.sitofp %60 : vector<256x1xi32> to vector<256x1xf32>
    %c31_i32 = arith.constant 31 : i32
    %62 = vector.broadcast %c31_i32 : i32 to vector<256x1xi32>
    %63 = arith.cmpi slt, %57, %62 : vector<256x1xi32>
    %64 = arith.extui %63 : vector<256x1xi1> to vector<256x1xi32>
    %65 = arith.sitofp %64 : vector<256x1xi32> to vector<256x1xf32>
    %c0_28 = arith.constant 0 : index
    %c0_29 = arith.constant 0 : index
    %66 = vector.load %arg7[%c0_28, %c0_29] : memref<9x8xf32, #tpu.memory_space<vmem>>, vector<9x8xf32>
    %cst_30 = arith.constant 0.000000e+00 : f32
    %67 = vector.broadcast %cst_30 : f32 to vector<256x8xf32>
    %c0_31 = arith.constant 0 : index
    %c0_32 = arith.constant 0 : index
    %68 = vector.load %arg16[%c0_31, %c0_32] : memref<320x8xf32, #tpu.memory_space<vmem>>, vector<256x8xf32>
    %c1_i32 = arith.constant 1 : i32
    %69 = tpu.dynamic_rotate %68 by %c1_i32 dim 0 : vector<256x8xf32>, i32 -> vector<256x8xf32>
    %70 = vector.broadcast %61 : vector<256x1xf32> to vector<256x8xf32>
    %71 = arith.mulf %69, %70 : vector<256x8xf32>
    %72 = vector.extract_strided_slice %66 {offsets = [0, 0], sizes = [1, 8], strides = [1, 1]} : vector<9x8xf32> to vector<1x8xf32>
    %73 = vector.broadcast %72 : vector<1x8xf32> to vector<256x8xf32>
    %74 = arith.mulf %71, %73 : vector<256x8xf32>
    %75 = arith.addf %67, %74 : vector<256x8xf32>
    %76 = vector.extract_strided_slice %66 {offsets = [1, 0], sizes = [1, 8], strides = [1, 1]} : vector<9x8xf32> to vector<1x8xf32>
    %77 = vector.broadcast %76 : vector<1x8xf32> to vector<256x8xf32>
    %78 = arith.mulf %68, %77 : vector<256x8xf32>
    %79 = arith.addf %75, %78 : vector<256x8xf32>
    %c255_i32 = arith.constant 255 : i32
    %80 = tpu.dynamic_rotate %68 by %c255_i32 dim 0 : vector<256x8xf32>, i32 -> vector<256x8xf32>
    %81 = vector.broadcast %65 : vector<256x1xf32> to vector<256x8xf32>
    %82 = arith.mulf %80, %81 : vector<256x8xf32>
    %83 = vector.extract_strided_slice %66 {offsets = [2, 0], sizes = [1, 8], strides = [1, 1]} : vector<9x8xf32> to vector<1x8xf32>
    %84 = vector.broadcast %83 : vector<1x8xf32> to vector<256x8xf32>
    %85 = arith.mulf %82, %84 : vector<256x8xf32>
    %86 = arith.addf %79, %85 : vector<256x8xf32>
    %c32_33 = arith.constant 32 : index
    %c0_34 = arith.constant 0 : index
    %87 = vector.load %arg16[%c32_33, %c0_34] : memref<320x8xf32, #tpu.memory_space<vmem>>, vector<256x8xf32>
    %c1_i32_35 = arith.constant 1 : i32
    %88 = tpu.dynamic_rotate %87 by %c1_i32_35 dim 0 : vector<256x8xf32>, i32 -> vector<256x8xf32>
    %89 = vector.broadcast %61 : vector<256x1xf32> to vector<256x8xf32>
    %90 = arith.mulf %88, %89 : vector<256x8xf32>
    %91 = vector.extract_strided_slice %66 {offsets = [3, 0], sizes = [1, 8], strides = [1, 1]} : vector<9x8xf32> to vector<1x8xf32>
    %92 = vector.broadcast %91 : vector<1x8xf32> to vector<256x8xf32>
    %93 = arith.mulf %90, %92 : vector<256x8xf32>
    %94 = arith.addf %86, %93 : vector<256x8xf32>
    %95 = vector.extract_strided_slice %66 {offsets = [4, 0], sizes = [1, 8], strides = [1, 1]} : vector<9x8xf32> to vector<1x8xf32>
    %96 = vector.broadcast %95 : vector<1x8xf32> to vector<256x8xf32>
    %97 = arith.mulf %87, %96 : vector<256x8xf32>
    %98 = arith.addf %94, %97 : vector<256x8xf32>
    %c255_i32_36 = arith.constant 255 : i32
    %99 = tpu.dynamic_rotate %87 by %c255_i32_36 dim 0 : vector<256x8xf32>, i32 -> vector<256x8xf32>
    %100 = vector.broadcast %65 : vector<256x1xf32> to vector<256x8xf32>
    %101 = arith.mulf %99, %100 : vector<256x8xf32>
    %102 = vector.extract_strided_slice %66 {offsets = [5, 0], sizes = [1, 8], strides = [1, 1]} : vector<9x8xf32> to vector<1x8xf32>
    %103 = vector.broadcast %102 : vector<1x8xf32> to vector<256x8xf32>
    %104 = arith.mulf %101, %103 : vector<256x8xf32>
    %105 = arith.addf %98, %104 : vector<256x8xf32>
    %c64 = arith.constant 64 : index
    %c0_37 = arith.constant 0 : index
    %106 = vector.load %arg16[%c64, %c0_37] : memref<320x8xf32, #tpu.memory_space<vmem>>, vector<256x8xf32>
    %c1_i32_38 = arith.constant 1 : i32
    %107 = tpu.dynamic_rotate %106 by %c1_i32_38 dim 0 : vector<256x8xf32>, i32 -> vector<256x8xf32>
    %108 = vector.broadcast %61 : vector<256x1xf32> to vector<256x8xf32>
    %109 = arith.mulf %107, %108 : vector<256x8xf32>
    %110 = vector.extract_strided_slice %66 {offsets = [6, 0], sizes = [1, 8], strides = [1, 1]} : vector<9x8xf32> to vector<1x8xf32>
    %111 = vector.broadcast %110 : vector<1x8xf32> to vector<256x8xf32>
    %112 = arith.mulf %109, %111 : vector<256x8xf32>
    %113 = arith.addf %105, %112 : vector<256x8xf32>
    %114 = vector.extract_strided_slice %66 {offsets = [7, 0], sizes = [1, 8], strides = [1, 1]} : vector<9x8xf32> to vector<1x8xf32>
    %115 = vector.broadcast %114 : vector<1x8xf32> to vector<256x8xf32>
    %116 = arith.mulf %106, %115 : vector<256x8xf32>
    %117 = arith.addf %113, %116 : vector<256x8xf32>
    %c255_i32_39 = arith.constant 255 : i32
    %118 = tpu.dynamic_rotate %106 by %c255_i32_39 dim 0 : vector<256x8xf32>, i32 -> vector<256x8xf32>
    %119 = vector.broadcast %65 : vector<256x1xf32> to vector<256x8xf32>
    %120 = arith.mulf %118, %119 : vector<256x8xf32>
    %121 = vector.extract_strided_slice %66 {offsets = [8, 0], sizes = [1, 8], strides = [1, 1]} : vector<9x8xf32> to vector<1x8xf32>
    %122 = vector.broadcast %121 : vector<1x8xf32> to vector<256x8xf32>
    %123 = arith.mulf %120, %122 : vector<256x8xf32>
    %124 = arith.addf %117, %123 : vector<256x8xf32>
    %c0_40 = arith.constant 0 : index
    %c0_41 = arith.constant 0 : index
    %125 = vector.load %arg8[%c0_40, %c0_41] : memref<1x8xf32, #tpu.memory_space<vmem>>, vector<1x8xf32>
    %126 = vector.broadcast %125 : vector<1x8xf32> to vector<256x8xf32>
    %127 = arith.addf %124, %126 : vector<256x8xf32>
    %128 = arith.truncf %127 : vector<256x8xf32> to vector<256x8xbf16>
    %c0_42 = arith.constant 0 : index
    %c0_43 = arith.constant 0 : index
    %129 = vector.load %arg9[%c0_42, %c0_43] : memref<8x8xbf16, #tpu.memory_space<vmem>>, vector<8x8xbf16>
    %cst_44 = arith.constant dense<0.000000e+00> : vector<256x8xf32>
    %130 = tpu.matmul %128, %129, %cst_44 {dimension_numbers = #tpu.dot_dimension_numbers<[1], [0], [0], [1], [0, 0, 1, 1], [], []>} : vector<256x8xbf16>, vector<8x8xbf16>, vector<256x8xf32> -> vector<256x8xf32>
    %c0_45 = arith.constant 0 : index
    %c0_46 = arith.constant 0 : index
    %131 = vector.load %arg10[%c0_45, %c0_46] : memref<1x8xf32, #tpu.memory_space<vmem>>, vector<1x8xf32>
    %132 = vector.broadcast %131 : vector<1x8xf32> to vector<256x8xf32>
    %133 = arith.addf %130, %132 : vector<256x8xf32>
    %134 = arith.addf %133, %9 : vector<256x8xf32>
    %135 = arith.truncf %134 : vector<256x8xf32> to vector<256x8xbf16>
    %c0_47 = arith.constant 0 : index
    %c0_48 = arith.constant 0 : index
    %136 = vector.load %arg11[%c0_47, %c0_48] : memref<8x32xbf16, #tpu.memory_space<vmem>>, vector<8x32xbf16>
    %cst_49 = arith.constant dense<0.000000e+00> : vector<256x32xf32>
    %137 = tpu.matmul %135, %136, %cst_49 {dimension_numbers = #tpu.dot_dimension_numbers<[1], [0], [0], [1], [0, 0, 1, 1], [], []>} : vector<256x8xbf16>, vector<8x32xbf16>, vector<256x32xf32> -> vector<256x32xf32>
    %c0_50 = arith.constant 0 : index
    %c0_51 = arith.constant 0 : index
    %138 = vector.load %arg12[%c0_50, %c0_51] : memref<1x32xf32, #tpu.memory_space<vmem>>, vector<1x32xf32>
    %139 = vector.broadcast %138 : vector<1x32xf32> to vector<256x32xf32>
    %140 = arith.addf %137, %139 : vector<256x32xf32>
    %cst_52 = arith.constant 4.000000e+00 : f32
    %141 = vector.broadcast %cst_52 : f32 to vector<256x32xf32>
    %142 = arith.mulf %141, %140 : vector<256x32xf32>
    %143 = arith.negf %142 : vector<256x32xf32>
    %144 = math.exp %143 : vector<256x32xf32>
    %cst_53 = arith.constant 1.000000e+00 : f32
    %145 = vector.broadcast %cst_53 : f32 to vector<256x32xf32>
    %146 = arith.addf %145, %144 : vector<256x32xf32>
    %147 = arith.divf %145, %146 : vector<256x32xf32>
    %148 = arith.mulf %147, %140 : vector<256x32xf32>
    %149 = vector.extract_strided_slice %148 {offsets = [0, 0], sizes = [256, 16], strides = [1, 1]} : vector<256x32xf32> to vector<256x16xf32>
    %150 = vector.extract_strided_slice %148 {offsets = [0, 16], sizes = [256, 16], strides = [1, 1]} : vector<256x32xf32> to vector<256x16xf32>
    %151 = arith.addf %149, %150 : vector<256x16xf32>
    %152 = arith.truncf %151 : vector<256x16xf32> to vector<256x16xbf16>
    %c0_54 = arith.constant 0 : index
    %c0_55 = arith.constant 0 : index
    %153 = vector.load %arg13[%c0_54, %c0_55] : memref<16x8xbf16, #tpu.memory_space<vmem>>, vector<16x8xbf16>
    %cst_56 = arith.constant dense<0.000000e+00> : vector<256x8xf32>
    %154 = tpu.matmul %152, %153, %cst_56 {dimension_numbers = #tpu.dot_dimension_numbers<[1], [0], [0], [1], [0, 0, 1, 1], [], []>} : vector<256x16xbf16>, vector<16x8xbf16>, vector<256x8xf32> -> vector<256x8xf32>
    %c0_57 = arith.constant 0 : index
    %c0_58 = arith.constant 0 : index
    %155 = vector.load %arg14[%c0_57, %c0_58] : memref<1x8xf32, #tpu.memory_space<vmem>>, vector<1x8xf32>
    %156 = vector.broadcast %155 : vector<1x8xf32> to vector<256x8xf32>
    %157 = arith.addf %154, %156 : vector<256x8xf32>
    %158 = arith.addf %157, %134 : vector<256x8xf32>
    %159 = arith.addf %158, %9 : vector<256x8xf32>
    %160 = arith.truncf %159 : vector<256x8xf32> to vector<256x8xbf16>
    %161 = vector.shape_cast %160 : vector<256x8xbf16> to vector<8x32x8xbf16>
    %c0_59 = arith.constant 0 : index
    %c0_60 = arith.constant 0 : index
    %c0_61 = arith.constant 0 : index
    %c0_62 = arith.constant 0 : index
    %162 = vector.load %arg15[%c0_59, %c0_60, %c0_61, %c0_62] : memref<1x8x32x8xbf16, #tpu.memory_space<vmem>>, vector<1x8x32x8xbf16>
    %163 = vector.shape_cast %162 : vector<1x8x32x8xbf16> to vector<8x32x8xbf16>
    %164 = vector.shape_cast %161 : vector<8x32x8xbf16> to vector<1x8x32x8xbf16>
    tpu.vector_store %arg15[%c0_59, %c0_60, %c0_61, %c0_62], %164 {strides = array<i32>} : memref<1x8x32x8xbf16, #tpu.memory_space<vmem>>, vector<1x8x32x8xbf16>,
    return
  }
  func.func @transform_0(%arg0: i32, %arg1: i32) -> (i32, i32, i32, i32) {
    %c0_i32 = arith.constant 0 : i32
    %c0_i32_0 = arith.constant 0 : i32
    %c0_i32_1 = arith.constant 0 : i32
    return %arg0, %arg1, %c0_i32, %c0_i32_0 : i32, i32, i32, i32
  }
  func.func @transform_1(%arg0: i32, %arg1: i32) -> (i32, i32, i32, i32) {
    %c8_i32 = arith.constant 8 : i32
    %0 = arith.muli %arg1, %c8_i32 : i32
    %c1_i32 = arith.constant 1 : i32
    %1 = arith.subi %0, %c1_i32 : i32
    %c0_i32 = arith.constant 0 : i32
    %2 = arith.maxsi %1, %c0_i32 : i32
    %c0_i32_0 = arith.constant 0 : i32
    %c0_i32_1 = arith.constant 0 : i32
    %c0_i32_2 = arith.constant 0 : i32
    return %arg0, %2, %c0_i32_0, %c0_i32_1 : i32, i32, i32, i32
  }
  func.func @transform_2(%arg0: i32, %arg1: i32) -> (i32, i32, i32, i32) {
    %c1_i32 = arith.constant 1 : i32
    %0 = arith.addi %arg1, %c1_i32 : i32
    %c8_i32 = arith.constant 8 : i32
    %1 = arith.muli %0, %c8_i32 : i32
    %c31_i32 = arith.constant 31 : i32
    %2 = arith.minsi %1, %c31_i32 : i32
    %c0_i32 = arith.constant 0 : i32
    %c0_i32_0 = arith.constant 0 : i32
    %c0_i32_1 = arith.constant 0 : i32
    return %arg0, %2, %c0_i32, %c0_i32_0 : i32, i32, i32, i32
  }
  func.func @transform_3(%arg0: i32, %arg1: i32) -> (i32, i32) {
    %c0_i32 = arith.constant 0 : i32
    %c0_i32_0 = arith.constant 0 : i32
    %c0_i32_1 = arith.constant 0 : i32
    return %c0_i32, %c0_i32_0 : i32, i32
  }
  func.func @transform_4(%arg0: i32, %arg1: i32) -> (i32, i32) {
    %c0_i32 = arith.constant 0 : i32
    %c0_i32_0 = arith.constant 0 : i32
    %c0_i32_1 = arith.constant 0 : i32
    return %c0_i32, %c0_i32_0 : i32, i32
  }
  func.func @transform_5(%arg0: i32, %arg1: i32) -> (i32, i32) {
    %c0_i32 = arith.constant 0 : i32
    %c0_i32_0 = arith.constant 0 : i32
    %c0_i32_1 = arith.constant 0 : i32
    return %c0_i32, %c0_i32_0 : i32, i32
  }
  func.func @transform_6(%arg0: i32, %arg1: i32) -> (i32, i32) {
    %c0_i32 = arith.constant 0 : i32
    %c0_i32_0 = arith.constant 0 : i32
    %c0_i32_1 = arith.constant 0 : i32
    return %c0_i32, %c0_i32_0 : i32, i32
  }
  func.func @transform_7(%arg0: i32, %arg1: i32) -> (i32, i32) {
    %c0_i32 = arith.constant 0 : i32
    %c0_i32_0 = arith.constant 0 : i32
    %c0_i32_1 = arith.constant 0 : i32
    return %c0_i32, %c0_i32_0 : i32, i32
  }
  func.func @transform_8(%arg0: i32, %arg1: i32) -> (i32, i32) {
    %c0_i32 = arith.constant 0 : i32
    %c0_i32_0 = arith.constant 0 : i32
    %c0_i32_1 = arith.constant 0 : i32
    return %c0_i32, %c0_i32_0 : i32, i32
  }
  func.func @transform_9(%arg0: i32, %arg1: i32) -> (i32, i32) {
    %c0_i32 = arith.constant 0 : i32
    %c0_i32_0 = arith.constant 0 : i32
    %c0_i32_1 = arith.constant 0 : i32
    return %c0_i32, %c0_i32_0 : i32, i32
  }
  func.func @transform_10(%arg0: i32, %arg1: i32) -> (i32, i32) {
    %c0_i32 = arith.constant 0 : i32
    %c0_i32_0 = arith.constant 0 : i32
    %c0_i32_1 = arith.constant 0 : i32
    return %c0_i32, %c0_i32_0 : i32, i32
  }
  func.func @transform_11(%arg0: i32, %arg1: i32) -> (i32, i32) {
    %c0_i32 = arith.constant 0 : i32
    %c0_i32_0 = arith.constant 0 : i32
    %c0_i32_1 = arith.constant 0 : i32
    return %c0_i32, %c0_i32_0 : i32, i32
  }
  func.func @transform_12(%arg0: i32, %arg1: i32) -> (i32, i32) {
    %c0_i32 = arith.constant 0 : i32
    %c0_i32_0 = arith.constant 0 : i32
    %c0_i32_1 = arith.constant 0 : i32
    return %c0_i32, %c0_i32_0 : i32, i32
  }
  func.func @transform_13(%arg0: i32, %arg1: i32) -> (i32, i32, i32, i32) {
    %c0_i32 = arith.constant 0 : i32
    %c0_i32_0 = arith.constant 0 : i32
    %c0_i32_1 = arith.constant 0 : i32
    return %arg0, %arg1, %c0_i32, %c0_i32_0 : i32, i32, i32, i32
  }
}

</mosaic_0001>

<bundles_post_ra>
// kernel: residual_block_upsample.2
= control target key start
LH: loop header
LB: loop body
LE: loop exit
PB: predicated region body
PF: predicated region fallthrough
CT: control target
= control target key end

     0   :  { %s1219_s12 = smov 0   ;;  %s1221_s13 = smov 0   ;;  %s1516_s0 = inlined_call_operand.vmem [shape: bf16[2,16,16,4], index: 0, kind: input, shape index: {}]   ;;  %s1517_s1 = inlined_call_operand.vmem [shape: bf16[4,32], index: 1, kind: input, shape index: {}]   ;;  %s1518_s2 = inlined_call_operand.vmem [shape: f32[1,32], index: 2, kind: input, shape index: {}]   ;;  %s1519_s3 = inlined_call_operand.vmem [shape: bf16[2,16,2,16,16], index: 3, kind: output, shape index: {}]  }
   0x1   :  { %s1223_s14 = smov 0  }
   0x2 LB: > { %s25_s15 = sadd.s32 1, %s1192_s13  ;;  %p940_p0 = scmp.ge.s32.totalorder %s1196_s14, 1  ;;  %s1196_s14 = sphi %s1223_s14, %s13_s14   ;;  %s1192_s13 = sphi %s1221_s13, %s1521_s13   ;;  %s1188_s12 = sphi %s1219_s12, %s1520_s12  }
   0x3   : > { %p27_p1 = scmp.ge.s32.totalorder %s25_s15, 2  ;;  %p159_p2 = scmp.lt.s32.totalorder %s1196_s14, 3 }
   0x5   : > { %s1523_s15 = smov (%p27_p1, %s25_s15), 0  ;;  %p160_p3 = pnand %p940_p0, %p159_p2 }
   0x6   : > { %v248_v0 = vld [vmem:[%s1517_s1] sm:$0x3] (!%p160_p3)  ;;  %vm385_vm0 = vcmask (!%p160_p3), 1041408   ;;  %p194_p4 = scmp.lt.s32.totalorder (!%p160_p3), %s1188_s12, 1  ;;  %vm336_vm1 = vcmask (!%p160_p3), 31744   ;;  %vm678_vm2 = vcmask (!%p160_p3), 125952  }
   0x7   : > { %163 = sbr.rel (%p160_p3) target bundleno = 412 (0x19c), region = 32  ;;  %1131 = vmatprep.subr.msk.bf16.mxu0 (!%p160_p3), %vm385_vm0, %v248_v0  ;;  %1132 = vmatprep.subr.msk.bf16.mxu1 (!%p160_p3), %vm385_vm0, %v248_v0  ;;  %v387_v1 = vsel (!%p160_p3), %vm385_vm0, %v248_v0, 0  ;;  %v1283_v18 = vld [vmem:[%s1518_s2] ss:$0 sm:$0xff] (!%p160_p3)  ;;  %s1198_s28 = smov (!%p160_p3), 112  }
   0x8   : > { %1096 = vmatpush3.bf16.msra.mxu0 (!%p160_p3), %v387_v1  ;;  %1130 = vmatpush3.bf16.msra.mxu1 (!%p160_p3), %v387_v1 }
   0xe   : > { %s1525_s12 = smov (!%p194_p4, %s1188_s12), 1 }
   0xf   : > { %s1044_s18 = sshll.u32 %s1525_s12, 7  ;;  %s1045_s24 = sshll.u32 %s1525_s12, 8 }
  0x10   : > { %s1246_s21 = scalar_lea.vmem %s1516_s0, %s1044_s18  ;;  %s1290_s27 = scalar_lea.vmem %s1519_s3, %s1045_s24 }
  0x11   : > { %v1158_v2 = vld [vmem:[%s1246_s21] sm:$0xff]   ;;  %v1160_v4 = vld [vmem:[%s1246_s21 + $0x8] sm:$0xff]   ;;  %v1162_v6 = vld [vmem:[%s1246_s21 + $0x10] sm:$0xff]  }
  0x12   : > { %v1159_v3 = vld [vmem:[%s1246_s21 + $0x40] sm:$0xff]   ;;  %1097 = vmatprep.mubr.msk.bf16.mxu0 %vm336_vm1, %v1158_v2  ;;  %v1161_v5 = vld [vmem:[%s1246_s21 + $0x48] sm:$0xff]   ;;  %v1164_v7 = vld [vmem:[%s1246_s21 + $0x50] sm:$0xff]  }
  0x13   : > { %1113 = vmatprep.mubr.msk.bf16.mxu1 %vm336_vm1, %v1159_v3  ;;  %1098 = vmatmul.mubr.msk.bf16.vlgmr.msra.gmra.mrb[0].mxu0 %vm336_vm1, %v1160_v4  ;;  %v1163_v8 = vld [vmem:[%s1246_s21 + $0x18] sm:$0xff]   ;;  %v1166_v10 = vld [vmem:[%s1246_s21 + $0x20] sm:$0xff]   ;;  %v1167_v12 = vld [vmem:[%s1246_s21 + $0x28] sm:$0xff]  }
  0x14   : > { %1114 = vmatmul.mubr.msk.bf16.vlgmr.msra.gmra.mrb[0].mxu1 %vm336_vm1, %v1161_v5  ;;  %1101 = vmatprep.mubr.msk.bf16.mxu0 %vm336_vm1, %v1162_v6  ;;  %v1165_v9 = vld [vmem:[%s1246_s21 + $0x58] sm:$0xff]   ;;  %v1168_v11 = vld [vmem:[%s1246_s21 + $0x60] sm:$0xff]   ;;  %v1169_v13 = vld [vmem:[%s1246_s21 + $0x68] sm:$0xff]  }
  0x15   : > { %1117 = vmatprep.mubr.msk.bf16.mxu1 %vm336_vm1, %v1164_v7  ;;  %v1170_v14 = vld [vmem:[%s1246_s21 + $0x30] sm:$0xff]   ;;  %v1171_v16 = vld [vmem:[%s1246_s21 + $0x38] sm:$0xff]  }
  0x16   : > { %v1172_v15 = vld [vmem:[%s1246_s21 + $0x70] sm:$0xff]   ;;  %v1173_v17 = vld [vmem:[%s1246_s21 + $0x78] sm:$0xff]  }
  0x1b   : > { %1102 = vmatmul.mubr.msk.bf16.gmra.mrb[4].mxu0 %vm336_vm1, %v1163_v8 }
  0x1c   : > { %1118 = vmatmul.mubr.msk.bf16.gmra.mrb[4].mxu1 %vm336_vm1, %v1165_v9  ;;  %1105 = vmatprep.mubr.msk.bf16.mxu0 %vm336_vm1, %v1166_v10 }
  0x1d   : > { %1121 = vmatprep.mubr.msk.bf16.mxu1 %vm336_vm1, %v1168_v11 }
  0x23   : > { %1106 = vmatmul.mubr.msk.bf16.gmra.mrb[8].mxu0 %vm336_vm1, %v1167_v12 }
  0x24   : > { %1122 = vmatmul.mubr.msk.bf16.gmra.mrb[8].mxu1 %vm336_vm1, %v1169_v13  ;;  %1109 = vmatprep.mubr.msk.bf16.mxu0 %vm336_vm1, %v1170_v14 }
  0x25   : > { %1125 = vmatprep.mubr.msk.bf16.mxu1 %vm336_vm1, %v1172_v15 }
  0x2b   : > { %1110 = vmatmul.mubr.msk.bf16.gmra.mrb[12].mxu0 %vm336_vm1, %v1171_v16 }
  0x2c   : > { %1126 = vmatmul.mubr.msk.bf16.gmra.mrb[12].mxu1 %vm336_vm1, %v1173_v17 }
  0xe6   : > { %v1099_v19 = vpop.f32.mrb[0].mxu0 }
  0xe7   : > { %v432_v20 = vadd.f32 %v1099_v19, %v1283_v18  ;;  %v1115_v21 = vpop.f32.mrb[0].mxu1  ;;  %v423_v22 = vpop.f32.mrb[1].mxu0 }
  0xe8   : > { %v496_v23 = vadd.f32 %v1115_v21, %v1283_v18  ;;  %v424_v24 = vadd.f32 %v1283_v18, %v423_v22  ;;  %v487_v25 = vpop.f32.mrb[1].mxu1  ;;  %v1100_v26 = vpop.f32.mrb[2].mxu0 }
  0xe9   : > { %v1048_v27 = vpack.c.bf16 %v432_v20, %v432_v20  ;;  %v488_v28 = vadd.f32 %v1283_v18, %v487_v25  ;;  %v435_v29 = vadd.f32 %v1100_v26, %v1283_v18  ;;  %v1116_v30 = vpop.f32.mrb[2].mxu1  ;;  %v426_v31 = vpop.f32.mrb[3].mxu0 }
  0xea   : > { %v1064_v32 = vpack.c.bf16 %v496_v23, %v496_v23  ;;  %v1046_v33 = vpack.c.bf16 %v424_v24, %v424_v24  ;;  %v499_v34 = vadd.f32 %v1116_v30, %v1283_v18  ;;  %v427_v35 = vadd.f32 %v1283_v18, %v426_v31  ;;  %v490_v36 = vpop.f32.mrb[3].mxu1 }
  0xeb   : > { %681 = vst.msk [vmem:[%s1290_s27 + $0x10] sm:$0xf] %vm678_vm2, %v1048_v27  ;;  %v1062_v37 = vpack.c.bf16 %v488_v28, %v488_v28  ;;  %v1049_v38 = vpack.c.bf16 %v435_v29, %v435_v29  ;;  %v491_v39 = vadd.f32 %v1283_v18, %v490_v36  ;;  %715 = vrot.lane.b32.xlu1 %v1048_v27, %s1198_s28 }
  0xec   : > { %697 = vst.msk [vmem:[%s1290_s27 + $0x90] sm:$0xf] %vm678_vm2, %v1064_v32  ;;  %679 = vst.msk [vmem:[%s1290_s27] sm:$0xf] %vm678_vm2, %v1046_v33  ;;  %v1065_v40 = vpack.c.bf16 %v499_v34, %v499_v34  ;;  %v1047_v41 = vpack.c.bf16 %v427_v35, %v427_v35  ;;  %747 = vrot.lane.b32.xlu0 %v1064_v32, %s1198_s28 }
  0xed   : > { %695 = vst.msk [vmem:[%s1290_s27 + $0x80] sm:$0xf] %vm678_vm2, %v1062_v37  ;;  %682 = vst.msk [vmem:[%s1290_s27 + $0x14] sm:$0xf] %vm678_vm2, %v1049_v38  ;;  %v1063_v42 = vpack.c.bf16 %v491_v39, %v491_v39 }
  0xee   : > { %698 = vst.msk [vmem:[%s1290_s27 + $0x94] sm:$0xf] %vm678_vm2, %v1065_v40  ;;  %680 = vst.msk [vmem:[%s1290_s27 + $0x4] sm:$0xf] %vm678_vm2, %v1047_v41  ;;  %v1103_v43 = vpop.f32.mrb[4].mxu0 }
  0xef   : > { %696 = vst.msk [vmem:[%s1290_s27 + $0x84] sm:$0xf] %vm678_vm2, %v1063_v42  ;;  %717 = vrot.lane.b32.xlu1 %v1049_v38, %s1198_s28  ;;  %v448_v44 = vadd.f32 %v1103_v43, %v1283_v18  ;;  %v439_v45 = vpop.f32.mrb[5].mxu0  ;;  %v1119_v46 = vpop.f32.mrb[4].mxu1 }
  0xf0   : > { %711 = vrot.lane.b32.xlu0 %v1046_v33, %s1198_s28  ;;  %v440_v47 = vadd.f32 %v1283_v18, %v439_v45  ;;  %v1104_v48 = vpop.f32.mrb[6].mxu0  ;;  %v512_v49 = vadd.f32 %v1119_v46, %v1283_v18  ;;  %v503_v50 = vpop.f32.mrb[5].mxu1 }
  0xf1   : > { %v1052_v51 = vpack.c.bf16 %v448_v44, %v448_v44  ;;  %v451_v52 = vadd.f32 %v1104_v48, %v1283_v18  ;;  %v442_v53 = vpop.f32.mrb[7].mxu0  ;;  %v504_v54 = vadd.f32 %v1283_v18, %v503_v50  ;;  %v1120_v55 = vpop.f32.mrb[6].mxu1 }
  0xf2   : > { %v1324_v56 = vpack.c.bf16 %v440_v47, %v440_v47  ;;  %v443_v57 = vadd.f32 %v1283_v18, %v442_v53  ;;  %v1068_v58 = vpack.c.bf16 %v512_v49, %v512_v49  ;;  %v515_v59 = vadd.f32 %v1120_v55, %v1283_v18  ;;  %v506_v60 = vpop.f32.mrb[7].mxu1 }
  0xf3   : > { %685 = vst.msk [vmem:[%s1290_s27 + $0x30] sm:$0xf] %vm678_vm2, %v1052_v51  ;;  %749 = vrot.lane.b32.xlu1 %v1065_v40, %s1198_s28  ;;  %v1053_v61 = vpack.c.bf16 %v451_v52, %v451_v52  ;;  %v1331_v62 = vpack.c.bf16 %v504_v54, %v504_v54  ;;  %v507_v63 = vadd.f32 %v1283_v18, %v506_v60 }
  0xf4   : > { %683 = vst.msk [vmem:[%s1290_s27 + $0x20] sm:$0xf] %vm678_vm2, %v1324_v56  ;;  %743 = vrot.lane.b32.xlu0 %v1062_v37, %s1198_s28  ;;  %v1338_v0 = vpack.c.bf16 %v443_v57, %v443_v57  ;;  %701 = vst.msk [vmem:[%s1290_s27 + $0xb0] sm:$0xf] %vm678_vm2, %v1068_v58  ;;  %v1069_v1 = vpack.c.bf16 %v515_v59, %v515_v59 }
  0xf5   : > { %686 = vst.msk [vmem:[%s1290_s27 + $0x34] sm:$0xf] %vm678_vm2, %v1053_v61  ;;  %699 = vst.msk [vmem:[%s1290_s27 + $0xa0] sm:$0xf] %vm678_vm2, %v1331_v62  ;;  %v1347_v2 = vpack.c.bf16 %v507_v63, %v507_v63 }
  0xf6   : > { %684 = vst.msk [vmem:[%s1290_s27 + $0x24] sm:$0xf] %vm678_vm2, %v1338_v0  ;;  %702 = vst.msk [vmem:[%s1290_s27 + $0xb4] sm:$0xf] %vm678_vm2, %v1069_v1  ;;  %v1107_v3 = vpop.f32.mrb[8].mxu0 }
  0xf7   : > { %745 = vrot.lane.b32.xlu1 %v1063_v42, %s1198_s28  ;;  %700 = vst.msk [vmem:[%s1290_s27 + $0xa4] sm:$0xf] %vm678_vm2, %v1347_v2  ;;  %v464_v4 = vadd.f32 %v1107_v3, %v1283_v18  ;;  %v455_v5 = vpop.f32.mrb[9].mxu0  ;;  %v1123_v6 = vpop.f32.mrb[8].mxu1 }
  0xf8   : > { %713 = vrot.lane.b32.xlu0 %v1047_v41, %s1198_s28  ;;  %v456_v7 = vadd.f32 %v1283_v18, %v455_v5  ;;  %v1108_v8 = vpop.f32.mrb[10].mxu0  ;;  %v528_v9 = vadd.f32 %v1123_v6, %v1283_v18  ;;  %v519_v10 = vpop.f32.mrb[9].mxu1 }
  0xf9   : > { %v1362_v11 = vpack.c.bf16 %v464_v4, %v464_v4  ;;  %v467_v12 = vadd.f32 %v1108_v8, %v1283_v18  ;;  %v458_v13 = vpop.f32.mrb[11].mxu0  ;;  %v520_v14 = vadd.f32 %v1283_v18, %v519_v10  ;;  %v1124_v15 = vpop.f32.mrb[10].mxu1 }
  0xfa   : > { %v1366_v16 = vpack.c.bf16 %v456_v7, %v456_v7  ;;  %v459_v17 = vadd.f32 %v1283_v18, %v458_v13  ;;  %v1072_v19 = vpack.c.bf16 %v528_v9, %v528_v9  ;;  %v531_v20 = vadd.f32 %v1124_v15, %v1283_v18  ;;  %v522_v21 = vpop.f32.mrb[11].mxu1 }
  0xfb   : > { %725 = vrot.lane.b32.xlu1 %v1053_v61, %s1198_s28  ;;  %689 = vst.msk [vmem:[%s1290_s27 + $0x50] sm:$0xf] %vm678_vm2, %v1362_v11  ;;  %v1057_v22 = vpack.c.bf16 %v467_v12, %v467_v12  ;;  %v1070_v23 = vpack.c.bf16 %v520_v14, %v520_v14  ;;  %v523_v24 = vadd.f32 %v1283_v18, %v522_v21 }
  0xfc   : > { %723 = vrot.lane.b32.xlu0 %v1052_v51, %s1198_s28  ;;  %687 = vst.msk [vmem:[%s1290_s27 + $0x40] sm:$0xf] %vm678_vm2, %v1366_v16  ;;  %v1055_v25 = vpack.c.bf16 %v459_v17, %v459_v17  ;;  %705 = vst.msk [vmem:[%s1290_s27 + $0xd0] sm:$0xf] %vm678_vm2, %v1072_v19  ;;  %v1073_v26 = vpack.c.bf16 %v531_v20, %v531_v20 }
  0xfd   : > { %690 = vst.msk [vmem:[%s1290_s27 + $0x54] sm:$0xf] %vm678_vm2, %v1057_v22  ;;  %703 = vst.msk [vmem:[%s1290_s27 + $0xc0] sm:$0xf] %vm678_vm2, %v1070_v23  ;;  %v1071_v27 = vpack.c.bf16 %v523_v24, %v523_v24 }
  0xfe   : > { %688 = vst.msk [vmem:[%s1290_s27 + $0x44] sm:$0xf] %vm678_vm2, %v1055_v25  ;;  %706 = vst.msk [vmem:[%s1290_s27 + $0xd4] sm:$0xf] %vm678_vm2, %v1073_v26  ;;  %v1111_v28 = vpop.f32.mrb[12].mxu0 }
  0xff   : > { %757 = vrot.lane.b32.xlu1 %v1069_v1, %s1198_s28  ;;  %704 = vst.msk [vmem:[%s1290_s27 + $0xc4] sm:$0xf] %vm678_vm2, %v1071_v27  ;;  %v480_v29 = vadd.f32 %v1111_v28, %v1283_v18  ;;  %v471_v30 = vpop.f32.mrb[13].mxu0  ;;  %v1127_v31 = vpop.f32.mrb[12].mxu1 }
 0x100   : > { %755 = vrot.lane.b32.xlu0 %v1068_v58, %s1198_s28  ;;  %v472_v32 = vadd.f32 %v1283_v18, %v471_v30  ;;  %v1112_v33 = vpop.f32.mrb[14].mxu0  ;;  %v544_v34 = vadd.f32 %v1127_v31, %v1283_v18  ;;  %v535_v35 = vpop.f32.mrb[13].mxu1 }
 0x101   : > { %v1060_v36 = vpack.c.bf16 %v480_v29, %v480_v29  ;;  %v483_v37 = vadd.f32 %v1112_v33, %v1283_v18  ;;  %v474_v38 = vpop.f32.mrb[15].mxu0  ;;  %v536_v39 = vadd.f32 %v1283_v18, %v535_v35  ;;  %v1128_v40 = vpop.f32.mrb[14].mxu1 }
 0x102   : > { %v1058_v41 = vpack.c.bf16 %v472_v32, %v472_v32  ;;  %v475_v42 = vadd.f32 %v1283_v18, %v474_v38  ;;  %v1076_v43 = vpack.c.bf16 %v544_v34, %v544_v34  ;;  %v547_v44 = vadd.f32 %v1128_v40, %v1283_v18  ;;  %v538_v45 = vpop.f32.mrb[15].mxu1 }
 0x103   : > { %721 = vrot.lane.b32.xlu1 %v1338_v0, %s1198_s28  ;;  %693 = vst.msk [vmem:[%s1290_s27 + $0x70] sm:$0xf] %vm678_vm2, %v1060_v36  ;;  %v1061_v46 = vpack.c.bf16 %v483_v37, %v483_v37  ;;  %v1074_v47 = vpack.c.bf16 %v536_v39, %v536_v39  ;;  %v539_v48 = vadd.f32 %v1283_v18, %v538_v45 }
 0x104   : > { %719 = vrot.lane.b32.xlu0 %v1324_v56, %s1198_s28  ;;  %691 = vst.msk [vmem:[%s1290_s27 + $0x60] sm:$0xf] %vm678_vm2, %v1058_v41  ;;  %v1059_v49 = vpack.c.bf16 %v475_v42, %v475_v42  ;;  %709 = vst.msk [vmem:[%s1290_s27 + $0xf0] sm:$0xf] %vm678_vm2, %v1076_v43  ;;  %v1077_v50 = vpack.c.bf16 %v547_v44, %v547_v44 }
 0x105   : > { %694 = vst.msk [vmem:[%s1290_s27 + $0x74] sm:$0xf] %vm678_vm2, %v1061_v46  ;;  %707 = vst.msk [vmem:[%s1290_s27 + $0xe0] sm:$0xf] %vm678_vm2, %v1074_v47  ;;  %v1075_v51 = vpack.c.bf16 %v539_v48, %v539_v48 }
 0x106   : > { %692 = vst.msk [vmem:[%s1290_s27 + $0x64] sm:$0xf] %vm678_vm2, %v1059_v49  ;;  %710 = vst.msk [vmem:[%s1290_s27 + $0xf4] sm:$0xf] %vm678_vm2, %v1077_v50 }
 0x107   : > { %753 = vrot.lane.b32.xlu1 %v1347_v2, %s1198_s28  ;;  %708 = vst.msk [vmem:[%s1290_s27 + $0xe4] sm:$0xf] %vm678_vm2, %v1075_v51 }
 0x108   : > { %751 = vrot.lane.b32.xlu0 %v1331_v62, %s1198_s28 }
 0x10b   : > { %733 = vrot.lane.b32.xlu1 %v1057_v22, %s1198_s28 }
 0x10c   : > { %731 = vrot.lane.b32.xlu0 %v1362_v11, %s1198_s28 }
 0x10f   : > { %765 = vrot.lane.b32.xlu1 %v1073_v26, %s1198_s28 }
 0x110   : > { %763 = vrot.lane.b32.xlu0 %v1072_v19, %s1198_s28 }
 0x113   : > { %729 = vrot.lane.b32.xlu1 %v1055_v25, %s1198_s28 }
 0x114   : > { %727 = vrot.lane.b32.xlu0 %v1366_v16, %s1198_s28 }
 0x117   : > { %761 = vrot.lane.b32.xlu1 %v1071_v27, %s1198_s28 }
 0x118   : > { %759 = vrot.lane.b32.xlu0 %v1070_v23, %s1198_s28 }
 0x11b   : > { %741 = vrot.lane.b32.xlu1 %v1061_v46, %s1198_s28 }
 0x11c   : > { %739 = vrot.lane.b32.xlu0 %v1060_v36, %s1198_s28 }
 0x11f   : > { %737 = vrot.lane.b32.xlu1 %v1059_v49, %s1198_s28 }
 0x120   : > { %735 = vrot.lane.b32.xlu0 %v1058_v41, %s1198_s28 }
 0x123   : > { %769 = vrot.lane.b32.xlu1 %v1075_v51, %s1198_s28 }
 0x124   : > { %767 = vrot.lane.b32.xlu0 %v1074_v47, %s1198_s28 }
 0x127   : > { %773 = vrot.lane.b32.xlu1 %v1077_v50, %s1198_s28 }
 0x128   : > { %771 = vrot.lane.b32.xlu0 %v1076_v43, %s1198_s28 }
 0x15d   : > { %v716_v18 = vpop.permute.xlu1 %715 }
 0x15e   : > { %v748_v52 = vpop.permute.xlu0 %747  ;;  %1012 = vst.msk [vmem:[%s1290_s27 + $0x18] sm:$0xf] %vm678_vm2, %v716_v18 }
 0x15f   : > { %1028 = vst.msk [vmem:[%s1290_s27 + $0x98] sm:$0xf] %vm678_vm2, %v748_v52 }
 0x161   : > { %v718_v53 = vpop.permute.xlu1 %717 }
 0x162   : > { %1013 = vst.msk [vmem:[%s1290_s27 + $0x1c] sm:$0xf] %vm678_vm2, %v718_v53  ;;  %v712_v54 = vpop.permute.xlu0 %711 }
 0x163   : > { %1010 = vst.msk [vmem:[%s1290_s27 + $0x8] sm:$0xf] %vm678_vm2, %v712_v54 }
 0x165   : > { %v750_v55 = vpop.permute.xlu1 %749 }
 0x166   : > { %1029 = vst.msk [vmem:[%s1290_s27 + $0x9c] sm:$0xf] %vm678_vm2, %v750_v55  ;;  %v744_v56 = vpop.permute.xlu0 %743 }
 0x167   : > { %1026 = vst.msk [vmem:[%s1290_s27 + $0x88] sm:$0xf] %vm678_vm2, %v744_v56 }
 0x169   : > { %v746_v57 = vpop.permute.xlu1 %745 }
 0x16a   : > { %1027 = vst.msk [vmem:[%s1290_s27 + $0x8c] sm:$0xf] %vm678_vm2, %v746_v57  ;;  %v714_v58 = vpop.permute.xlu0 %713 }
 0x16b   : > { %1011 = vst.msk [vmem:[%s1290_s27 + $0xc] sm:$0xf] %vm678_vm2, %v714_v58 }
 0x16d   : > { %v726_v59 = vpop.permute.xlu1 %725 }
 0x16e   : > { %1017 = vst.msk [vmem:[%s1290_s27 + $0x3c] sm:$0xf] %vm678_vm2, %v726_v59  ;;  %v724_v60 = vpop.permute.xlu0 %723 }
 0x16f   : > { %1016 = vst.msk [vmem:[%s1290_s27 + $0x38] sm:$0xf] %vm678_vm2, %v724_v60 }
 0x171   : > { %v758_v61 = vpop.permute.xlu1 %757 }
 0x172   : > { %1033 = vst.msk [vmem:[%s1290_s27 + $0xbc] sm:$0xf] %vm678_vm2, %v758_v61  ;;  %v756_v62 = vpop.permute.xlu0 %755 }
 0x173   : > { %1032 = vst.msk [vmem:[%s1290_s27 + $0xb8] sm:$0xf] %vm678_vm2, %v756_v62 }
 0x175   : > { %v722_v63 = vpop.permute.xlu1 %721 }
 0x176   : > { %1015 = vst.msk [vmem:[%s1290_s27 + $0x2c] sm:$0xf] %vm678_vm2, %v722_v63  ;;  %v720_v0 = vpop.permute.xlu0 %719 }
 0x177   : > { %1014 = vst.msk [vmem:[%s1290_s27 + $0x28] sm:$0xf] %vm678_vm2, %v720_v0 }
 0x179   : > { %v754_v1 = vpop.permute.xlu1 %753 }
 0x17a   : > { %1031 = vst.msk [vmem:[%s1290_s27 + $0xac] sm:$0xf] %vm678_vm2, %v754_v1  ;;  %v752_v2 = vpop.permute.xlu0 %751 }
 0x17b   : > { %1030 = vst.msk [vmem:[%s1290_s27 + $0xa8] sm:$0xf] %vm678_vm2, %v752_v2 }
 0x17d   : > { %v734_v3 = vpop.permute.xlu1 %733 }
 0x17e   : > { %1021 = vst.msk [vmem:[%s1290_s27 + $0x5c] sm:$0xf] %vm678_vm2, %v734_v3  ;;  %v732_v4 = vpop.permute.xlu0 %731 }
 0x17f   : > { %1020 = vst.msk [vmem:[%s1290_s27 + $0x58] sm:$0xf] %vm678_vm2, %v732_v4 }
 0x181   : > { %v766_v5 = vpop.permute.xlu1 %765 }
 0x182   : > { %1037 = vst.msk [vmem:[%s1290_s27 + $0xdc] sm:$0xf] %vm678_vm2, %v766_v5  ;;  %v764_v6 = vpop.permute.xlu0 %763 }
 0x183   : > { %1036 = vst.msk [vmem:[%s1290_s27 + $0xd8] sm:$0xf] %vm678_vm2, %v764_v6 }
 0x185   : > { %v730_v7 = vpop.permute.xlu1 %729 }
 0x186   : > { %1019 = vst.msk [vmem:[%s1290_s27 + $0x4c] sm:$0xf] %vm678_vm2, %v730_v7  ;;  %v728_v8 = vpop.permute.xlu0 %727 }
 0x187   : > { %1018 = vst.msk [vmem:[%s1290_s27 + $0x48] sm:$0xf] %vm678_vm2, %v728_v8 }
 0x189   : > { %v762_v9 = vpop.permute.xlu1 %761 }
 0x18a   : > { %1035 = vst.msk [vmem:[%s1290_s27 + $0xcc] sm:$0xf] %vm678_vm2, %v762_v9  ;;  %v760_v10 = vpop.permute.xlu0 %759 }
 0x18b   : > { %1034 = vst.msk [vmem:[%s1290_s27 + $0xc8] sm:$0xf] %vm678_vm2, %v760_v10 }
 0x18d   : > { %v742_v11 = vpop.permute.xlu1 %741 }
 0x18e   : > { %1025 = vst.msk [vmem:[%s1290_s27 + $0x7c] sm:$0xf] %vm678_vm2, %v742_v11  ;;  %v740_v12 = vpop.permute.xlu0 %739 }
 0x18f   : > { %1024 = vst.msk [vmem:[%s1290_s27 + $0x78] sm:$0xf] %vm678_vm2, %v740_v12 }
 0x191   : > { %v738_v13 = vpop.permute.xlu1 %737 }
 0x192   : > { %1023 = vst.msk [vmem:[%s1290_s27 + $0x6c] sm:$0xf] %vm678_vm2, %v738_v13  ;;  %v736_v14 = vpop.permute.xlu0 %735 }
 0x193   : > { %1022 = vst.msk [vmem:[%s1290_s27 + $0x68] sm:$0xf] %vm678_vm2, %v736_v14 }
 0x195   : > { %v770_v15 = vpop.permute.xlu1 %769 }
 0x196   : > { %1039 = vst.msk [vmem:[%s1290_s27 + $0xec] sm:$0xf] %vm678_vm2, %v770_v15  ;;  %v768_v16 = vpop.permute.xlu0 %767 }
 0x197   : > { %1038 = vst.msk [vmem:[%s1290_s27 + $0xe8] sm:$0xf] %vm678_vm2, %v768_v16 }
 0x199   : > { %v774_v17 = vpop.permute.xlu1 %773 }
 0x19a   : > { %1041 = vst.msk [vmem:[%s1290_s27 + $0xfc] sm:$0xf] %vm678_vm2, %v774_v17  ;;  %v772_v19 = vpop.permute.xlu0 %771 }
 0x19b   : > { %1040 = vst.msk [vmem:[%s1290_s27 + $0xf8] sm:$0xf] %vm678_vm2, %v772_v19 }
 0x19c PF: > { %s13_s14 = sadd.s32 1, %s1196_s14   ;;  %s1520_s12 = smov %s1192_s13 }
 0x19d   : > { %p10_p5 = scmp.ge.s32.totalorder %s13_s14, 4   ;;  %s1521_s13 = smov %s1523_s15 }
 0x19f   :  { %12 = sbr.rel (!%p10_p5) target bundleno = 2 (0x2), region = 63 }

// kernel: residual_block_upsample.3
= control target key start
LH: loop header
LB: loop body
LE: loop exit
PB: predicated region body
PF: predicated region fallthrough
CT: control target
= control target key end

     0   :  { %s4995_s25 = smov 0   ;;  %s4997_s26 = smov 0   ;;  %s7550_s0 = inlined_call_operand.vmem [shape: bf16[2,32,32,8], index: 0, kind: input, shape index: {}, may-alias: {0,1,2}]   ;;  %s7551_s1 = inlined_call_operand.vmem [shape: bf16[2,32,32,8], index: 1, kind: input, shape index: {}, may-alias: {0,1,2}]   ;;  %s7552_s2 = inlined_call_operand.vmem [shape: bf16[2,32,32,8], index: 2, kind: input, shape index: {}, may-alias: {0,1,2}]   ;;  %s7553_s3 = inlined_call_operand.vmem [shape: bf16[8,8], index: 3, kind: input, shape index: {}]   ;;  %s7554_s4 = inlined_call_operand.vmem [shape: f32[1,8], index: 4, kind: input, shape index: {}]   ;;  %s7555_s5 = inlined_call_operand.vmem [shape: f32[9,8], index: 5, kind: input, shape index: {}]   ;;  %s7556_s6 = inlined_call_operand.vmem [shape: f32[1,8], index: 6, kind: input, shape index: {}]   ;;  %s7557_s7 = inlined_call_operand.vmem [shape: bf16[8,8], index: 7, kind: input, shape index: {}]   ;;  %s7558_s8 = inlined_call_operand.vmem [shape: f32[1,8], index: 8, kind: input, shape index: {}]   ;;  %s7559_s9 = inlined_call_operand.vmem [shape: bf16[8,32], index: 9, kind: input, shape index: {}]   ;;  %s7560_s10 = inlined_call_operand.vmem [shape: f32[1,32], index: 10, kind: input, shape index: {}]   ;;  %s7561_s11 = inlined_call_operand.vmem [shape: bf16[16,8], index: 11, kind: input, shape index: {}]   ;;  %s7562_s12 = inlined_call_operand.vmem [shape: f32[1,8], index: 12, kind: input, shape index: {}]   ;;  %s7563_s13 = inlined_call_operand.vmem [shape: bf16[2,32,32,8], index: 13, kind: output, shape index: {}]  }
   0x1   :  { %7680 = sst [smem:[#allocation47_spill]] %s7550_s0  ;;  %s4999_s27 = smov 0  }
   0x2   :  { %7681 = sst [smem:[#allocation48_spill]] %s7553_s3  ;;  %s5001_s28 = smov 0  }
   0x3   :  { %s5003_s29 = smov 0  }
   0x4 LB: > { %s32_s30 = sadd.s32 1, %s4913_s27  ;;  %s35_s14 = sadd.s32 1, %s4917_s28  ;;  %s4921_s29 = sphi %s5003_s29, %s23_s29   ;;  %s4917_s28 = sphi %s5001_s28, %s7896_s28   ;;  %s4913_s27 = sphi %s4999_s27, %s7895_s27   ;;  %s4909_s26 = sphi %s4997_s26, %s7894_s26   ;;  %s4905_s25 = sphi %s4995_s25, %s7893_s25  }
   0x5   : > { %p33_p0 = scmp.ge.s32.totalorder %s32_s30, 4  ;;  %p3999_p1 = scmp.ge.s32.totalorder %s4921_s29, 1 }
   0x6   : > { %p473_p2 = scmp.lt.s32.totalorder %s4921_s29, 9 }
   0x7   : > { %s7898_s30 = smov (%p33_p0, %s32_s30), 0  ;;  %s7900_s14 = smov (!%p33_p0, %s35_s14), %s4917_s28 }
   0x8   : > { %7682 = sst [smem:[#allocation3_spill]] %s7898_s30  ;;  %p474_p3 = pnand %p3999_p1, %p473_p2 }
   0x9   : > { %p37_p4 = scmp.ge.s32.totalorder %s7900_s14, 2 }
   0xa   : > { %477 = sbr.rel (%p474_p3) target bundleno = 1350 (0x546), region = 72 }
   0xb   : > { %s7902_s14 = smov (%p37_p4, %s7900_s14), 0 }
   0xc   : > { %7683 = sst [smem:[#allocation4_spill]] %s7902_s14 }
  0x11   : > { %s7684_s3 = sld [smem:[#allocation48_spill]]  ;;  %vm817_vm0 = vcmask 1043456   ;;  %s4000_s17 = sshll.u32 %s4905_s25, 3  ;;  %vm768_vm1 = vcmask 64512   ;;  %v2478_v22 = vld [vmem:[%s7557_s7] sm:$0xf]  ;;  %v1490_v25 = vlaneseq }
  0x12   : > { %p554_p5 = scmp.lt.s32.totalorder %s4909_s26, 1  ;;  %p556_p6 = scmp.lt.s32.totalorder %s4000_s17, 31  ;;  %v2535_v23 = vsel %vm817_vm0, %v2478_v22, 0  ;;  %v5104_v24 = vld [vmem:[%s7554_s4] ss:$0 sm:$0xff]  ;;  %vm3413_vm6 = vcmask 130048  }
  0x13   : > { %s4235_s18 = sadd.s32 8, %s4000_s17  ;;  %s4005_s23 = sadd.s32 4294967295, %s4000_s17  ;;  %v5116_v34 = vshrl.u32 %v1490_v25, 7  ;;  %vm3815_vm7 = vcmask 60416  }
  0x14   : > { %s7904_s26 = smov (!%p554_p5, %s4909_s26), 1  ;;  %p5035_p7 = scmp.lt.s32.totalorder %s4235_s18, 31 }
  0x15   : > { %s557_s19 = scalar_select %p556_p6, %s4000_s17, 31  ;;  %v1652_v42 = vsub.s32 0, %v5116_v34  ;;  %v1494_v45 = vadd.s32 24, %v5116_v34  ;;  %v1720_v46 = vsub.s32 1, %v5116_v34  ;;  %vm1495_vm2 = vcmp.gt.s32.totalorder %v5116_v34, 0 }
  0x16   : > { %s4002_s20 = sshll.u32 %s7904_s26, 7  ;;  %p566_p8 = scmp.gt.s32.totalorder %s4005_s23, 0  ;;  %v2121_v25 = vsub.s32 5, %v5116_v34  ;;  %vm1585_vm4 = vcmp.lt.s32.totalorder %v5116_v34, 1  ;;  %vm1818_vm5 = vcmp.lt.s32.totalorder %v5116_v34, 7 }
  0x17   : > { %v680_v0 = vld [vmem:[%s7684_s3] sm:$0xf]  ;;  %s4001_s22 = sshll.u32 %s557_s19, 2  ;;  %s7686_s0 = sld [smem:[#allocation47_spill]]  ;;  %vm1510_vm3 = vcmp.lt.s32.totalorder %v1494_v45, 31 }
  0x18   : > { %4490 = vmatprep.subr.msk.bf16.mxu0 %vm817_vm0, %v680_v0  ;;  %v819_v1 = vsel %vm817_vm0, %v680_v0, 0  ;;  %4492 = vmatprep.subr.msk.bf16.mxu1 %vm817_vm0, %v680_v0  ;;  %s5039_s24 = sadd.s32 %s4002_s20, %s4001_s22  ;;  %p4006_p9 = scmp.lt.s32.totalorder %s4005_s23, 31 }
  0x19   : > { %4343 = vmatpush3.bf16.msra.mxu0 %v819_v1  ;;  %4383 = vmatpush3.bf16.msra.mxu1 %v819_v1  ;;  %s7564_s15 = sshll.u32 %s5039_s24, 2  ;;  %s7906_s18 = smov (!%p5035_p7, %s4235_s18), 31 }
  0x1a   : > { %4491 = vmatprep.subr.msk.bf16.mxu0 %vm817_vm0, %v680_v0  ;;  %s7908_s23 = smov (!%p566_p8, %s4005_s23), 0  ;;  %s7910_s18 = smov (!%p5035_p7, %s7906_s18), 31  ;;  %4493 = vmatprep.subr.msk.bf16.mxu1 %vm817_vm0, %v2478_v22  ;;  %v5156_v0 = vld [vmem:[%s7555_s5] sm:$0xff] }
  0x1b   : > { %s7912_s23 = smov (!%p4006_p9, %s7908_s23), 31  ;;  %s4018_s3 = sshll.u32 %s7910_s18, 2 }
  0x1c   : > { %s591_s26 = sadd.s32 %s4018_s3, %s4002_s20  ;;  %s4011_s17 = sshll.u32 %s7912_s23, 2 }
  0x1d   : > { %s5047_s14 = scalar_lea.vmem %s7686_s0, %s7564_s15  ;;  %s4020_s19 = sshll.u32 %s591_s26, 2 }
  0x1e   : > { %v616_v2 = vld [vmem:[%s5047_s14] sm:$0xff]   ;;  %v618_v3 = vld [vmem:[%s5047_s14 + $0x8] sm:$0xff]   ;;  %v620_v4 = vld [vmem:[%s5047_s14 + $0x10] sm:$0xff]   ;;  %s574_s21 = sadd.s32 %s4011_s17, %s4002_s20  ;;  %s593_s15 = scalar_lea.vmem %s7552_s2, %s4020_s19 }
  0x1f   : > { %4344 = vmatprep.mubr.msk.bf16.mxu0 %vm768_vm1, %v616_v2  ;;  %v622_v5 = vld [vmem:[%s5047_s14 + $0x18] sm:$0xff]   ;;  %v624_v6 = vld [vmem:[%s5047_s14 + $0x20] sm:$0xff]   ;;  %s4013_s0 = sshll.u32 %s574_s21, 2  ;;  %v4540_v8 = vld [vmem:[%s593_s15 + $0x8] sm:$0xff]   ;;  %p613_p10 = scmp.lt.s32.totalorder %s4905_s25, 3 }
  0x20   : > { %4345 = vmatmul.mubr.msk.bf16.vlgmr.msra.gmra.mrb[0].mxu0 %vm768_vm1, %v618_v3  ;;  %v4539_v7 = vld [vmem:[%s593_s15] sm:$0xff]   ;;  %s576_s30 = scalar_lea.vmem %s7551_s1, %s4013_s0  ;;  %v626_v9 = vld [vmem:[%s5047_s14 + $0x28] sm:$0xff]   ;;  %v628_v10 = vld [vmem:[%s5047_s14 + $0x30] sm:$0xff]   ;;  %p610_p11 = scmp.gt.s32.totalorder %s4905_s25, 0 }
  0x21   : > { %4377 = vmatpush3.bf16.msra.mxu0 %v819_v1  ;;  %4348 = vmatprep.mubr.msk.bf16.mxu0 %vm768_vm1, %v620_v4  ;;  %v630_v11 = vld [vmem:[%s5047_s14 + $0x38] sm:$0xff]   ;;  %v632_v12 = vld [vmem:[%s5047_s14 + $0x40] sm:$0xff]   ;;  %v634_v13 = vld [vmem:[%s5047_s14 + $0x48] sm:$0xff]   ;;  %s614_s26 = scalar_select %p613_p10, 1, 0 }
  0x22   : > { %4384 = vmatprep.mubr.msk.bf16.mxu1 %vm768_vm1, %v4539_v7  ;;  %v636_v14 = vld [vmem:[%s5047_s14 + $0x50] sm:$0xff]   ;;  %v638_v15 = vld [vmem:[%s5047_s14 + $0x58] sm:$0xff]   ;;  %v640_v16 = vld [vmem:[%s5047_s14 + $0x60] sm:$0xff]   ;;  %s5204_s21 = scalar_select %p610_p11, 1, 0 }
  0x23   : > { %4385 = vmatmul.mubr.msk.bf16.vlgmr.msra.gmra.mrb[0].mxu1 %vm768_vm1, %v4540_v8  ;;  %v642_v17 = vld [vmem:[%s5047_s14 + $0x68] sm:$0xff]   ;;  %v644_v18 = vld [vmem:[%s5047_s14 + $0x70] sm:$0xff]   ;;  %v646_v19 = vld [vmem:[%s5047_s14 + $0x78] sm:$0xff]   ;;  %v5165_v8 = vrot.slane %v5156_v0, %v1652_v42  ;;  %s7826_s0 = sshll.u32 %s5039_s24, 2 }
  0x24   : > { %v4555_v20 = vld [vmem:[%s576_s30] sm:$0xff]   ;;  %v4556_v21 = vld [vmem:[%s576_s30 + $0x8] sm:$0xff]   ;;  %4389 = vmatpush3.bf16.msra.mxu1 %v2535_v23  ;;  %s615_s30 = scvt.s32.f32 %s614_s26  ;;  %v1971_v23 = vsub.s32 3, %v5116_v34  ;;  %s612_s25 = scvt.s32.f32 %s5204_s21 }
  0x25   : > { %s7350_s15 = scalar_lea.vmem %s7563_s13, %s7826_s0 }
  0x26   : > { %v5124_v41 = vstv %s615_s30 }
  0x28   : > { %4349 = vmatmul.mubr.msk.bf16.gmra.mrb[4].mxu0 %vm768_vm1, %v622_v5 }
  0x29   : > { %4352 = vmatprep.mubr.msk.bf16.mxu0 %vm768_vm1, %v624_v6 }
  0x30   : > { %4353 = vmatmul.mubr.msk.bf16.gmra.mrb[8].mxu0 %vm768_vm1, %v626_v9 }
  0x31   : > { %4356 = vmatprep.mubr.msk.bf16.mxu0 %vm768_vm1, %v628_v10 }
  0x38   : > { %4357 = vmatmul.mubr.msk.bf16.gmra.mrb[12].mxu0 %vm768_vm1, %v630_v11  ;;  %v5168_v11 = vrot.slane %v5156_v0, %v1720_v46 }
  0x39   : > { %4360 = vmatprep.mubr.msk.bf16.mxu0 %vm768_vm1, %v632_v12 }
  0x40   : > { %4361 = vmatmul.mubr.msk.bf16.gmra.mrb[16].mxu0 %vm768_vm1, %v634_v13  ;;  %v4923_v13 = vmov 0.0  }
  0x41   : > { %4364 = vmatprep.mubr.msk.bf16.mxu0 %vm768_vm1, %v636_v14  ;;  %v5172_v14 = vsel %vm1495_vm2, 1.0, %v4923_v13 }
  0x42   : > { %7687 = vst [vmem:[#allocation5_spill] sm:$0xff] %v5172_v14 }
  0x48   : > { %4365 = vmatmul.mubr.msk.bf16.gmra.mrb[20].mxu0 %vm768_vm1, %v638_v15  ;;  %v5175_v15 = vsel %vm1510_vm3, 1.0, %v4923_v13 }
  0x49   : > { %4368 = vmatprep.mubr.msk.bf16.mxu0 %vm768_vm1, %v640_v16 }
  0x50   : > { %4369 = vmatmul.mubr.msk.bf16.gmra.mrb[24].mxu0 %vm768_vm1, %v642_v17 }
  0x51   : > { %4372 = vmatprep.mubr.msk.bf16.mxu0 %vm768_vm1, %v644_v18  ;;  %v1885_v18 = vsub.s32 2, %v5116_v34 }
  0x58   : > { %4373 = vmatmul.mubr.msk.bf16.gmra.mrb[28].mxu0 %vm768_vm1, %v646_v19  ;;  %v2039_v19 = vsub.s32 4, %v5116_v34 }
  0x59   : > { %4378 = vmatprep.mubr.msk.bf16.mxu0 %vm768_vm1, %v4555_v20 }
  0x60   : > { %4379 = vmatmul.mubr.msk.bf16.vlgmr.msra.gmra.mrb[32].mxu0 %vm768_vm1, %v4556_v21 }
  0xf3   : > { %v4346_v26 = vpop.f32.mrb[0].mxu0 }
  0xf4   : > { %v5107_v27 = vadd.f32 %v4346_v26, %v5104_v24  ;;  %v855_v28 = vpop.f32.mrb[1].mxu0 }
  0xf5   : > { %v5110_v29 = vadd.f32 %v5104_v24, %v855_v28  ;;  %v4347_v30 = vpop.f32.mrb[2].mxu0 }
  0xf6   : > { %v4060_v31 = vmul.f32 -4.0, %v5107_v27  ;;  %v5114_v32 = vadd.f32 %v4347_v30, %v5104_v24  ;;  %v858_v33 = vpop.f32.mrb[3].mxu0  ;;  %v4386_v44 = vpop.f32.mrb[0].mxu1 }
  0xf7   : > { %v4058_v35 = vmul.f32 -4.0, %v5110_v29  ;;  %v5120_v36 = vadd.f32 %v5104_v24, %v858_v33  ;;  %v5130_v48 = vadd.f32 %v4386_v44, %v5104_v24  ;;  %v1398_v49 = vpop.f32.mrb[1].mxu1  ;;  %v2275_v33 = vsub.s32 7, %v5116_v34 }
  0xf8   : > { %v1050_v37 = vmul.f32 1.442695, %v4060_v31  ;;  %v4061_v38 = vmul.f32 -4.0, %v5114_v32  ;;  %v5134_v51 = vadd.f32 %v5104_v24, %v1398_v49  ;;  %v4387_v52 = vpop.f32.mrb[2].mxu1 }
  0xf9   : > { %v1046_v39 = vmul.f32 1.442695, %v4058_v35  ;;  %v4059_v40 = vmul.f32 -4.0, %v5120_v36  ;;  %v4104_v55 = vmul.f32 -4.0, %v5130_v48  ;;  %v5141_v56 = vadd.f32 %v4387_v52, %v5104_v24  ;;  %v5146_v59 = vpop.f32.mrb[3].mxu1 }
  0xfa   : > { %4574 = vpow2.f32 %v1050_v37  ;;  %v1052_v43 = vmul.f32 1.442695, %v4061_v38  ;;  %v4102_v60 = vmul.f32 -4.0, %v5134_v51 }
  0xfb   : > { %4576 = vpow2.f32 %v1046_v39  ;;  %v1048_v47 = vmul.f32 1.442695, %v4059_v40  ;;  %v4350_v50 = vpop.f32.mrb[4].mxu0  ;;  %v1425_v1 = vmul.f32 1.442695, %v4104_v55  ;;  %v4105_v2 = vmul.f32 -4.0, %v5141_v56 }
  0xfc   : > { %4578 = vpow2.f32 %v1052_v43  ;;  %v5137_v53 = vadd.f32 %v4350_v50, %v5104_v24  ;;  %v871_v54 = vpop.f32.mrb[5].mxu0  ;;  %v1421_v5 = vmul.f32 1.442695, %v4102_v60  ;;  %v2207_v40 = vsub.s32 6, %v5116_v34 }
  0xfd   : > { %4580 = vpow2.f32 %v1048_v47  ;;  %v5144_v57 = vadd.f32 %v5104_v24, %v871_v54  ;;  %v4351_v58 = vpop.f32.mrb[6].mxu0  ;;  %v1427_v9 = vmul.f32 1.442695, %v4105_v2  ;;  %v5200_v54 = vrot.slane %v5156_v0, %v2039_v19 }
  0xfe   : > { %v4064_v61 = vmul.f32 -4.0, %v5137_v53  ;;  %v5151_v62 = vadd.f32 %v4351_v58, %v5104_v24  ;;  %v874_v63 = vpop.f32.mrb[7].mxu0  ;;  %4582 = vpow2.f32 %v1425_v1  ;;  %v5207_v55 = vrot.slane %v5156_v0, %v1885_v18 }
  0xff   : > { %v4062_v3 = vmul.f32 -4.0, %v5144_v57  ;;  %v5161_v4 = vadd.f32 %v5104_v24, %v874_v63  ;;  %4584 = vpow2.f32 %v1421_v5  ;;  %v5210_v58 = vrot.slane %v5156_v0, %v1971_v23 }
 0x100   : > { %v1058_v6 = vmul.f32 1.442695, %v4064_v61  ;;  %v4065_v7 = vmul.f32 -4.0, %v5151_v62  ;;  %4586 = vpow2.f32 %v1427_v9  ;;  %v5213_v60 = vrot.slane %v5156_v0, %v2121_v25 }
 0x101   : > { %v1054_v10 = vmul.f32 1.442695, %v4062_v3  ;;  %v4063_v16 = vmul.f32 -4.0, %v5161_v4  ;;  %v5217_v1 = vadd.f32 %v5104_v24, %v5146_v59  ;;  %v5220_v2 = vrot.slane %v5156_v0, %v2207_v40 }
 0x102   : > { %v1060_v12 = vmul.f32 1.442695, %v4065_v7  ;;  %4588 = vpow2.f32 %v1058_v6  ;;  %v5223_v3 = vrot.slane %v5156_v0, %v2275_v33 }
 0x103   : > { %v4354_v17 = vpop.f32.mrb[8].mxu0  ;;  %4590 = vpow2.f32 %v1054_v10  ;;  %v1056_v44 = vmul.f32 1.442695, %v4063_v16  ;;  %7688 = vst [vmem:[#allocation6_spill] sm:$0xff] %v5220_v2 }
 0x104   : > { %v4575_v20 = vpop.eup %4574  ;;  %v5181_v21 = vadd.f32 %v4354_v17, %v5104_v24  ;;  %v887_v22 = vpop.f32.mrb[9].mxu0  ;;  %4592 = vpow2.f32 %v1060_v12  ;;  %7689 = vst [vmem:[#allocation7_spill] sm:$0xff] %v5223_v3 }
 0x105   : > { %v4577_v26 = vpop.eup %4576  ;;  %v1112_v28 = vadd.f32 1.0, %v4575_v20  ;;  %v5186_v30 = vadd.f32 %v5104_v24, %v887_v22  ;;  %v4355_v31 = vpop.f32.mrb[10].mxu0 }
 0x106   : > { %v4579_v35 = vpop.eup %4578  ;;  %v1110_v37 = vadd.f32 1.0, %v4577_v26  ;;  %v4068_v38 = vmul.f32 -4.0, %v5181_v21  ;;  %v890_v39 = vpop.f32.mrb[11].mxu0  ;;  %v5194_v49 = vadd.f32 %v4355_v31, %v5104_v24 }
 0x107   : > { %v4581_v42 = vpop.eup %4580  ;;  %4594 = vrcp.f32 %v1112_v28  ;;  %v1113_v43 = vadd.f32 1.0, %v4579_v35  ;;  %v4066_v45 = vmul.f32 -4.0, %v5186_v30  ;;  %v5197_v52 = vadd.f32 %v5104_v24, %v890_v39 }
 0x108   : > { %4596 = vrcp.f32 %v1110_v37  ;;  %v1111_v46 = vadd.f32 1.0, %v4581_v42  ;;  %v1066_v47 = vmul.f32 1.442695, %v4068_v38  ;;  %v4583_v61 = vpop.eup %4582  ;;  %v4069_v7 = vmul.f32 -4.0, %v5194_v49 }
 0x109   : > { %4598 = vrcp.f32 %v1113_v43  ;;  %v1062_v50 = vmul.f32 1.442695, %v4066_v45  ;;  %v4585_v5 = vpop.eup %4584  ;;  %v1431_v6 = vadd.f32 1.0, %v4583_v61  ;;  %v4067_v59 = vmul.f32 -4.0, %v5197_v52 }
 0x10a   : > { %4600 = vrcp.f32 %v1111_v46  ;;  %v4587_v12 = vpop.eup %4586  ;;  %v1429_v13 = vadd.f32 1.0, %v4585_v5  ;;  %v4103_v28 = vmul.f32 -4.0, %v5217_v1  ;;  %v1068_v35 = vmul.f32 1.442695, %v4069_v7 }
 0x10b   : > { %4602 = vpow2.f32 %v1056_v44  ;;  %v4358_v63 = vpop.f32.mrb[12].mxu0  ;;  %v1432_v18 = vadd.f32 1.0, %v4587_v12  ;;  %v1064_v40 = vmul.f32 1.442695, %v4067_v59  ;;  %v5245_v46 = vstv %s612_s25  ;;  %s4924_s25 = smov 112  }
 0x10c   : > { %4604 = vpow2.f32 %v1066_v47  ;;  %v5227_v9 = vadd.f32 %v4358_v63, %v5104_v24  ;;  %v903_v10 = vpop.f32.mrb[13].mxu0  ;;  %v4589_v17 = vpop.eup %4588  ;;  %v5248_v5 = vmul.f32 1.442695, %v4103_v28 }
 0x10d   : > { %4606 = vpow2.f32 %v1062_v50  ;;  %v5231_v16 = vadd.f32 %v5104_v24, %v903_v10  ;;  %v4359_v0 = vpop.f32.mrb[14].mxu0  ;;  %v4591_v23 = vpop.eup %4590  ;;  %v1116_v25 = vadd.f32 1.0, %v4589_v17 }
 0x10e   : > { %4608 = vrcp.f32 %v1431_v6  ;;  %v4072_v19 = vmul.f32 -4.0, %v5227_v9  ;;  %v5235_v20 = vadd.f32 %v4359_v0, %v5104_v24  ;;  %v906_v22 = vpop.f32.mrb[15].mxu0  ;;  %v4593_v31 = vpop.eup %4592  ;;  %v1114_v33 = vadd.f32 1.0, %v4591_v23 }
 0x10f   : > { %4610 = vrcp.f32 %v1429_v13  ;;  %v4070_v26 = vmul.f32 -4.0, %v5231_v16  ;;  %v5241_v37 = vadd.f32 %v5104_v24, %v906_v22  ;;  %v1117_v39 = vadd.f32 1.0, %v4593_v31 }
 0x110   : > { %4612 = vrcp.f32 %v1432_v18  ;;  %v4073_v42 = vmul.f32 -4.0, %v5235_v20  ;;  %v1074_v45 = vmul.f32 1.442695, %v4072_v19 }
 0x111   : > { %v4595_v38 = vpop.eup %4594  ;;  %4614 = vrcp.f32 %v1116_v25  ;;  %v1070_v61 = vmul.f32 1.442695, %v4070_v26 }
 0x112   : > { %v4597_v43 = vpop.eup %4596  ;;  %v1208_v44 = vmul.f32 %v4595_v38, %v5107_v27  ;;  %4616 = vrcp.f32 %v1114_v33  ;;  %v4071_v27 = vmul.f32 -4.0, %v5241_v37  ;;  %v1076_v59 = vmul.f32 1.442695, %v4073_v42 }
 0x113   : > { %v4599_v47 = vpop.eup %4598  ;;  %v1206_v50 = vmul.f32 %v4597_v43, %v5110_v29  ;;  %4618 = vrcp.f32 %v1117_v39  ;;  %v4362_v63 = vpop.f32.mrb[16].mxu0 }
 0x114   : > { %v4601_v6 = vpop.eup %4600  ;;  %1456 = vst.msk [vmem:[#allocation2 + $0x30] sm:$0xff] %vm768_vm1, %v1208_v44  ;;  %v1209_v7 = vmul.f32 %v4599_v47, %v5114_v32  ;;  %4620 = vpow2.f32 %v1068_v35  ;;  %v5254_v10 = vadd.f32 %v4362_v63, %v5104_v24  ;;  %v919_v12 = vpop.f32.mrb[17].mxu0  ;;  %v1072_v35 = vmul.f32 1.442695, %v4071_v27 }
 0x115   : > { %v4603_v13 = vpop.eup %4602  ;;  %1454 = vst.msk [vmem:[#allocation2 + $0x20] sm:$0xff] %vm768_vm1, %v1206_v50  ;;  %v1207_v29 = vmul.f32 %v4601_v6, %v5120_v36  ;;  %4622 = vpow2.f32 %v1064_v40  ;;  %v5259_v0 = vadd.f32 %v5104_v24, %v919_v12  ;;  %v4363_v17 = vpop.f32.mrb[18].mxu0 }
 0x116   : > { %v4605_v18 = vpop.eup %4604  ;;  %1457 = vst.msk [vmem:[#allocation2 + $0x38] sm:$0xff] %vm768_vm1, %v1209_v7  ;;  %v1115_v32 = vadd.f32 1.0, %v4603_v13  ;;  %4624 = vpow2.f32 %v1074_v45  ;;  %v4076_v19 = vmul.f32 -4.0, %v5254_v10  ;;  %v5264_v22 = vadd.f32 %v4363_v17, %v5104_v24  ;;  %v922_v23 = vpop.f32.mrb[19].mxu0 }
 0x117   : > { %v4607_v25 = vpop.eup %4606  ;;  %1455 = vst.msk [vmem:[#allocation2 + $0x28] sm:$0xff] %vm768_vm1, %v1207_v29  ;;  %v1120_v36 = vadd.f32 1.0, %v4605_v18  ;;  %4626 = vpow2.f32 %v1070_v61  ;;  %v4074_v26 = vmul.f32 -4.0, %v5259_v0  ;;  %v5269_v28 = vadd.f32 %v5104_v24, %v922_v23 }
 0x118   : > { %v4609_v31 = vpop.eup %4608  ;;  %4628 = vrcp.f32 %v1115_v32  ;;  %v1118_v33 = vadd.f32 1.0, %v4607_v25  ;;  %v4077_v38 = vmul.f32 -4.0, %v5264_v22  ;;  %v1082_v42 = vmul.f32 1.442695, %v4076_v19 }
 0x119   : > { %v4611_v39 = vpop.eup %4610  ;;  %v1443_v40 = vmul.f32 %v4609_v31, %v5130_v48  ;;  %4630 = vrcp.f32 %v1120_v36  ;;  %v4075_v43 = vmul.f32 -4.0, %v5269_v28  ;;  %v1078_v47 = vmul.f32 1.442695, %v4074_v26 }
 0x11a   : > { %v4613_v44 = vpop.eup %4612  ;;  %v1441_v45 = vmul.f32 %v4611_v39, %v5134_v51  ;;  %4632 = vrcp.f32 %v1118_v33  ;;  %v1084_v50 = vmul.f32 1.442695, %v4077_v38 }
 0x11b   : > { %v4615_v61 = vpop.eup %4614  ;;  %v1448_v63 = vmul.f32 %v5124_v41, %v1443_v40  ;;  %v1444_v6 = vmul.f32 %v4613_v44, %v5141_v56  ;;  %4634 = vpow2.f32 %v1076_v59  ;;  %v1080_v7 = vmul.f32 1.442695, %v4075_v43  ;;  %v4366_v27 = vpop.f32.mrb[20].mxu0 }
 0x11c   : > { %v4617_v12 = vpop.eup %4616  ;;  %v1446_v48 = vmul.f32 %v5124_v41, %v1441_v45  ;;  %v1212_v13 = vmul.f32 %v4615_v61, %v5137_v53  ;;  %4636 = vpow2.f32 %v1072_v35  ;;  %v5280_v29 = vadd.f32 %v4366_v27, %v5104_v24  ;;  %v935_v51 = vpop.f32.mrb[21].mxu0 }
 0x11d   : > { %v4619_v17 = vpop.eup %4618  ;;  %1488 = vst.msk [vmem:[#allocation2 + $0x130] sm:$0xff] %vm768_vm1, %v1448_v63  ;;  %v1449_v18 = vmul.f32 %v5124_v41, %v1444_v6  ;;  %v1210_v56 = vmul.f32 %v4617_v12, %v5144_v57  ;;  %4638 = vpow2.f32 %v1082_v42  ;;  %v5286_v59 = vadd.f32 %v5104_v24, %v935_v51  ;;  %v4367_v32 = vpop.f32.mrb[22].mxu0 }
 0x11e   : > { %v4621_v19 = vpop.eup %4620  ;;  %1486 = vst.msk [vmem:[#allocation2 + $0x120] sm:$0xff] %vm768_vm1, %v1446_v48  ;;  %1460 = vst.msk [vmem:[#allocation2 + $0x50] sm:$0xff] %vm768_vm1, %v1212_v13  ;;  %v1213_v53 = vmul.f32 %v4619_v17, %v5151_v62  ;;  %4640 = vpow2.f32 %v1078_v47  ;;  %v4080_v23 = vmul.f32 -4.0, %v5280_v29  ;;  %v5293_v25 = vadd.f32 %v4367_v32, %v5104_v24  ;;  %v938_v36 = vpop.f32.mrb[23].mxu0  ;;  %v5301_v62 = vld [vmem:[#allocation2 + $0x20] sm:$0xff]  ;;  %v5305_v42 = vld [vmem:[#allocation2 + $0x28] sm:$0xff] }
 0x11f   : > { %v4623_v57 = vpop.eup %4622  ;;  %1489 = vst.msk [vmem:[#allocation2 + $0x138] sm:$0xff] %vm768_vm1, %v1449_v18  ;;  %1458 = vst.msk [vmem:[#allocation2 + $0x40] sm:$0xff] %vm768_vm1, %v1210_v56  ;;  %v1121_v26 = vadd.f32 1.0, %v4621_v19  ;;  %4642 = vpow2.f32 %v1084_v50  ;;  %v4078_v31 = vmul.f32 -4.0, %v5286_v59  ;;  %v5299_v33 = vadd.f32 %v5104_v24, %v938_v36  ;;  %v5309_v50 = vld [vmem:[#allocation2 + $0x30] sm:$0xff] }
 0x120   : > { %v4625_v35 = vpop.eup %4624  ;;  %1461 = vst.msk [vmem:[#allocation2 + $0x58] sm:$0xff] %vm768_vm1, %v1213_v53  ;;  %v1119_v38 = vadd.f32 1.0, %v4623_v57  ;;  %4644 = vpow2.f32 %v1080_v7  ;;  %v1090_v39 = vmul.f32 1.442695, %v4080_v23  ;;  %v4081_v40 = vmul.f32 -4.0, %v5293_v25  ;;  %v5311_v7 = vld [vmem:[#allocation2 + $0x38] sm:$0xff] }
 0x121   : > { %v4627_v43 = vpop.eup %4626  ;;  %4646 = vrcp.f32 %v1121_v26  ;;  %v1124_v44 = vadd.f32 1.0, %v4625_v35  ;;  %v1086_v45 = vmul.f32 1.442695, %v4078_v31  ;;  %v4079_v47 = vmul.f32 -4.0, %v5299_v33 }
 0x122   : > { %v4629_v61 = vpop.eup %4628  ;;  %4648 = vrcp.f32 %v1119_v38  ;;  %v1122_v63 = vadd.f32 1.0, %v4627_v43  ;;  %v1092_v6 = vmul.f32 1.442695, %v4081_v40  ;;  %v5314_v27 = vrot.slane %v5301_v62, 7 }
 0x123   : > { %v4631_v12 = vpop.eup %4630  ;;  %v1211_v48 = vmul.f32 %v4629_v61, %v5161_v4  ;;  %4650 = vrcp.f32 %v1124_v44  ;;  %v5317_v13 = vmul.f32 1.442695, %v4079_v47  ;;  %v4370_v51 = vpop.f32.mrb[24].mxu0  ;;  %v7565_v17 = vrot.slane %v5305_v42, 7 }
 0x124   : > { %v4633_v18 = vpop.eup %4632  ;;  %v1216_v56 = vmul.f32 %v4631_v12, %v5181_v21  ;;  %4652 = vrcp.f32 %v1122_v63  ;;  %v5322_v32 = vadd.f32 %v4370_v51, %v5104_v24  ;;  %v951_v19 = vpop.f32.mrb[25].mxu0  ;;  %v7566_v26 = vrot.slane %v5311_v7, 7 }
 0x125   : > { %v4635_v23 = vpop.eup %4634  ;;  %1459 = vst.msk [vmem:[#allocation2 + $0x48] sm:$0xff] %vm768_vm1, %v1211_v48  ;;  %v1214_v4 = vmul.f32 %v4633_v18, %v5186_v30  ;;  %4654 = vpow2.f32 %v1090_v39  ;;  %v5328_v36 = vadd.f32 %v5104_v24, %v951_v19  ;;  %v4371_v57 = vpop.f32.mrb[26].mxu0 }
 0x126   : > { %v4637_v21 = vpop.eup %4636  ;;  %1464 = vst.msk [vmem:[#allocation2 + $0x70] sm:$0xff] %vm768_vm1, %v1216_v56  ;;  %v1125_v31 = vadd.f32 1.0, %v4635_v23  ;;  %4656 = vpow2.f32 %v1086_v45  ;;  %v4084_v35 = vmul.f32 -4.0, %v5322_v32  ;;  %v5334_v38 = vadd.f32 %v4371_v57, %v5104_v24  ;;  %v954_v40 = vpop.f32.mrb[27].mxu0  ;;  %v5341_v47 = vld [vmem:[#allocation2 + $0x40] sm:$0xff] }
 0x127   : > { %v4639_v43 = vpop.eup %4638  ;;  %1462 = vst.msk [vmem:[#allocation2 + $0x60] sm:$0xff] %vm768_vm1, %v1214_v4  ;;  %v1123_v30 = vadd.f32 1.0, %v4637_v21  ;;  %4658 = vpow2.f32 %v1092_v6  ;;  %v4082_v39 = vmul.f32 -4.0, %v5328_v36  ;;  %v5339_v44 = vadd.f32 %v5104_v24, %v954_v40 }
 0x128   : > { %v4641_v61 = vpop.eup %4640  ;;  %4660 = vrcp.f32 %v1125_v31  ;;  %v1128_v45 = vadd.f32 1.0, %v4639_v43  ;;  %v1098_v63 = vmul.f32 1.442695, %v4084_v35  ;;  %v4085_v12 = vmul.f32 -4.0, %v5334_v38 }
 0x129   : > { %v4643_v48 = vpop.eup %4642  ;;  %4662 = vrcp.f32 %v1123_v30  ;;  %v1126_v51 = vadd.f32 1.0, %v4641_v61  ;;  %v1094_v18 = vmul.f32 1.442695, %v4082_v39  ;;  %v4083_v56 = vmul.f32 -4.0, %v5339_v44 }
 0x12a   : > { %v4645_v6 = vpop.eup %4644  ;;  %4664 = vrcp.f32 %v1128_v45  ;;  %v1129_v19 = vadd.f32 1.0, %v4643_v48  ;;  %v5345_v23 = vmul.f32 1.442695, %v4085_v12  ;;  %v5348_v4 = vrot.slane %v5341_v47, 7 }
 0x12b   : > { %v4647_v57 = vpop.eup %4646  ;;  %4666 = vrcp.f32 %v1126_v51  ;;  %v1127_v21 = vadd.f32 1.0, %v4645_v6  ;;  %v5350_v31 = vmul.f32 1.442695, %v4083_v56  ;;  %v4374_v35 = vpop.f32.mrb[28].mxu0  ;;  %v5357_v40 = vsel %vm1585_vm4, %v5314_v27, %v7565_v17 }
 0x12c   : > { %v4649_v43 = vpop.eup %4648  ;;  %v1217_v30 = vmul.f32 %v4647_v57, %v5194_v49  ;;  %4668 = vrcp.f32 %v1129_v19  ;;  %v5361_v39 = vadd.f32 %v4374_v35, %v5104_v24  ;;  %v967_v61 = vpop.f32.mrb[29].mxu0  ;;  %v5363_v45 = vld [vmem:[#allocation2 + $0x48] sm:$0xff]  ;;  %v1609_v12 = vsel %vm1585_vm4, %v7566_v26, %v5348_v4 }
 0x12d   : > { %v4651_v48 = vpop.eup %4650  ;;  %v1215_v51 = vmul.f32 %v4649_v43, %v5197_v52  ;;  %4670 = vrcp.f32 %v1127_v21  ;;  %v5372_v56 = vadd.f32 %v5104_v24, %v967_v61  ;;  %v4375_v49 = vpop.f32.mrb[30].mxu0  ;;  %v7567_v6 = vrot.slane %v5363_v45, 7 }
 0x12e   : > { %v4653_v19 = vpop.eup %4652  ;;  %1465 = vst.msk [vmem:[#allocation2 + $0x78] sm:$0xff] %vm768_vm1, %v1217_v30  ;;  %v1220_v57 = vmul.f32 %v4651_v48, %v5227_v9  ;;  %4672 = vpow2.f32 %v5317_v13  ;;  %v4088_v35 = vmul.f32 -4.0, %v5361_v39  ;;  %v5380_v17 = vadd.f32 %v4375_v49, %v5104_v24  ;;  %v970_v52 = vpop.f32.mrb[31].mxu0 }
 0x12f   : > { %v4655_v21 = vpop.eup %4654  ;;  %1463 = vst.msk [vmem:[#allocation2 + $0x68] sm:$0xff] %vm768_vm1, %v1215_v51  ;;  %v1218_v43 = vmul.f32 %v4653_v19, %v5231_v16  ;;  %4674 = vpow2.f32 %v5248_v5  ;;  %v4086_v61 = vmul.f32 -4.0, %v5372_v56  ;;  %v5387_v30 = vadd.f32 %v5104_v24, %v970_v52 }
 0x130   : > { %v4657_v9 = vpop.eup %4656  ;;  %1468 = vst.msk [vmem:[#allocation2 + $0x90] sm:$0xff] %vm768_vm1, %v1220_v57  ;;  %v1132_v13 = vadd.f32 1.0, %v4655_v21  ;;  %4676 = vpow2.f32 %v1098_v63  ;;  %v1106_v48 = vmul.f32 1.442695, %v4088_v35  ;;  %v4089_v49 = vmul.f32 -4.0, %v5380_v17 }
 0x131   : > { %v4659_v53 = vpop.eup %4658  ;;  %1466 = vst.msk [vmem:[#allocation2 + $0x80] sm:$0xff] %vm768_vm1, %v1218_v43  ;;  %v1130_v51 = vadd.f32 1.0, %v4657_v9  ;;  %4678 = vpow2.f32 %v1094_v18  ;;  %v1102_v16 = vmul.f32 1.442695, %v4086_v61  ;;  %v4087_v5 = vmul.f32 -4.0, %v5387_v30 }
 0x132   : > { %v4661_v19 = vpop.eup %4660  ;;  %4680 = vrcp.f32 %v1132_v13  ;;  %v1133_v52 = vadd.f32 1.0, %v4659_v53  ;;  %v1108_v26 = vmul.f32 1.442695, %v4089_v49  ;;  %v5398_v63 = vsel %vm1585_vm4, %v5348_v4, %v7567_v6 }
 0x133   : > { %v4663_v57 = vpop.eup %4662  ;;  %v1221_v35 = vmul.f32 %v4661_v19, %v5235_v20  ;;  %4682 = vrcp.f32 %v1130_v51  ;;  %v1104_v21 = vmul.f32 1.442695, %v4087_v5  ;;  %v4380_v18 = vpop.f32.mrb[32].mxu0  ;;  %v5402_v43 = vmul.f32 %v5172_v14, %v1609_v12 }
 0x134   : > { %v4665_v61 = vpop.eup %4664  ;;  %v1219_v53 = vmul.f32 %v4663_v57, %v5241_v37  ;;  %4684 = vrcp.f32 %v1133_v52  ;;  %v5406_v9 = vadd.f32 %v4380_v18, %v5104_v24  ;;  %v1292_v13 = vpop.f32.mrb[33].mxu0  ;;  %v5410_v49 = vmul.f32 %v5165_v8, %v5357_v40 }
 0x135   : > { %v4667_v6 = vpop.eup %4666  ;;  %1469 = vst.msk [vmem:[#allocation2 + $0x98] sm:$0xff] %vm768_vm1, %v1221_v35  ;;  %v1224_v20 = vmul.f32 %v4665_v61, %v5254_v10  ;;  %4686 = vpow2.f32 %v5345_v23  ;;  %v5416_v12 = vadd.f32 %v5104_v24, %v1292_v13  ;;  %v4381_v37 = vpop.f32.mrb[34].mxu0  ;;  %v1662_v51 = vmul.f32 %v5165_v8, %v5402_v43 }
 0x136   : > { %v4669_v5 = vpop.eup %4668  ;;  %1467 = vst.msk [vmem:[#allocation2 + $0x88] sm:$0xff] %vm768_vm1, %v1219_v53  ;;  %v1222_v19 = vmul.f32 %v4667_v6, %v5259_v0  ;;  %4688 = vpow2.f32 %v5350_v31  ;;  %v4096_v52 = vmul.f32 -4.0, %v5406_v9  ;;  %v5425_v10 = vadd.f32 %v4381_v37, %v5104_v24  ;;  %v1295_v23 = vpop.f32.mrb[35].mxu0 }
 0x137   : > { %v4671_v57 = vpop.eup %4670  ;;  %1472 = vst.msk [vmem:[#allocation2 + $0xb0] sm:$0xff] %vm768_vm1, %v1224_v20  ;;  %v1225_v35 = vmul.f32 %v4669_v5, %v5264_v22  ;;  %4690 = vpow2.f32 %v1106_v48  ;;  %v4094_v18 = vmul.f32 -4.0, %v5416_v12  ;;  %v5432_v0 = vadd.f32 %v5104_v24, %v1295_v23 }
 0x138   : > { %v4673_v31 = vpop.eup %4672  ;;  %1470 = vst.msk [vmem:[#allocation2 + $0xa0] sm:$0xff] %vm768_vm1, %v1222_v19  ;;  %v1223_v6 = vmul.f32 %v4671_v57, %v5269_v28  ;;  %4692 = vpow2.f32 %v1102_v16  ;;  %v1319_v61 = vmul.f32 1.442695, %v4096_v52  ;;  %v4097_v53 = vmul.f32 -4.0, %v5425_v10 }
 0x139   : > { %7690 = vst [vmem:[#allocation8_spill] sm:$0xff] %v5432_v0  ;;  %v4675_v13 = vpop.eup %4674  ;;  %1473 = vst.msk [vmem:[#allocation2 + $0xb8] sm:$0xff] %vm768_vm1, %v1225_v35  ;;  %v1131_v20 = vadd.f32 1.0, %v4673_v31  ;;  %4694 = vpow2.f32 %v1108_v26  ;;  %v1315_v22 = vmul.f32 1.442695, %v4094_v18  ;;  %v4095_v48 = vmul.f32 -4.0, %v5432_v0 }
 0x13a   : > { %v4677_v37 = vpop.eup %4676  ;;  %1471 = vst.msk [vmem:[#allocation2 + $0xa8] sm:$0xff] %vm768_vm1, %v1223_v6  ;;  %v1430_v24 = vadd.f32 1.0, %v4675_v13  ;;  %4696 = vpow2.f32 %v1104_v21  ;;  %v1321_v5 = vmul.f32 1.442695, %v4097_v53  ;;  %v1663_v28 = vmul.f32 %v5165_v8, %v5398_v63  ;;  %v5452_v6 = vld [vmem:[#allocation2 + $0x50] sm:$0xff] }
 0x13b   : > { %v4679_v16 = vpop.eup %4678  ;;  %4698 = vrcp.f32 %v1131_v20  ;;  %v1136_v19 = vadd.f32 1.0, %v4677_v37  ;;  %v5442_v52 = vmul.f32 1.442695, %v4095_v48  ;;  %v1730_v26 = vmul.f32 %v5168_v11, %v5341_v47  ;;  %7692 = vst [vmem:[#allocation10_spill] sm:$0xff] %v5452_v6 }
 0x13c   : > { %v4681_v23 = vpop.eup %4680  ;;  %4700 = vrcp.f32 %v1430_v24  ;;  %v1134_v57 = vadd.f32 1.0, %v4679_v16  ;;  %v1731_v35 = vmul.f32 %v5168_v11, %v5363_v45  ;;  %v5449_v21 = vrot.slane %v5301_v62, 1 }
 0x13d   : > { %v4683_v18 = vpop.eup %4682  ;;  %v1228_v31 = vmul.f32 %v4681_v23, %v5280_v29  ;;  %4702 = vrcp.f32 %v1136_v19  ;;  %v1762_v53 = vadd.f32 %v1730_v26, %v1662_v51  ;;  %v1791_v13 = vrot.slane %v5305_v42, 1 }
 0x13e   : > { %7691 = vst [vmem:[#allocation9_spill] sm:$0xff] %v5449_v21  ;;  %v4685_v20 = vpop.eup %4684  ;;  %v1226_v48 = vmul.f32 %v4683_v18, %v5286_v59  ;;  %4704 = vrcp.f32 %v1134_v57  ;;  %v1763_v37 = vadd.f32 %v1731_v35, %v1663_v28  ;;  %v7569_v24 = vrot.slane %v5309_v50, 1 }
 0x13f   : > { %v4687_v16 = vpop.eup %4686  ;;  %1476 = vst.msk [vmem:[#allocation2 + $0xd0] sm:$0xff] %vm768_vm1, %v1228_v31  ;;  %v1229_v0 = vmul.f32 %v4685_v20, %v5293_v25  ;;  %4706 = vpow2.f32 %v1319_v61  ;;  %v7570_v29 = vrot.slane %v5311_v7, 1  ;;  %v5461_v19 = vrot.slane %v5341_v47, 1 }
 0x140   : > { %v4689_v51 = vpop.eup %4688  ;;  %1474 = vst.msk [vmem:[#allocation2 + $0xc0] sm:$0xff] %vm768_vm1, %v1226_v48  ;;  %v1137_v26 = vadd.f32 1.0, %v4687_v16  ;;  %4708 = vpow2.f32 %v1315_v22  ;;  %v1795_v59 = vrot.slane %v5363_v45, 1  ;;  %v7571_v28 = vrot.slane %v5452_v6, 1 }
 0x141   : > { %7693 = vst [vmem:[#allocation11_spill] sm:$0xff] %v5461_v19  ;;  %v4691_v23 = vpop.eup %4690  ;;  %1477 = vst.msk [vmem:[#allocation2 + $0xd8] sm:$0xff] %vm768_vm1, %v1229_v0  ;;  %v1135_v57 = vadd.f32 1.0, %v4689_v51  ;;  %4710 = vpow2.f32 %v1321_v5  ;;  %v1842_v25 = vsel %vm1818_vm5, %v7570_v29, %v5461_v19  ;;  %v1844_v61 = vsel %vm1818_vm5, %v1791_v13, %v7569_v24 }
 0x142   : > { %v4693_v22 = vpop.eup %4692  ;;  %4712 = vrcp.f32 %v1137_v26  ;;  %v1140_v35 = vadd.f32 1.0, %v4691_v23  ;;  %v5480_v0 = vsel %vm1818_vm5, %v1795_v59, %v7571_v28  ;;  %v1841_v5 = vsel %vm1818_vm5, %v5461_v19, %v1795_v59  ;;  %v5514_v19 = vld [vmem:[#allocation2 + $0x138] sm:$0xff] }
 0x143   : > { %v4695_v18 = vpop.eup %4694  ;;  %4714 = vrcp.f32 %v1135_v57  ;;  %v1138_v31 = vadd.f32 1.0, %v4693_v22  ;;  %v1845_v20 = vsel %vm1818_vm5, %v5449_v21, %v1791_v13  ;;  %v5489_v48 = vmul.f32 %v5175_v15, %v1842_v25  ;;  %7697 = vst [vmem:[#allocation15_spill] sm:$0xff] %v5514_v19 }
 0x144   : > { %v4697_v16 = vpop.eup %4696  ;;  %4716 = vrcp.f32 %v1140_v35  ;;  %v1141_v51 = vadd.f32 1.0, %v4695_v18  ;;  %v5492_v26 = vmul.f32 %v5207_v55, %v1845_v20  ;;  %v5495_v23 = vmul.f32 %v5207_v55, %v1844_v61 }
 0x145   : > { %7694 = vst [vmem:[#allocation12_spill] sm:$0xff] %v5489_v48  ;;  %v4699_v59 = vpop.eup %4698  ;;  %4718 = vrcp.f32 %v1138_v31  ;;  %v1139_v57 = vadd.f32 1.0, %v4697_v16  ;;  %v1895_v22 = vmul.f32 %v5207_v55, %v1841_v5  ;;  %v1896_v13 = vmul.f32 %v5207_v55, %v5480_v0 }
 0x146   : > { %v4701_v24 = vpop.eup %4700  ;;  %v1227_v25 = vmul.f32 %v4699_v59, %v5299_v33  ;;  %4720 = vrcp.f32 %v1141_v51  ;;  %v5503_v35 = vmul.f32 %v5210_v58, %v5357_v40  ;;  %v5507_v18 = vmul.f32 %v5210_v58, %v5398_v63  ;;  %v5532_v59 = vld [vmem:[%s7555_s5 + $0x8] ss:$0 sm:$0xff] }
 0x147   : > { %v4703_v29 = vpop.eup %4702  ;;  %v1442_v31 = vmul.f32 %v4701_v24, %v5217_v1  ;;  %4722 = vrcp.f32 %v1139_v57  ;;  %v5510_v16 = vadd.f32 %v1895_v22, %v1762_v53  ;;  %v5512_v28 = vadd.f32 %v1896_v13, %v1763_v37  ;;  %7698 = vst [vmem:[#allocation16_spill] sm:$0xff] %v5532_v59 }
 0x148   : > { %v4705_v33 = vpop.eup %4704  ;;  %1475 = vst.msk [vmem:[#allocation2 + $0xc8] sm:$0xff] %vm768_vm1, %v1227_v25  ;;  %v1232_v40 = vmul.f32 %v4703_v29, %v5322_v32  ;;  %4724 = vpow2.f32 %v5442_v52  ;;  %v5521_v51 = vmul.f32 %v5200_v54, %v5301_v62  ;;  %v5525_v1 = vmul.f32 %v5200_v54, %v5305_v42 }
 0x149   : > { %7695 = vst [vmem:[#allocation13_spill] sm:$0xff] %v5510_v16  ;;  %7696 = vst [vmem:[#allocation14_spill] sm:$0xff] %v5512_v28  ;;  %v4707_v53 = vpop.eup %4706  ;;  %v1447_v37 = vmul.f32 %v5124_v41, %v1442_v31  ;;  %v1230_v24 = vmul.f32 %v4705_v33, %v5328_v36  ;;  %v5535_v32 = vmul.f32 %v5213_v60, %v1845_v20  ;;  %v7574_v36 = vrot.slane %v5514_v19, 7  ;;  %v5563_v33 = vld [vmem:[#allocation2 + $0x58] sm:$0xff]  ;;  %v5580_v19 = vld [vmem:[#allocation2 + $0x60] sm:$0xff] }
 0x14a   : > { %v5538_v52 = vmul.f32 %v5213_v60, %v1844_v61  ;;  %v4709_v29 = vpop.eup %4708  ;;  %1480 = vst.msk [vmem:[#allocation2 + $0xf0] sm:$0xff] %vm768_vm1, %v1232_v40  ;;  %v1325_v57 = vadd.f32 1.0, %v4707_v53  ;;  %v5542_v22 = vmul.f32 %v5213_v60, %v1841_v5  ;;  %v5546_v41 = vmul.f32 %v5213_v60, %v5480_v0  ;;  %7703 = vst [vmem:[#allocation21_spill] sm:$0xff] %v5563_v33 }
 0x14b   : > { %v4711_v13 = vpop.eup %4710  ;;  %1487 = vst.msk [vmem:[#allocation2 + $0x128] sm:$0xff] %vm768_vm1, %v1447_v37  ;;  %1478 = vst.msk [vmem:[#allocation2 + $0xe0] sm:$0xff] %vm768_vm1, %v1230_v24  ;;  %v1323_v61 = vadd.f32 1.0, %v4709_v29  ;;  %v5553_v20 = vmul.f32 %v5220_v2, %v5398_v63  ;;  %v5557_v25 = vmul.f32 %v5223_v3, %v5341_v47  ;;  %v5561_v31 = vmul.f32 %v5223_v3, %v5363_v45 }
 0x14c   : > { %7699 = vst [vmem:[#allocation17_spill] sm:$0xff] %v5538_v52  ;;  %v4713_v40 = vpop.eup %4712  ;;  %4726 = vrcp.f32 %v1325_v57  ;;  %v1326_v53 = vadd.f32 1.0, %v4711_v13  ;;  %v2199_v63 = vsel %vm1585_vm4, %v7574_v36, %v5348_v4  ;;  %v5571_v37 = vmul.f32 %v5532_v59, %v1841_v5  ;;  %7706 = vst [vmem:[#allocation24_spill] sm:$0xff] %v5580_v19 }
 0x14d   : > { %7700 = vst [vmem:[#allocation18_spill] sm:$0xff] %v5553_v20  ;;  %7701 = vst [vmem:[#allocation19_spill] sm:$0xff] %v5557_v25  ;;  %v4715_v24 = vpop.eup %4714  ;;  %v1233_v29 = vmul.f32 %v4713_v40, %v5334_v38  ;;  %4728 = vrcp.f32 %v1323_v61  ;;  %v2200_v28 = vmul.f32 %v5172_v14, %v2199_v63  ;;  %v5577_v16 = vmul.f32 %v5532_v59, %v5480_v0 }
 0x14e   : > { %7702 = vst [vmem:[#allocation20_spill] sm:$0xff] %v5561_v31  ;;  %7704 = vst [vmem:[#allocation22_spill] sm:$0xff] %v5571_v37  ;;  %v4717_v57 = vpop.eup %4716  ;;  %v1231_v13 = vmul.f32 %v4715_v24, %v5339_v44  ;;  %4730 = vrcp.f32 %v1326_v53  ;;  %v1563_v4 = vrot.slane %v5452_v6, 7  ;;  %v1564_v5 = vrot.slane %v5563_v33, 7 }
 0x14f   : > { %7705 = vst [vmem:[#allocation23_spill] sm:$0xff] %v5577_v16  ;;  %v4719_v36 = vpop.eup %4718  ;;  %1481 = vst.msk [vmem:[#allocation2 + $0xf8] sm:$0xff] %vm768_vm1, %v1233_v29  ;;  %v1236_v38 = vmul.f32 %v4717_v57, %v5361_v39  ;;  %v5587_v61 = vmul.f32 %v5220_v2, %v2200_v28  ;;  %v7708_v0 = vrot.slane %v5311_v7, 7  ;;  %v7709_v40 = vrot.slane %v5309_v50, 7 }
 0x150   : > { %v7711_v63 = vrot.slane %v5305_v42, 7  ;;  %v4721_v39 = vpop.eup %4720  ;;  %1479 = vst.msk [vmem:[#allocation2 + $0xe8] sm:$0xff] %vm768_vm1, %v1231_v13  ;;  %v1234_v28 = vmul.f32 %v4719_v36, %v5372_v56  ;;  %v5609_v29 = vsel %vm1585_vm4, %v1563_v4, %v1564_v5  ;;  %v7713_v57 = vrot.slane %v5363_v45, 7 }
 0x151   : > { %7707 = vst [vmem:[#allocation25_spill] sm:$0xff] %v5587_v61  ;;  %v5595_v44 = vsel %vm1585_vm4, %v7709_v40, %v7708_v0  ;;  %v7710_v53 = vmov %v7709_v40  ;;  %7712 = vst [vmem:[#allocation26_spill] sm:$0xff] %v5609_v29  ;;  %v1797_v40 = vrot.slane %v5563_v33, 1  ;;  %v4723_v16 = vpop.eup %4722  ;;  %v5626_v36 = vmul.f32 %v5165_v8, %v5609_v29 }
 0x152   : > { %v5603_v24 = vsel %vm1585_vm4, %v7711_v63, %v7710_v53  ;;  %v5615_v0 = vsel %vm1585_vm4, %v7713_v57, %v1563_v4  ;;  %1484 = vst.msk [vmem:[#allocation2 + $0x110] sm:$0xff] %vm768_vm1, %v1236_v38  ;;  %v1237_v53 = vmul.f32 %v4721_v39, %v5380_v17  ;;  %v1798_v13 = vrot.slane %v5580_v19, 1  ;;  %v4725_v63 = vpop.eup %4724  ;;  %1482 = vst.msk [vmem:[#allocation2 + $0x100] sm:$0xff] %vm768_vm1, %v1234_v28 }
 0x153   : > { %7714 = vst [vmem:[#allocation27_spill] sm:$0xff] %v5615_v0  ;;  %v5622_v56 = vmul.f32 %v5165_v8, %v5615_v0  ;;  %7716 = vst [vmem:[#allocation29_spill] sm:$0xff] %v5626_v36  ;;  %v1235_v4 = vmul.f32 %v4723_v16, %v5387_v30  ;;  %v7717_v57 = vrot.slane %v5452_v6, 1  ;;  %v7719_v38 = vrot.slane %v5311_v7, 1 }
 0x154   : > { %v7720_v39 = vrot.slane %v5309_v50, 1  ;;  %1485 = vst.msk [vmem:[#allocation2 + $0x118] sm:$0xff] %vm768_vm1, %v1237_v53  ;;  %v1324_v30 = vadd.f32 1.0, %v4725_v63  ;;  %v1838_v16 = vsel %vm1818_vm5, %v1797_v40, %v1798_v13  ;;  %v5666_v53 = vmul.f32 %v5200_v54, %v5309_v50 }
 0x155   : > { %7715 = vst [vmem:[#allocation28_spill] sm:$0xff] %v5622_v56  ;;  %v5635_v17 = vsel %vm1818_vm5, %v7717_v57, %v1797_v40  ;;  %v5647_v56 = vmul.f32 %v5210_v58, %v5603_v24  ;;  %v5658_v57 = vmul.f32 %v5210_v58, %v5595_v44  ;;  %1483 = vst.msk [vmem:[#allocation2 + $0x108] sm:$0xff] %vm768_vm1, %v1235_v4 }
 0x156   : > { %7718 = vst [vmem:[#allocation30_spill] sm:$0xff] %v5635_v17  ;;  %v5643_v36 = vsel %vm1818_vm5, %v7720_v39, %v7719_v38  ;;  %v5654_v28 = vmul.f32 %v5207_v55, %v5635_v17  ;;  %v5662_v38 = vmul.f32 %v5175_v15, %v1838_v16  ;;  %v5670_v40 = vmul.f32 %v5200_v54, %v5311_v7  ;;  %v5676_v39 = vld [vmem:[#allocation2 + $0x68] sm:$0xff]  ;;  %v4727_v37 = vpop.eup %4726  ;;  %v1552_v31 = vld [vmem:[#allocation2 + $0xf8] sm:$0xff] }
 0x157   : > { %v5674_v63 = vmul.f32 %v5213_v60, %v5643_v36  ;;  %7724 = vst [vmem:[#allocation34_spill] sm:$0xff] %v5676_v39  ;;  %4732 = vrcp.f32 %v1324_v30  ;;  %v5680_v4 = vmul.f32 %v5213_v60, %v5489_v48  ;;  %v5684_v16 = vmul.f32 %v5220_v2, %v5615_v0 }
 0x158   : > { %7721 = vst [vmem:[#allocation31_spill] sm:$0xff] %v5654_v28  ;;  %7722 = vst [vmem:[#allocation32_spill] sm:$0xff] %v5662_v38  ;;  %v5688_v28 = vmul.f32 %v5220_v2, %v5609_v29  ;;  %v5692_v25 = vmul.f32 %v5223_v3, %v5452_v6  ;;  %v5696_v30 = vmul.f32 %v5223_v3, %v5563_v33  ;;  %v4729_v29 = vpop.eup %4728  ;;  %v1565_v6 = vrot.slane %v5580_v19, 7 }
 0x159   : > { %7723 = vst [vmem:[#allocation33_spill] sm:$0xff] %v5674_v63  ;;  %7725 = vst [vmem:[#allocation35_spill] sm:$0xff] %v5684_v16  ;;  %v5700_v20 = vmul.f32 %v5532_v59, %v5635_v17  ;;  %v5704_v0 = vmul.f32 %v5532_v59, %v5662_v38  ;;  %v1337_v16 = vmul.f32 %v4727_v37, %v5406_v9  ;;  %v5707_v63 = vrot.slane %v1552_v31, 7  ;;  %v4731_v61 = vpop.eup %4730  ;;  %v5722_v37 = vld [vmem:[#allocation2 + $0x70] sm:$0xff] }
 0x15a   : > { %7726 = vst [vmem:[#allocation36_spill] sm:$0xff] %v5692_v25  ;;  %v7584_v25 = vrot.slane %v5676_v39, 7  ;;  %v1335_v33 = vmul.f32 %v4729_v29, %v5416_v12  ;;  %v5714_v17 = vmul.f32 %v5168_v11, %v5301_v62  ;;  %v1727_v38 = vmul.f32 %v5168_v11, %v5305_v42 }
 0x15b   : > { %7727 = vst [vmem:[#allocation37_spill] sm:$0xff] %v5700_v20  ;;  %7728 = vst [vmem:[#allocation38_spill] sm:$0xff] %v5704_v0  ;;  %v1734_v20 = vmul.f32 %v5168_v11, %v5580_v19  ;;  %v1342_v9 = vmul.f32 %v5245_v46, %v1337_v16  ;;  %v1338_v31 = vmul.f32 %v4731_v61, %v5425_v10  ;;  %v1954_v42 = vld [vmem:[#allocation2 + $0x118] sm:$0xff] }
 0x15c   : > { %7729 = vst [vmem:[#allocation39_spill] sm:$0xff] %v5707_v63  ;;  %v1604_v12 = vsel %vm1585_vm4, %v1565_v6, %v7584_v25  ;;  %v1605_v62 = vsel %vm1585_vm4, %v1564_v5, %v1565_v6  ;;  %v1340_v29 = vmul.f32 %v5245_v46, %v1335_v33  ;;  %v1735_v10 = vmul.f32 %v5168_v11, %v5676_v39 }
 0x15d   : > { %v5732_v0 = vmul.f32 %v5172_v14, %v1605_v62  ;;  %v1667_v16 = vmul.f32 %v5165_v8, %v1604_v12  ;;  %1452 = vst.msk [vmem:[#allocation2 + $0x10] sm:$0xff] %vm768_vm1, %v1342_v9  ;;  %v1343_v61 = vmul.f32 %v5245_v46, %v1338_v31  ;;  %v5739_v52 = vrot.slane %v1954_v42, 7 }
 0x15e   : > { %v1759_v25 = vadd.f32 %v1727_v38, %v5410_v49  ;;  %v1799_v6 = vrot.slane %v5676_v39, 1  ;;  %1450 = vst.msk [vmem:[#allocation2] sm:$0xff] %vm768_vm1, %v1340_v29  ;;  %v7586_v62 = vrot.slane %v5722_v37, 1  ;;  %v5749_v48 = vmul.f32 %v5210_v58, %v5402_v43 }
 0x15f   : > { %7730 = vst [vmem:[#allocation40_spill] sm:$0xff] %v5732_v0  ;;  %7731 = vst [vmem:[#allocation41_spill] sm:$0xff] %v5739_v52  ;;  %v1666_v33 = vmul.f32 %v5165_v8, %v5732_v0  ;;  %v1767_v5 = vadd.f32 %v1735_v10, %v1667_v16  ;;  %v1963_v49 = vsel %vm1585_vm4, %v5739_v52, %v5314_v27 }
 0x160   : > { %1453 = vst.msk [vmem:[#allocation2 + $0x18] sm:$0xff] %vm768_vm1, %v1343_v61  ;;  %v1837_v38 = vsel %vm1818_vm5, %v1798_v13, %v1799_v6  ;;  %v1924_v9 = vadd.f32 %v5495_v23, %v1759_v25  ;;  %v5760_v31 = vmul.f32 %v5210_v58, %v1604_v12  ;;  %v1964_v29 = vmul.f32 %v5172_v14, %v1963_v49 }
 0x161   : > { %v1766_v42 = vadd.f32 %v1734_v20, %v1666_v33  ;;  %v1836_v43 = vsel %vm1818_vm5, %v1799_v6, %v7586_v62  ;;  %v1899_v16 = vmul.f32 %v5207_v55, %v1837_v38  ;;  %v4733_v10 = vpop.eup %4732  ;;  %v5772_v23 = vmul.f32 %v5200_v54, %v5341_v47  ;;  %v7733_v20 = vld [vmem:[#allocation8_spill] sm:$0xff] }
 0x162   : > { %7732 = vst [vmem:[#allocation42_spill] sm:$0xff] %v5760_v31  ;;  %v1900_v61 = vmul.f32 %v5207_v55, %v1836_v43  ;;  %v2010_v13 = vadd.f32 %v5507_v18, %v1924_v9  ;;  %v2046_v25 = vmul.f32 %v5200_v54, %v5363_v45  ;;  %v1336_v33 = vmul.f32 %v4733_v10, %v7733_v20 }
 0x163   : > { %v5778_v49 = vmul.f32 %v5210_v58, %v1964_v29  ;;  %v5780_v6 = vadd.f32 %v1899_v16, %v1766_v42  ;;  %v5783_v62 = vmul.f32 %v5213_v60, %v1837_v38  ;;  %v5788_v9 = vmul.f32 %v5213_v60, %v1836_v43 }
 0x164   : > { %v5785_v52 = vadd.f32 %v1900_v61, %v1767_v5  ;;  %v2078_v18 = vadd.f32 %v2046_v25, %v2010_v13  ;;  %v5792_v47 = vmul.f32 %v5220_v2, %v5732_v0  ;;  %v1341_v45 = vmul.f32 %v5245_v46, %v1336_v33  ;;  %v1523_v10 = vld [vmem:[#allocation2 + $0x10] sm:$0xff] }
 0x165   : > { %7734 = vst [vmem:[#allocation8_spill] sm:$0xff] %v5780_v6  ;;  %7735 = vst [vmem:[#allocation43_spill] sm:$0xff] %v5783_v62  ;;  %v2214_v29 = vmul.f32 %v5220_v2, %v1604_v12  ;;  %v5798_v42 = vmul.f32 %v5223_v3, %v5580_v19  ;;  %v2282_v5 = vmul.f32 %v5223_v3, %v5676_v39  ;;  %v5802_v16 = vld [vmem:[#allocation2] sm:$0xff]  ;;  %v1555_v61 = vrot.slane %v1523_v10, 7 }
 0x166   : > { %7736 = vst [vmem:[#allocation44_spill] sm:$0xff] %v5785_v52  ;;  %7737 = vst [vmem:[#allocation45_spill] sm:$0xff] %v5788_v9  ;;  %v1788_v13 = vrot.slane %v1523_v10, 1  ;;  %v1724_v25 = vmul.f32 %v5168_v11, %v1523_v10  ;;  %v2160_v20 = vadd.f32 %v5546_v41, %v2078_v18  ;;  %v5806_v52 = vld [vmem:[#allocation2 + $0x78] sm:$0xff]  ;;  %v1553_v12 = vrot.slane %v5802_v16, 7 }
 0x167   : > { %7738 = vst [vmem:[#allocation46_spill] sm:$0xff] %v5802_v16  ;;  %1451 = vst.msk [vmem:[#allocation2 + $0x8] sm:$0xff] %vm768_vm1, %v1341_v45  ;;  %v1524_v46 = vld [vmem:[#allocation2 + $0x18] sm:$0xff]  ;;  %v1722_v33 = vmul.f32 %v5168_v11, %v5802_v16  ;;  %v5814_v9 = vmul.f32 %v5532_v59, %v1837_v38  ;;  %v2364_v45 = vmul.f32 %v5532_v59, %v1836_v43  ;;  %v1567_v31 = vrot.slane %v5722_v37, 7 }
 0x168   : > { %v1789_v62 = vrot.slane %v1524_v46, 1  ;;  %v1556_v19 = vrot.slane %v1524_v46, 7  ;;  %v1725_v10 = vmul.f32 %v5168_v11, %v1524_v46  ;;  %v2246_v41 = vadd.f32 %v2214_v29, %v2160_v20 }
 0x169   : > { %v1617_v18 = vsel %vm1585_vm4, %v5707_v63, %v1553_v12  ;;  %v7739_v3 = vrot.slane %v5806_v52, 7 }
 0x16a   : > { %v1618_v6 = vmul.f32 %v5172_v14, %v1617_v18  ;;  %v1846_v38 = vsel %vm1818_vm5, %v1789_v62, %v5449_v21  ;;  %v1614_v46 = vsel %vm1585_vm4, %v1555_v61, %v1556_v19  ;;  %v1847_v29 = vsel %vm1818_vm5, %v1788_v13, %v1789_v62 }
 0x16b   : > { %v1854_v20 = vmul.f32 %v5175_v15, %v1846_v38  ;;  %v1657_v43 = vmul.f32 %v5165_v8, %v1614_v46  ;;  %v1889_v63 = vmul.f32 %v5207_v55, %v1847_v29  ;;  %v1613_v18 = vsel %vm1585_vm4, %v1556_v19, %v5314_v27  ;;  %v5848_v38 = vld [vmem:[%s7556_s6] ss:$0 sm:$0xff] }
 0x16c   : > { %v1654_v0 = vmul.f32 %v5165_v8, %v1618_v6  ;;  %v1622_v21 = vmul.f32 %v5172_v14, %v1613_v18  ;;  %v2314_v59 = vadd.f32 %v2282_v5, %v2246_v41  ;;  %v5843_v62 = vsel %vm1585_vm4, %v1567_v31, %v7739_v3 }
 0x16d   : > { %v1757_v46 = vadd.f32 %v1725_v10, %v1657_v43  ;;  %v1890_v29 = vmul.f32 %v5207_v55, %v1854_v20  ;;  %v7740_v27 = vrot.slane %v5676_v39, 7  ;;  %v1660_v6 = vmul.f32 %v5165_v8, %v5603_v24 }
 0x16e   : > { %v1522_v5 = vld [vmem:[#allocation2 + $0x8] sm:$0xff]  ;;  %v1754_v3 = vadd.f32 %v1722_v33, %v1654_v0  ;;  %v1658_v41 = vmul.f32 %v5165_v8, %v1622_v21  ;;  %v2396_v18 = vadd.f32 %v2364_v45, %v2314_v59  ;;  %v1661_v14 = vmul.f32 %v5165_v8, %v5595_v44 }
 0x16f   : > { %v5855_v19 = vsel %vm1585_vm4, %v7740_v27, %v1567_v31  ;;  %v1554_v10 = vrot.slane %v1522_v5, 7  ;;  %v1723_v20 = vmul.f32 %v5168_v11, %v1522_v5  ;;  %v1787_v43 = vrot.slane %v1522_v5, 1 }
 0x170   : > { %v1922_v39 = vadd.f32 %v1890_v29, %v1757_v46  ;;  %v1758_v2 = vadd.f32 %v5714_v17, %v1658_v41  ;;  %v5865_v31 = vadd.f32 %v5848_v38, %v2396_v18  ;;  %v1668_v24 = vmul.f32 %v5165_v8, %v5855_v19 }
 0x171   : > { %v1669_v21 = vmul.f32 %v5165_v8, %v5843_v62  ;;  %v1616_v59 = vsel %vm1585_vm4, %v1553_v12, %v1554_v10  ;;  %v1848_v44 = vsel %vm1818_vm5, %v1787_v43, %v1788_v13  ;;  %v7741_v0 = vrot.slane %v5802_v16, 1 }
 0x172   : > { %v1615_v33 = vsel %vm1585_vm4, %v1554_v10, %v1555_v61  ;;  %v1655_v45 = vmul.f32 %v5165_v8, %v1616_v59  ;;  %v1888_v29 = vmul.f32 %v5207_v55, %v1848_v44  ;;  %v2008_v12 = vadd.f32 %v5658_v57, %v1922_v39 }
 0x173   : > { %v1849_v17 = vsel %vm1818_vm5, %v7741_v0, %v1787_v43  ;;  %v1656_v27 = vmul.f32 %v5165_v8, %v1615_v33  ;;  %v1923_v13 = vadd.f32 %v5492_v26, %v1758_v2  ;;  %v1728_v5 = vmul.f32 %v5168_v11, %v5309_v50  ;;  %v5898_v0 = vld [vmem:[#allocation2 + $0x80] sm:$0xff] }
 0x174   : > { %v1887_v46 = vmul.f32 %v5207_v55, %v1849_v17  ;;  %v1729_v41 = vmul.f32 %v5168_v11, %v5311_v7  ;;  %v1755_v18 = vadd.f32 %v1723_v20, %v1655_v45  ;;  %v1736_v43 = vmul.f32 %v5168_v11, %v5722_v37 }
 0x175   : > { %v1756_v10 = vadd.f32 %v1724_v25, %v1656_v27  ;;  %v2076_v59 = vadd.f32 %v5670_v40, %v2008_v12  ;;  %v2009_v44 = vadd.f32 %v5749_v48, %v1923_v13  ;;  %v1737_v57 = vmul.f32 %v5168_v11, %v5806_v52 }
 0x176   : > { %v1919_v61 = vadd.f32 %v1887_v46, %v1754_v3  ;;  %v1760_v2 = vadd.f32 %v1728_v5, %v1660_v6  ;;  %v1920_v26 = vadd.f32 %v1888_v29, %v1755_v18  ;;  %v1761_v7 = vadd.f32 %v1729_v41, %v1661_v14  ;;  %v7746_v29 = vld [vmem:[#allocation33_spill] sm:$0xff]  ;;  %v7748_v18 = vld [vmem:[#allocation18_spill] sm:$0xff] }
 0x177   : > { %v1921_v39 = vadd.f32 %v1889_v63, %v1756_v10  ;;  %v2158_v25 = vadd.f32 %v5680_v4, %v2076_v59  ;;  %v2077_v3 = vadd.f32 %v5772_v23, %v2009_v44  ;;  %v1768_v20 = vadd.f32 %v1736_v43, %v1668_v24  ;;  %v7749_v10 = vld [vmem:[#allocation19_spill] sm:$0xff] }
 0x178   : > { %v2005_v50 = vadd.f32 %v5778_v49, %v1919_v61  ;;  %v5902_v17 = vadd.f32 %v1737_v57, %v1669_v21  ;;  %v2006_v48 = vadd.f32 %v5503_v35, %v1920_v26  ;;  %v1801_v33 = vrot.slane %v5806_v52, 1  ;;  %v7743_v21 = vld [vmem:[#allocation12_spill] sm:$0xff]  ;;  %v7750_v59 = vld [vmem:[#allocation35_spill] sm:$0xff] }
 0x179   : > { %v2007_v6 = vadd.f32 %v5647_v56, %v1921_v39  ;;  %v2244_v63 = vadd.f32 %v5688_v28, %v2158_v25  ;;  %v2159_v49 = vadd.f32 %v5542_v22, %v2077_v3  ;;  %v1802_v14 = vrot.slane %v5898_v0, 1 }
 0x17a   : > { %v2073_v40 = vadd.f32 %v5521_v51, %v2005_v50  ;;  %v1893_v4 = vmul.f32 %v5207_v55, %v5643_v36  ;;  %v2074_v23 = vadd.f32 %v5525_v1, %v2006_v48  ;;  %v7742_v51 = vrot.slane %v5722_v37, 1 }
 0x17b   : > { %v2075_v35 = vadd.f32 %v5666_v53, %v2007_v6  ;;  %v2312_v28 = vadd.f32 %v5696_v30, %v2244_v63  ;;  %v2245_v22 = vadd.f32 %v5792_v47, %v2159_v49  ;;  %v1834_v36 = vsel %vm1818_vm5, %v1801_v33, %v1802_v14  ;;  %v7745_v53 = vld [vmem:[#allocation25_spill] sm:$0xff]  ;;  %v7747_v30 = vld [vmem:[#allocation38_spill] sm:$0xff] }
 0x17c   : > { %v2155_v24 = vadd.f32 %v5535_v32, %v2073_v40  ;;  %v1835_v56 = vsel %vm1818_vm5, %v7742_v51, %v1801_v33  ;;  %v1894_v1 = vmul.f32 %v5207_v55, %v7743_v21  ;;  %v7744_v32 = vld [vmem:[#allocation17_spill] sm:$0xff]  ;;  %v5932_v12 = vmul.f32 %v5175_v15, %v1834_v36  ;;  %v7753_v40 = vld [vmem:[#allocation36_spill] sm:$0xff]  ;;  %v7754_v33 = vld [vmem:[#allocation27_spill] sm:$0xff] }
 0x17d   : > { %v2156_v45 = vadd.f32 %v7744_v32, %v2074_v23  ;;  %v2157_v27 = vadd.f32 %v7746_v29, %v2075_v35  ;;  %v2394_v13 = vadd.f32 %v7747_v30, %v2312_v28  ;;  %v2313_v47 = vadd.f32 %v5798_v42, %v2245_v22  ;;  %v7751_v42 = vld [vmem:[#allocation20_spill] sm:$0xff]  ;;  %v7757_v51 = vld [vmem:[#allocation37_spill] sm:$0xff] }
 0x17e   : > { %v2241_v46 = vadd.f32 %v7745_v53, %v2155_v24  ;;  %v1901_v5 = vmul.f32 %v5207_v55, %v1835_v56  ;;  %v1925_v41 = vadd.f32 %v1893_v4, %v1760_v2  ;;  %v5942_v57 = vmul.f32 %v5207_v55, %v5932_v12  ;;  %v7752_v2 = vld [vmem:[#allocation22_spill] sm:$0xff] }
 0x17f   : > { %v2242_v61 = vadd.f32 %v7748_v18, %v2156_v45  ;;  %v2243_v44 = vadd.f32 %v7750_v59, %v2157_v27  ;;  %v2433_v26 = vadd.f32 %v5848_v38, %v2394_v13  ;;  %v2395_v50 = vadd.f32 %v5814_v9, %v2313_v47  ;;  %v7755_v4 = vld [vmem:[#allocation26_spill] sm:$0xff]  ;;  %v7759_v45 = vld [vmem:[#allocation21_spill] sm:$0xff]  ;;  %v7761_v13 = vld [vmem:[#allocation32_spill] sm:$0xff] }
 0x180   : > { %v2309_v43 = vadd.f32 %v7749_v10, %v2241_v46  ;;  %v1926_v39 = vadd.f32 %v1894_v1, %v1761_v7  ;;  %v5946_v25 = vadd.f32 %v1901_v5, %v1768_v20  ;;  %v1979_v63 = vmul.f32 %v5210_v58, %v7754_v33  ;;  %v7756_v20 = vld [vmem:[#allocation23_spill] sm:$0xff]  ;;  %v7758_v1 = vld [vmem:[#allocation10_spill] sm:$0xff] }
 0x181   : > { %v2310_v3 = vadd.f32 %v7751_v42, %v2242_v61  ;;  %v2311_v6 = vadd.f32 %v7753_v40, %v2243_v44  ;;  %v2434_v49 = vadd.f32 %v5848_v38, %v2395_v50  ;;  %v1980_v23 = vmul.f32 %v5210_v58, %v7755_v4  ;;  %v7760_v27 = vld [vmem:[#allocation30_spill] sm:$0xff]  ;;  %v7763_v50 = vld [vmem:[#allocation7_spill] sm:$0xff] }
 0x182   : > { %v2391_v48 = vadd.f32 %v7752_v2, %v2309_v43  ;;  %v5958_v9 = vmul.f32 %v5210_v58, %v5855_v19  ;;  %v5962_v7 = vmul.f32 %v5210_v58, %v5843_v62  ;;  %v2011_v22 = vadd.f32 %v1979_v63, %v1925_v41  ;;  %v7762_v18 = vld [vmem:[#allocation6_spill] sm:$0xff] }
 0x183   : > { %v2392_v24 = vadd.f32 %v7756_v20, %v2310_v3  ;;  %v2393_v28 = vadd.f32 %v7757_v51, %v2311_v6  ;;  %v2464_v36 = vpack.c.bf16 %v5865_v31, %v2434_v49  ;;  %v2012_v21 = vadd.f32 %v1980_v23, %v1926_v39  ;;  %v5983_v10 = vld [vmem:[#allocation2 + $0x88] sm:$0xff]  ;;  %v5992_v6 = vld [vmem:[#allocation2 + $0x90] sm:$0xff]  ;;  %v7766_v51 = vld [vmem:[#allocation40_spill] sm:$0xff] }
 0x184   : > { %v2430_v35 = vadd.f32 %v5848_v38, %v2391_v48  ;;  %v2047_v32 = vmul.f32 %v5200_v54, %v7758_v1  ;;  %v2048_v53 = vmul.f32 %v5200_v54, %v7759_v45  ;;  %v2129_v30 = vmul.f32 %v5213_v60, %v7760_v27  ;;  %v7764_v48 = vld [vmem:[#allocation16_spill] sm:$0xff] }
 0x185   : > { %v2431_v46 = vadd.f32 %v5848_v38, %v2392_v24  ;;  %v2432_v29 = vadd.f32 %v5848_v38, %v2393_v28  ;;  %v2130_v47 = vmul.f32 %v5213_v60, %v7761_v13  ;;  %v5979_v31 = vmul.f32 %v5213_v60, %v1835_v56 }
 0x186   : > { %v2079_v5 = vadd.f32 %v2047_v32, %v2011_v22  ;;  %v2080_v41 = vadd.f32 %v2048_v53, %v2012_v21  ;;  %v2215_v61 = vmul.f32 %v7762_v18, %v5855_v19  ;;  %v2216_v44 = vmul.f32 %v7762_v18, %v5843_v62  ;;  %v7767_v32 = vld [vmem:[#allocation5_spill] sm:$0xff] }
 0x187   : > { %v2462_v43 = vpack.c.bf16 %v2431_v46, %v2430_v35  ;;  %v2463_v59 = vpack.c.bf16 %v2433_v26, %v2432_v29  ;;  %v2283_v39 = vmul.f32 %v7763_v50, %v5722_v37  ;;  %v2284_v2 = vmul.f32 %v7763_v50, %v5806_v52 }
 0x188   : > { %v2161_v42 = vadd.f32 %v2129_v30, %v2079_v5  ;;  %v2162_v3 = vadd.f32 %v2130_v47, %v2080_v41  ;;  %v2365_v40 = vmul.f32 %v7764_v48, %v1835_v56  ;;  %v2366_v19 = vmul.f32 %v7764_v48, %v5932_v12  ;;  %v7768_v30 = vld [vmem:[#allocation13_spill] sm:$0xff] }
 0x189   : > { %4390 = vmatprep.mubr.msk.bf16.mxu1 %vm768_vm1, %v2462_v43  ;;  %v1569_v26 = vrot.slane %v5898_v0, 7  ;;  %v1570_v62 = vrot.slane %v5983_v10, 7  ;;  %v1738_v33 = vmul.f32 %v5168_v11, %v5898_v0  ;;  %v1739_v56 = vmul.f32 %v5168_v11, %v5983_v10 }
 0x18a   : > { %4391 = vmatmul.mubr.msk.bf16.vlgmr.msra.gmra.mrb[4].mxu1 %vm768_vm1, %v2463_v59  ;;  %v2247_v63 = vadd.f32 %v2215_v61, %v2161_v42  ;;  %v2248_v49 = vadd.f32 %v2216_v44, %v2162_v3  ;;  %v1803_v4 = vrot.slane %v5983_v10, 1  ;;  %v7765_v20 = vrot.slane %v5806_v52, 7  ;;  %v7770_v42 = vld [vmem:[#allocation42_spill] sm:$0xff] }
 0x18b   : > { %4394 = vmatprep.mubr.msk.bf16.mxu1 %vm768_vm1, %v2464_v36  ;;  %v1600_v23 = vsel %vm1585_vm4, %v1569_v26, %v1570_v62  ;;  %v1804_v35 = vrot.slane %v5992_v6, 1  ;;  %v1981_v28 = vmul.f32 %v5210_v58, %v7766_v51 }
 0x18c   : > { %v1601_v24 = vsel %vm1585_vm4, %v7765_v20, %v1569_v26  ;;  %v2315_v22 = vadd.f32 %v2283_v39, %v2247_v63  ;;  %v2316_v21 = vadd.f32 %v2284_v2, %v2248_v49  ;;  %v1671_v36 = vmul.f32 %v5165_v8, %v1600_v23  ;;  %v7769_v39 = vld [vmem:[#allocation14_spill] sm:$0xff]  ;;  %v7771_v2 = vld [vmem:[#allocation24_spill] sm:$0xff] }
 0x18d   : > { %v6016_v53 = vmul.f32 %v7767_v32, %v1601_v24  ;;  %v1832_v46 = vsel %vm1818_vm5, %v1803_v4, %v1804_v35  ;;  %v1833_v29 = vsel %vm1818_vm5, %v1802_v14, %v1803_v4  ;;  %v6028_v27 = vmul.f32 %v5210_v58, %v1600_v23 }
 0x18e   : > { %v2013_v47 = vadd.f32 %v1981_v28, %v7768_v30  ;;  %v2397_v5 = vadd.f32 %v2365_v40, %v2315_v22  ;;  %v2398_v41 = vadd.f32 %v2366_v19, %v2316_v21  ;;  %v1771_v43 = vadd.f32 %v1739_v56, %v1671_v36  ;;  %v7772_v19 = vld [vmem:[#allocation34_spill] sm:$0xff]  ;;  %v7773_v36 = vld [vmem:[#allocation43_spill] sm:$0xff] }
 0x18f   : > { %v1670_v61 = vmul.f32 %v5165_v8, %v6016_v53  ;;  %v1903_v59 = vmul.f32 %v5207_v55, %v1833_v29  ;;  %v1904_v44 = vmul.f32 %v5207_v55, %v1832_v46  ;;  %v2014_v3 = vadd.f32 %v7770_v42, %v7769_v39 }
 0x190   : > { %v2049_v14 = vmul.f32 %v5200_v54, %v7771_v2  ;;  %v2436_v26 = vadd.f32 %v5848_v38, %v2397_v5  ;;  %v2437_v63 = vadd.f32 %v5848_v38, %v2398_v41  ;;  %v2050_v49 = vmul.f32 %v5200_v54, %v7772_v19 }
 0x191   : > { %v1770_v40 = vadd.f32 %v1738_v33, %v1670_v61  ;;  %v6043_v4 = vadd.f32 %v1904_v44, %v1771_v43  ;;  %v6046_v20 = vmul.f32 %v5213_v60, %v1833_v29  ;;  %v6049_v24 = vmul.f32 %v5213_v60, %v1832_v46  ;;  %v6055_v33 = vld [vmem:[#allocation2 + $0x98] sm:$0xff]  ;;  %v7774_v61 = vld [vmem:[#allocation45_spill] sm:$0xff] }
 0x192   : > { %v2081_v56 = vadd.f32 %v2049_v14, %v2013_v47  ;;  %v2465_v51 = vpack.c.bf16 %v2437_v63, %v2436_v26  ;;  %v2082_v22 = vadd.f32 %v2050_v49, %v2014_v3  ;;  %v2217_v21 = vmul.f32 %v7762_v18, %v6016_v53  ;;  %v6073_v26 = vld [vmem:[#allocation2 + $0xa0] sm:$0xff]  ;;  %v7775_v49 = vld [vmem:[#allocation28_spill] sm:$0xff] }
 0x193   : > { %v6051_v28 = vadd.f32 %v1903_v59, %v1770_v40  ;;  %v2218_v5 = vmul.f32 %v7762_v18, %v1600_v23  ;;  %v2285_v47 = vmul.f32 %v7763_v50, %v5898_v0  ;;  %v2286_v41 = vmul.f32 %v7763_v50, %v5983_v10 }
 0x194   : > { %v2163_v30 = vadd.f32 %v7773_v36, %v2081_v56  ;;  %4395 = vmatmul.mubr.msk.bf16.gmra.mrb[8].mxu1 %vm768_vm1, %v2465_v51  ;;  %v2164_v43 = vadd.f32 %v7774_v61, %v2082_v22  ;;  %v2367_v59 = vmul.f32 %v7764_v48, %v1833_v29  ;;  %v2368_v44 = vmul.f32 %v7764_v48, %v1832_v46  ;;  %v7776_v22 = vld [vmem:[#allocation29_spill] sm:$0xff] }
 0x195   : > { %v1571_v39 = vrot.slane %v5992_v6, 7  ;;  %v1572_v3 = vrot.slane %v6055_v33, 7  ;;  %v1732_v23 = vmul.f32 %v5168_v11, %v7758_v1  ;;  %v1733_v2 = vmul.f32 %v5168_v11, %v7759_v45 }
 0x196   : > { %v2249_v42 = vadd.f32 %v2217_v21, %v2163_v30  ;;  %v2250_v14 = vadd.f32 %v2218_v5, %v2164_v43  ;;  %v1740_v46 = vmul.f32 %v5168_v11, %v5992_v6  ;;  %v1741_v29 = vmul.f32 %v5168_v11, %v6055_v33 }
 0x197   : > { %v1599_v63 = vsel %vm1585_vm4, %v1570_v62, %v1571_v39  ;;  %v1598_v19 = vsel %vm1585_vm4, %v1571_v39, %v1572_v3  ;;  %v1764_v45 = vadd.f32 %v1732_v23, %v7775_v49  ;;  %v1765_v21 = vadd.f32 %v1733_v2, %v7776_v22  ;;  %v7777_v39 = vld [vmem:[#allocation31_spill] sm:$0xff] }
 0x198   : > { %v2317_v40 = vadd.f32 %v2285_v47, %v2249_v42  ;;  %v1672_v1 = vmul.f32 %v5165_v8, %v1599_v63  ;;  %v2318_v56 = vadd.f32 %v2286_v41, %v2250_v14  ;;  %v1673_v51 = vmul.f32 %v5165_v8, %v1598_v19 }
 0x199   : > { %v1805_v62 = vrot.slane %v6055_v33, 1  ;;  %v1806_v5 = vrot.slane %v6073_v26, 1  ;;  %v1898_v47 = vmul.f32 %v5207_v55, %v7761_v13  ;;  %v1929_v42 = vadd.f32 %v7777_v39, %v1764_v45 }
 0x19a   : > { %v2399_v36 = vadd.f32 %v2367_v59, %v2317_v40  ;;  %v1772_v30 = vadd.f32 %v1740_v46, %v1672_v1  ;;  %v2400_v61 = vadd.f32 %v2368_v44, %v2318_v56  ;;  %v6091_v43 = vadd.f32 %v1741_v29, %v1673_v51 }
 0x19b   : > { %v1831_v41 = vsel %vm1818_vm5, %v1804_v35, %v1805_v62  ;;  %v1830_v59 = vsel %vm1818_vm5, %v1805_v62, %v1806_v5  ;;  %v1930_v14 = vadd.f32 %v1898_v47, %v1765_v21  ;;  %v6107_v46 = vmul.f32 %v5210_v58, %v1599_v63  ;;  %v6126_v21 = vld [vmem:[#allocation2 + $0xa8] sm:$0xff]  ;;  %v6139_v47 = vld [vmem:[#allocation2 + $0xb0] sm:$0xff] }
 0x19c   : > { %v2438_v23 = vadd.f32 %v5848_v38, %v2399_v36  ;;  %v1905_v2 = vmul.f32 %v5207_v55, %v1831_v41  ;;  %v2439_v13 = vadd.f32 %v5848_v38, %v2400_v61  ;;  %v6104_v44 = vmul.f32 %v5175_v15, %v1830_v59 }
 0x19d   : > { %v6110_v35 = vmul.f32 %v5210_v58, %v1598_v19  ;;  %v2015_v40 = vadd.f32 %v5958_v9, %v1929_v42  ;;  %v2016_v1 = vadd.f32 %v5962_v7, %v1930_v14  ;;  %v2051_v49 = vmul.f32 %v5200_v54, %v5722_v37 }
 0x19e   : > { %v6112_v29 = vadd.f32 %v1905_v2, %v1772_v30  ;;  %v2466_v45 = vpack.c.bf16 %v2439_v13, %v2438_v23  ;;  %v6120_v56 = vmul.f32 %v5207_v55, %v6104_v44  ;;  %v2052_v51 = vmul.f32 %v5200_v54, %v5806_v52 }
 0x19f   : > { %v2134_v22 = vmul.f32 %v5213_v60, %v5932_v12  ;;  %v2083_v62 = vadd.f32 %v2051_v49, %v2015_v40  ;;  %v6129_v9 = vmul.f32 %v5213_v60, %v1831_v41  ;;  %v2219_v7 = vmul.f32 %v7762_v18, %v1599_v63 }
 0x1a0   : > { %7778 = vst [vmem:[#allocation12_spill] sm:$0xff] %v6112_v29  ;;  %v2220_v37 = vmul.f32 %v7762_v18, %v1598_v19  ;;  %4398 = vmatprep.mubr.msk.bf16.mxu1 %vm768_vm1, %v2466_v45  ;;  %v2084_v36 = vadd.f32 %v2052_v51, %v2016_v1  ;;  %v2287_v30 = vmul.f32 %v7763_v50, %v5992_v6  ;;  %v1573_v19 = vrot.slane %v6073_v26, 7 }
 0x1a1   : > { %v2288_v52 = vmul.f32 %v7763_v50, %v6055_v33  ;;  %v2369_v12 = vmul.f32 %v7764_v48, %v1831_v41  ;;  %v2165_v61 = vadd.f32 %v5979_v31, %v2083_v62  ;;  %v2370_v63 = vmul.f32 %v7764_v48, %v6104_v44 }
 0x1a2   : > { %v1574_v39 = vrot.slane %v6126_v21, 7  ;;  %v2166_v42 = vadd.f32 %v2134_v22, %v2084_v36  ;;  %v1742_v23 = vmul.f32 %v5168_v11, %v6073_v26  ;;  %v1743_v59 = vmul.f32 %v5168_v11, %v6126_v21 }
 0x1a3   : > { %v1807_v41 = vrot.slane %v6126_v21, 1  ;;  %v2251_v2 = vadd.f32 %v2219_v7, %v2165_v61  ;;  %v1597_v14 = vsel %vm1585_vm4, %v1572_v3, %v1573_v19  ;;  %v1808_v13 = vrot.slane %v6139_v47, 1 }
 0x1a4   : > { %v1596_v31 = vsel %vm1585_vm4, %v1573_v19, %v1574_v39  ;;  %v2252_v40 = vadd.f32 %v2220_v37, %v2166_v42  ;;  %v6157_v1 = vmul.f32 %v7767_v32, %v1597_v14  ;;  %v1985_v3 = vmul.f32 %v5210_v58, %v6016_v53 }
 0x1a5   : > { %v1675_v49 = vmul.f32 %v5165_v8, %v1596_v31  ;;  %v1829_v45 = vsel %vm1818_vm5, %v1806_v5, %v1807_v41  ;;  %v2319_v51 = vadd.f32 %v2287_v30, %v2251_v2  ;;  %v1828_v22 = vsel %vm1818_vm5, %v1807_v41, %v1808_v13  ;;  %v7779_v5 = vld [vmem:[#allocation8_spill] sm:$0xff] }
 0x1a6   : > { %v1907_v62 = vmul.f32 %v5207_v55, %v1829_v45  ;;  %v2320_v7 = vadd.f32 %v2288_v52, %v2252_v40  ;;  %v1674_v37 = vmul.f32 %v5165_v8, %v6157_v1  ;;  %v1908_v61 = vmul.f32 %v5207_v55, %v1828_v22  ;;  %v7780_v2 = vld [vmem:[#allocation44_spill] sm:$0xff] }
 0x1a7   : > { %v1775_v36 = vadd.f32 %v1743_v59, %v1675_v49  ;;  %v2401_v19 = vadd.f32 %v2369_v12, %v2319_v51  ;;  %v6171_v42 = vmul.f32 %v5210_v58, %v1596_v31  ;;  %v2017_v30 = vadd.f32 %v1985_v3, %v7779_v5 }
 0x1a8   : > { %v2018_v41 = vadd.f32 %v6028_v27, %v7780_v2  ;;  %v2402_v14 = vadd.f32 %v2370_v63, %v2320_v7  ;;  %v1774_v16 = vadd.f32 %v1742_v23, %v1674_v37  ;;  %v2053_v53 = vmul.f32 %v5200_v54, %v5898_v0  ;;  %v6194_v0 = vld [vmem:[#allocation2 + $0xb8] sm:$0xff]  ;;  %v6201_v37 = vld [vmem:[#allocation2 + $0xc0] sm:$0xff] }
 0x1a9   : > { %v6176_v29 = vadd.f32 %v1908_v61, %v1775_v36  ;;  %v2440_v52 = vadd.f32 %v5848_v38, %v2401_v19  ;;  %v2054_v12 = vmul.f32 %v5200_v54, %v5983_v10  ;;  %v6184_v59 = vmul.f32 %v5213_v60, %v1829_v45 }
 0x1aa   : > { %v6187_v40 = vmul.f32 %v5213_v60, %v1828_v22  ;;  %v2441_v27 = vadd.f32 %v5848_v38, %v2402_v14  ;;  %v6190_v63 = vadd.f32 %v1907_v62, %v1774_v16  ;;  %v2085_v23 = vadd.f32 %v2053_v53, %v2017_v30 }
 0x1ab   : > { %v2221_v49 = vmul.f32 %v7762_v18, %v6157_v1  ;;  %v2086_v51 = vadd.f32 %v2054_v12, %v2018_v41  ;;  %v2222_v3 = vmul.f32 %v7762_v18, %v1596_v31  ;;  %v2289_v10 = vmul.f32 %v7763_v50, %v6073_v26 }
 0x1ac   : > { %v2290_v7 = vmul.f32 %v7763_v50, %v6126_v21  ;;  %v2467_v36 = vpack.c.bf16 %v2441_v27, %v2440_v52  ;;  %v2167_v16 = vadd.f32 %v6046_v20, %v2085_v23  ;;  %v2371_v62 = vmul.f32 %v7764_v48, %v1829_v45 }
 0x1ad   : > { %v2372_v61 = vmul.f32 %v7764_v48, %v1828_v22  ;;  %v2168_v19 = vadd.f32 %v6049_v24, %v2086_v51  ;;  %v1575_v5 = vrot.slane %v6139_v47, 7  ;;  %v1576_v31 = vrot.slane %v6194_v0, 7 }
 0x1ae   : > { %v1744_v30 = vmul.f32 %v5168_v11, %v6139_v47  ;;  %4399 = vmatmul.mubr.msk.bf16.gmra.mrb[12].mxu1 %vm768_vm1, %v2467_v36  ;;  %v2253_v2 = vadd.f32 %v2221_v49, %v2167_v16  ;;  %v1745_v41 = vmul.f32 %v5168_v11, %v6194_v0  ;;  %v1809_v20 = vrot.slane %v6194_v0, 1 }
 0x1af   : > { %v1810_v45 = vrot.slane %v6201_v37, 1  ;;  %v2254_v22 = vadd.f32 %v2222_v3, %v2168_v19  ;;  %v1594_v24 = vsel %vm1585_vm4, %v1575_v5, %v1576_v31  ;;  %v1595_v14 = vsel %vm1585_vm4, %v1574_v39, %v1575_v5 }
 0x1b0   : > { %v1934_v53 = vadd.f32 %v5942_v57, %v5902_v17  ;;  %v2321_v52 = vadd.f32 %v2289_v10, %v2253_v2  ;;  %v1676_v12 = vmul.f32 %v5165_v8, %v1595_v14  ;;  %v1677_v27 = vmul.f32 %v5165_v8, %v1594_v24 }
 0x1b1   : > { %v1826_v23 = vsel %vm1818_vm5, %v1809_v20, %v1810_v45  ;;  %v2322_v49 = vadd.f32 %v2290_v7, %v2254_v22  ;;  %v1827_v51 = vsel %vm1818_vm5, %v1808_v13, %v1809_v20  ;;  %v6232_v39 = vmul.f32 %v5210_v58, %v1595_v14 }
 0x1b2   : > { %v6229_v3 = vmul.f32 %v5175_v15, %v1826_v23  ;;  %v2403_v36 = vadd.f32 %v2371_v62, %v2321_v52  ;;  %v1776_v17 = vadd.f32 %v1744_v30, %v1676_v12  ;;  %v6234_v57 = vadd.f32 %v1745_v41, %v1677_v27  ;;  %v6269_v27 = vld [vmem:[#allocation2 + $0xd0] sm:$0xff] }
 0x1b3   : > { %v1909_v10 = vmul.f32 %v5207_v55, %v1827_v51  ;;  %v2404_v16 = vadd.f32 %v2372_v61, %v2322_v49  ;;  %v6242_v7 = vmul.f32 %v5210_v58, %v1594_v24  ;;  %v2019_v13 = vadd.f32 %v6107_v46, %v5946_v25  ;;  %v6260_v25 = vld [vmem:[#allocation2 + $0xc8] sm:$0xff] }
 0x1b4   : > { %v6239_v19 = vmul.f32 %v5207_v55, %v6229_v3  ;;  %v2442_v5 = vadd.f32 %v5848_v38, %v2403_v36  ;;  %v2020_v62 = vadd.f32 %v6110_v35, %v1934_v53  ;;  %v2055_v30 = vmul.f32 %v5200_v54, %v5992_v6 }
 0x1b5   : > { %v6247_v2 = vadd.f32 %v1909_v10, %v1776_v17  ;;  %v2443_v61 = vadd.f32 %v5848_v38, %v2404_v16  ;;  %v2056_v41 = vmul.f32 %v5200_v54, %v6055_v33  ;;  %v2138_v20 = vmul.f32 %v5213_v60, %v6104_v44 }
 0x1b6   : > { %v6258_v22 = vmul.f32 %v5213_v60, %v1827_v51  ;;  %v2087_v46 = vadd.f32 %v2055_v30, %v2019_v13  ;;  %v2223_v52 = vmul.f32 %v7762_v18, %v1595_v14  ;;  %v2224_v35 = vmul.f32 %v7762_v18, %v1594_v24 }
 0x1b7   : > { %v2291_v6 = vmul.f32 %v7763_v50, %v6139_v47  ;;  %v2468_v53 = vpack.c.bf16 %v2443_v61, %v2442_v5  ;;  %v2088_v12 = vadd.f32 %v2056_v41, %v2020_v62  ;;  %v2292_v33 = vmul.f32 %v7763_v50, %v6194_v0 }
 0x1b8   : > { %v2373_v44 = vmul.f32 %v7764_v48, %v1827_v51  ;;  %v2169_v23 = vadd.f32 %v6129_v9, %v2087_v46  ;;  %v2374_v49 = vmul.f32 %v7764_v48, %v6229_v3  ;;  %v1577_v14 = vrot.slane %v6201_v37, 7 }
 0x1b9   : > { %v1578_v24 = vrot.slane %v6260_v25, 7  ;;  %4402 = vmatprep.mubr.msk.bf16.mxu1 %vm768_vm1, %v2468_v53  ;;  %v2170_v36 = vadd.f32 %v2138_v20, %v2088_v12  ;;  %v1746_v17 = vmul.f32 %v5168_v11, %v6201_v37  ;;  %v1747_v51 = vmul.f32 %v5168_v11, %v6260_v25 }
 0x1ba   : > { %v1811_v10 = vrot.slane %v6260_v25, 1  ;;  %v2255_v16 = vadd.f32 %v2223_v52, %v2169_v23  ;;  %v1593_v48 = vsel %vm1585_vm4, %v1576_v31, %v1577_v14  ;;  %v1812_v13 = vrot.slane %v6269_v27, 1 }
 0x1bb   : > { %v1592_v9 = vsel %vm1585_vm4, %v1577_v14, %v1578_v24  ;;  %v2256_v5 = vadd.f32 %v2224_v35, %v2170_v36  ;;  %v6288_v62 = vmul.f32 %v7767_v32, %v1593_v48  ;;  %v1989_v31 = vmul.f32 %v5210_v58, %v6157_v1 }
 0x1bc   : > { %v1679_v30 = vmul.f32 %v5165_v8, %v1592_v9  ;;  %v1825_v61 = vsel %vm1818_vm5, %v1810_v45, %v1811_v10  ;;  %v2323_v41 = vadd.f32 %v2291_v6, %v2255_v16  ;;  %v1824_v20 = vsel %vm1818_vm5, %v1811_v10, %v1812_v13 }
 0x1bd   : > { %v1911_v46 = vmul.f32 %v5207_v55, %v1825_v61  ;;  %v2324_v52 = vadd.f32 %v2292_v33, %v2256_v5  ;;  %v1678_v35 = vmul.f32 %v5165_v8, %v6288_v62  ;;  %v1912_v12 = vmul.f32 %v5207_v55, %v1824_v20 }
 0x1be   : > { %v1779_v53 = vadd.f32 %v1747_v51, %v1679_v30  ;;  %v2405_v23 = vadd.f32 %v2373_v44, %v2323_v41  ;;  %v6302_v14 = vmul.f32 %v5210_v58, %v1592_v9  ;;  %v2021_v45 = vadd.f32 %v1989_v31, %v6051_v28  ;;  %v6332_v41 = vld [vmem:[#allocation2 + $0xe0] sm:$0xff] }
 0x1bf   : > { %v2022_v6 = vadd.f32 %v6171_v42, %v6043_v4  ;;  %v2406_v36 = vadd.f32 %v2374_v49, %v2324_v52  ;;  %v1778_v10 = vadd.f32 %v1746_v17, %v1678_v35  ;;  %v2057_v1 = vmul.f32 %v5200_v54, %v6073_v26  ;;  %v6325_v26 = vld [vmem:[#allocation2 + $0xd8] sm:$0xff]  ;;  %v6338_v52 = vld [vmem:[%s7555_s5 + $0x8] ss:$0 sm:$0xff] }
 0x1c0   : > { %v6307_v16 = vadd.f32 %v1912_v12, %v1779_v53  ;;  %v2444_v33 = vadd.f32 %v5848_v38, %v2405_v23  ;;  %v2058_v44 = vmul.f32 %v5200_v54, %v6126_v21  ;;  %v6315_v51 = vmul.f32 %v5213_v60, %v1825_v61 }
 0x1c1   : > { %v6318_v28 = vmul.f32 %v5213_v60, %v1824_v20  ;;  %v2445_v4 = vadd.f32 %v5848_v38, %v2406_v36  ;;  %v6321_v42 = vadd.f32 %v1911_v46, %v1778_v10  ;;  %v2089_v49 = vadd.f32 %v2057_v1, %v2021_v45 }
 0x1c2   : > { %v2225_v17 = vmul.f32 %v7762_v18, %v6288_v62  ;;  %v2090_v48 = vadd.f32 %v2058_v44, %v2022_v6  ;;  %v2226_v5 = vmul.f32 %v7762_v18, %v1592_v9  ;;  %v2293_v21 = vmul.f32 %v7763_v50, %v6201_v37 }
 0x1c3   : > { %v2294_v30 = vmul.f32 %v7763_v50, %v6260_v25  ;;  %v2469_v31 = vpack.c.bf16 %v2445_v4, %v2444_v33  ;;  %v2171_v46 = vadd.f32 %v6184_v59, %v2089_v49  ;;  %v2375_v35 = vmul.f32 %v6338_v52, %v1825_v61 }
 0x1c4   : > { %v2376_v9 = vmul.f32 %v6338_v52, %v1824_v20  ;;  %v2172_v53 = vadd.f32 %v6187_v40, %v2090_v48  ;;  %v1579_v12 = vrot.slane %v6269_v27, 7  ;;  %v1580_v23 = vrot.slane %v6325_v26, 7 }
 0x1c5   : > { %v1748_v45 = vmul.f32 %v5168_v11, %v6269_v27  ;;  %4403 = vmatmul.mubr.msk.bf16.gmra.mrb[16].mxu1 %vm768_vm1, %v2469_v31  ;;  %v2257_v59 = vadd.f32 %v2225_v17, %v2171_v46  ;;  %v1749_v6 = vmul.f32 %v5168_v11, %v6325_v26  ;;  %v1813_v36 = vrot.slane %v6325_v26, 1 }
 0x1c6   : > { %v1814_v61 = vrot.slane %v6332_v41, 1  ;;  %v2258_v20 = vadd.f32 %v2226_v5, %v2172_v53  ;;  %v1590_v40 = vsel %vm1585_vm4, %v1579_v12, %v1580_v23  ;;  %v1591_v10 = vsel %vm1585_vm4, %v1578_v24, %v1579_v12 }
 0x1c7   : > { %v1938_v1 = vadd.f32 %v6120_v56, %v6091_v43  ;;  %v2325_v33 = vadd.f32 %v2293_v21, %v2257_v59  ;;  %v1680_v44 = vmul.f32 %v5165_v8, %v1591_v10  ;;  %v1681_v4 = vmul.f32 %v5165_v8, %v1590_v40 }
 0x1c8   : > { %v1822_v49 = vsel %vm1818_vm5, %v1813_v36, %v1814_v61  ;;  %v2326_v17 = vadd.f32 %v2294_v30, %v2258_v20  ;;  %v1823_v48 = vsel %vm1818_vm5, %v1812_v13, %v1813_v36  ;;  %v6368_v24 = vmul.f32 %v5210_v58, %v1591_v10  ;;  %v7781_v13 = vld [vmem:[#allocation12_spill] sm:$0xff] }
 0x1c9   : > { %v6365_v5 = vmul.f32 %v5175_v15, %v1822_v49  ;;  %v2407_v31 = vadd.f32 %v2375_v35, %v2325_v33  ;;  %v1780_v43 = vadd.f32 %v1748_v45, %v1680_v44  ;;  %v6370_v56 = vadd.f32 %v1749_v6, %v1681_v4 }
 0x1ca   : > { %v1913_v21 = vmul.f32 %v5207_v55, %v1823_v48  ;;  %v2408_v46 = vadd.f32 %v2376_v9, %v2326_v17  ;;  %v6378_v30 = vmul.f32 %v5210_v58, %v1590_v40  ;;  %v2023_v12 = vadd.f32 %v6232_v39, %v7781_v13  ;;  %v6396_v39 = vld [vmem:[#allocation2 + $0xe8] sm:$0xff]  ;;  %v6405_v17 = vld [vmem:[#allocation2 + $0xf0] sm:$0xff] }
 0x1cb   : > { %v6375_v53 = vmul.f32 %v5207_v55, %v6365_v5  ;;  %v2446_v59 = vadd.f32 %v5848_v38, %v2407_v31  ;;  %v2024_v35 = vadd.f32 %v6242_v7, %v1938_v1  ;;  %v2059_v45 = vmul.f32 %v5200_v54, %v6139_v47 }
 0x1cc   : > { %v6383_v36 = vadd.f32 %v1913_v21, %v1780_v43  ;;  %v2447_v9 = vadd.f32 %v5848_v38, %v2408_v46  ;;  %v2060_v6 = vmul.f32 %v5200_v54, %v6194_v0  ;;  %v2142_v20 = vmul.f32 %v5213_v60, %v6229_v3 }
 0x1cd   : > { %v6394_v33 = vmul.f32 %v5213_v60, %v1823_v48  ;;  %v2091_v44 = vadd.f32 %v2059_v45, %v2023_v12  ;;  %v2227_v4 = vmul.f32 %v7762_v18, %v1591_v10  ;;  %v2228_v7 = vmul.f32 %v7762_v18, %v1590_v40 }
 0x1ce   : > { %7782 = vst [vmem:[#allocation17_spill] sm:$0xff] %v6383_v36  ;;  %v2295_v47 = vmul.f32 %v7763_v50, %v6269_v27  ;;  %v2470_v1 = vpack.c.bf16 %v2447_v9, %v2446_v59  ;;  %v2092_v49 = vadd.f32 %v2060_v6, %v2024_v35  ;;  %v2296_v0 = vmul.f32 %v7763_v50, %v6325_v26 }
 0x1cf   : > { %v2377_v3 = vmul.f32 %v6338_v52, %v1823_v48  ;;  %v2173_v31 = vadd.f32 %v6258_v22, %v2091_v44  ;;  %v2378_v43 = vmul.f32 %v6338_v52, %v6365_v5  ;;  %v1581_v10 = vrot.slane %v6332_v41, 7 }
 0x1d0   : > { %v1582_v40 = vrot.slane %v6396_v39, 7  ;;  %4406 = vmatprep.mubr.msk.bf16.mxu1 %vm768_vm1, %v2470_v1  ;;  %v2174_v21 = vadd.f32 %v2142_v20, %v2092_v49  ;;  %v1750_v46 = vmul.f32 %v5168_v11, %v6332_v41  ;;  %v1751_v48 = vmul.f32 %v5168_v11, %v6396_v39 }
 0x1d1   : > { %v1815_v13 = vrot.slane %v6396_v39, 1  ;;  %v2259_v12 = vadd.f32 %v2227_v4, %v2173_v31  ;;  %v1589_v59 = vsel %vm1585_vm4, %v1580_v23, %v1581_v10  ;;  %v1816_v35 = vrot.slane %v6405_v17, 1 }
 0x1d2   : > { %v1588_v22 = vsel %vm1585_vm4, %v1581_v10, %v1582_v40  ;;  %v2260_v45 = vadd.f32 %v2228_v7, %v2174_v21  ;;  %v6424_v9 = vmul.f32 %v7767_v32, %v1589_v59  ;;  %v1993_v23 = vmul.f32 %v5210_v58, %v6288_v62 }
 0x1d3   : > { %v1683_v6 = vmul.f32 %v5165_v8, %v1588_v22  ;;  %v1821_v20 = vsel %vm1818_vm5, %v1814_v61, %v1815_v13  ;;  %v2327_v44 = vadd.f32 %v2295_v47, %v2259_v12  ;;  %v1820_v4 = vsel %vm1818_vm5, %v1815_v13, %v1816_v35 }
 0x1d4   : > { %v1915_v1 = vmul.f32 %v5207_v55, %v1821_v20  ;;  %v2328_v49 = vadd.f32 %v2296_v0, %v2260_v45  ;;  %v1682_v7 = vmul.f32 %v5165_v8, %v6424_v9  ;;  %v1916_v10 = vmul.f32 %v5207_v55, %v1820_v4 }
 0x1d5   : > { %v1783_v31 = vadd.f32 %v1751_v48, %v1683_v6  ;;  %v2409_v21 = vadd.f32 %v2377_v3, %v2327_v44  ;;  %v6438_v59 = vmul.f32 %v5210_v58, %v1588_v22  ;;  %v2025_v61 = vadd.f32 %v1993_v23, %v6190_v63 }
 0x1d6   : > { %v2026_v47 = vadd.f32 %v6302_v14, %v6176_v29  ;;  %v2410_v13 = vadd.f32 %v2378_v43, %v2328_v49  ;;  %v1782_v12 = vadd.f32 %v1750_v46, %v1682_v7  ;;  %v2061_v62 = vmul.f32 %v5200_v54, %v6201_v37 }
 0x1d7   : > { %v6443_v36 = vadd.f32 %v1916_v10, %v1783_v31  ;;  %v2448_v0 = vadd.f32 %v5848_v38, %v2409_v21  ;;  %v2062_v3 = vmul.f32 %v5200_v54, %v6260_v25  ;;  %v6451_v48 = vmul.f32 %v5213_v60, %v1821_v20  ;;  %v6473_v10 = vld [vmem:[#allocation2 + $0xf8] sm:$0xff] }
 0x1d8   : > { %v6454_v63 = vmul.f32 %v5213_v60, %v1820_v4  ;;  %v2449_v29 = vadd.f32 %v5848_v38, %v2410_v13  ;;  %v6457_v14 = vadd.f32 %v1915_v1, %v1782_v12  ;;  %v2093_v43 = vadd.f32 %v2061_v62, %v2025_v61 }
 0x1d9   : > { %v2229_v46 = vmul.f32 %v7762_v18, %v6424_v9  ;;  %v2094_v37 = vadd.f32 %v2062_v3, %v2026_v47  ;;  %v2230_v45 = vmul.f32 %v7762_v18, %v1588_v22  ;;  %v2297_v25 = vmul.f32 %v7763_v50, %v6332_v41  ;;  %v7783_v47 = vld [vmem:[#allocation39_spill] sm:$0xff] }
 0x1da   : > { %v2298_v6 = vmul.f32 %v7763_v50, %v6396_v39  ;;  %v2471_v44 = vpack.c.bf16 %v2449_v29, %v2448_v0  ;;  %v2175_v23 = vadd.f32 %v6315_v51, %v2093_v43  ;;  %v2379_v49 = vmul.f32 %v6338_v52, %v1821_v20 }
 0x1db   : > { %v2380_v1 = vmul.f32 %v6338_v52, %v1820_v4  ;;  %v2176_v7 = vadd.f32 %v6318_v28, %v2094_v37  ;;  %v1583_v31 = vrot.slane %v6405_v17, 7  ;;  %v1752_v22 = vmul.f32 %v5168_v11, %v6405_v17 }
 0x1dc   : > { %v1753_v21 = vmul.f32 %v6473_v10, %v5168_v11  ;;  %4407 = vmatmul.mubr.msk.bf16.gmra.mrb[20].mxu1 %vm768_vm1, %v2471_v44  ;;  %v2261_v61 = vadd.f32 %v2229_v46, %v2175_v23  ;;  %v1817_v51 = vrot.slane %v6473_v10, 1  ;;  %v1942_v20 = vadd.f32 %v6239_v19, %v6234_v57 }
 0x1dd   : > { %v2027_v28 = vadd.f32 %v6368_v24, %v6247_v2  ;;  %v2262_v4 = vadd.f32 %v2230_v45, %v2176_v7  ;;  %v1586_v13 = vsel %vm1585_vm4, %v1583_v31, %v7783_v47  ;;  %v1587_v12 = vsel %vm1585_vm4, %v1582_v40, %v1583_v31  ;;  %v7784_v2 = vld [vmem:[#allocation46_spill] sm:$0xff]  ;;  %v6499_v40 = vld [vmem:[#allocation2 + $0x100] sm:$0xff] }
 0x1de   : > { %v2063_v11 = vmul.f32 %v5200_v54, %v6269_v27  ;;  %v2329_v62 = vadd.f32 %v2297_v25, %v2261_v61  ;;  %v1684_v0 = vmul.f32 %v5165_v8, %v1587_v12  ;;  %v1685_v3 = vmul.f32 %v5165_v8, %v1586_v13 }
 0x1df   : > { %v1819_v57 = vsel %vm1818_vm5, %v1816_v35, %v1817_v51  ;;  %v2330_v19 = vadd.f32 %v2298_v6, %v2262_v4  ;;  %v7785_v24 = vrot.slane %v7784_v2, 1  ;;  %v6502_v27 = vmul.f32 %v5210_v58, %v1587_v12  ;;  %v6530_v4 = vld [vmem:[#allocation2 + $0x108] sm:$0xff] }
 0x1e0   : > { %v1917_v43 = vmul.f32 %v5207_v55, %v1819_v57  ;;  %v2411_v46 = vadd.f32 %v2379_v49, %v2329_v62  ;;  %v1784_v37 = vadd.f32 %v1752_v22, %v1684_v0  ;;  %v6504_v45 = vadd.f32 %v1753_v21, %v1685_v3 }
 0x1e1   : > { %v1850_v29 = vsel %vm1818_vm5, %v1817_v51, %v7785_v24  ;;  %v2412_v35 = vadd.f32 %v2380_v1, %v2330_v19  ;;  %v6510_v25 = vmul.f32 %v5210_v58, %v1586_v13  ;;  %v2028_v6 = vadd.f32 %v6378_v30, %v1942_v20 }
 0x1e2   : > { %v6507_v8 = vmul.f32 %v5175_v15, %v1850_v29  ;;  %v2064_v44 = vmul.f32 %v5200_v54, %v6325_v26  ;;  %v2450_v23 = vadd.f32 %v5848_v38, %v2411_v46  ;;  %v6516_v7 = vadd.f32 %v1917_v43, %v1784_v37  ;;  %v6552_v43 = vld [vmem:[#allocation2 + $0x110] sm:$0xff] }
 0x1e3   : > { %v2095_v49 = vadd.f32 %v2063_v11, %v2027_v28  ;;  %v2105_v31 = vrot.slane %v6499_v40, 1  ;;  %v2451_v22 = vadd.f32 %v5848_v38, %v2412_v35  ;;  %v2146_v1 = vmul.f32 %v5213_v60, %v6365_v5  ;;  %v6535_v38 = vld [vmem:[%s7559_s9] sm:$0xf] }
 0x1e4   : > { %v2096_v21 = vadd.f32 %v2064_v44, %v2028_v6  ;;  %v6523_v61 = vmul.f32 %v5213_v60, %v1819_v57  ;;  %v2231_v20 = vmul.f32 %v7762_v18, %v1587_v12  ;;  %v2232_v28 = vmul.f32 %v7762_v18, %v1586_v13  ;;  %4494 = vmatprep.subr.msk.bf16.mxu0 %vm817_vm0, %v6535_v38 }
 0x1e5   : > { %v2112_v30 = vsel %vm1818_vm5, %v1817_v51, %v2105_v31  ;;  %v2177_v26 = vadd.f32 %v6394_v33, %v2095_v49  ;;  %v2472_v5 = vpack.c.bf16 %v2451_v22, %v2450_v23  ;;  %v2299_v51 = vmul.f32 %v7763_v50, %v6405_v17 }
 0x1e6   : > { %v2114_v11 = vmul.f32 %v5175_v15, %v2112_v30  ;;  %v2178_v62 = vadd.f32 %v2146_v1, %v2096_v21  ;;  %v2300_v13 = vmul.f32 %v6473_v10, %v7763_v50  ;;  %v2381_v12 = vmul.f32 %v6338_v52, %v1819_v57 }
 0x1e7   : > { %v2263_v33 = vadd.f32 %v2231_v20, %v2177_v26  ;;  %v1955_v0 = vrot.slane %v6499_v40, 7  ;;  %4410 = vmatprep.mubr.msk.bf16.mxu1 %vm768_vm1, %v2472_v5  ;;  %v1956_v24 = vrot.slane %v6530_v4, 7  ;;  %v1997_v57 = vmul.f32 %v5210_v58, %v6424_v9 }
 0x1e8   : > { %v6548_v3 = vmul.f32 %v5213_v60, %v2114_v11  ;;  %v2264_v19 = vadd.f32 %v2232_v28, %v2178_v62  ;;  %v2382_v2 = vmul.f32 %v6338_v52, %v2114_v11  ;;  %v2030_v37 = vadd.f32 %v6438_v59, %v6307_v16 }
 0x1e9   : > { %v2331_v29 = vadd.f32 %v2299_v51, %v2263_v33  ;;  %v1962_v46 = vsel %vm1585_vm4, %v7783_v47, %v1955_v0  ;;  %v1961_v6 = vsel %vm1585_vm4, %v1955_v0, %v1956_v24  ;;  %v2065_v23 = vmul.f32 %v5200_v54, %v6332_v41  ;;  %v6578_v41 = vld [vmem:[%s7556_s6] ss:$0 sm:$0xff] }
 0x1ea   : > { %v2332_v35 = vadd.f32 %v2300_v13, %v2264_v19  ;;  %v1965_v44 = vmul.f32 %v7767_v32, %v1962_v46  ;;  %v6567_v22 = vmul.f32 %v5210_v58, %v1961_v6  ;;  %v2029_v47 = vadd.f32 %v1997_v57, %v6321_v42 }
 0x1eb   : > { %v2413_v49 = vadd.f32 %v2381_v12, %v2331_v29  ;;  %v2066_v9 = vmul.f32 %v5200_v54, %v6396_v39  ;;  %v2106_v59 = vrot.slane %v6530_v4, 1  ;;  %v2107_v1 = vrot.slane %v6552_v43, 1 }
 0x1ec   : > { %v2414_v21 = vadd.f32 %v2382_v2, %v2332_v35  ;;  %v2001_v16 = vmul.f32 %v5210_v58, %v1965_v44  ;;  %v2097_v26 = vadd.f32 %v2065_v23, %v2029_v47  ;;  %v2233_v42 = vmul.f32 %v7762_v18, %v1965_v44  ;;  %v6613_v47 = vld [vmem:[#allocation2 + $0x118] sm:$0xff] }
 0x1ed   : > { %v2452_v30 = vadd.f32 %v6578_v41, %v2413_v49  ;;  %v2098_v20 = vadd.f32 %v2066_v9, %v2030_v37  ;;  %v2110_v28 = vsel %vm1818_vm5, %v2106_v59, %v2107_v1  ;;  %v2111_v5 = vsel %vm1818_vm5, %v2105_v31, %v2106_v59 }
 0x1ee   : > { %v2453_v39 = vadd.f32 %v6578_v41, %v2414_v21  ;;  %v2234_v11 = vmul.f32 %v7762_v18, %v1961_v6  ;;  %v6589_v62 = vmul.f32 %v5213_v60, %v2111_v5  ;;  %v6592_v51 = vmul.f32 %v5213_v60, %v2110_v28 }
 0x1ef   : > { %v2179_v33 = vadd.f32 %v6451_v48, %v2097_v26  ;;  %v2180_v13 = vadd.f32 %v6454_v63, %v2098_v20  ;;  %v2301_v0 = vmul.f32 %v7763_v50, %v6499_v40  ;;  %v2302_v19 = vmul.f32 %v7763_v50, %v6530_v4  ;;  %v7786_v63 = vld [vmem:[#allocation17_spill] sm:$0xff] }
 0x1f0   : > { %v2473_v12 = vpack.c.bf16 %v2453_v39, %v2452_v30  ;;  %v2383_v31 = vmul.f32 %v6338_v52, %v2111_v5  ;;  %v2384_v46 = vmul.f32 %v6338_v52, %v2110_v28  ;;  %v1946_v57 = vadd.f32 %v6375_v53, %v6370_v56  ;;  %v7787_v53 = vld [vmem:[#allocation41_spill] sm:$0xff] }
 0x1f1   : > { %v2265_v2 = vadd.f32 %v2233_v42, %v2179_v33  ;;  %v2266_v29 = vadd.f32 %v2234_v11, %v2180_v13  ;;  %v1957_v48 = vrot.slane %v6552_v43, 7  ;;  %v2031_v37 = vadd.f32 %v6502_v27, %v7786_v63  ;;  %v2187_v26 = vld [vmem:[#allocation2 + $0x120] sm:$0xff] }
 0x1f2   : > { %4411 = vmatmul.mubr.msk.bf16.gmra.mrb[24].mxu1 %vm768_vm1, %v2473_v12  ;;  %v2067_v35 = vmul.f32 %v5200_v54, %v6405_v17  ;;  %v2068_v6 = vmul.f32 %v6473_v10, %v5200_v54  ;;  %v2032_v49 = vadd.f32 %v6510_v25, %v1946_v57  ;;  %v6616_v56 = vrot.slane %v6613_v47, 1 }
 0x1f3   : > { %v2333_v44 = vadd.f32 %v2301_v0, %v2265_v2  ;;  %v2334_v23 = vadd.f32 %v2302_v19, %v2266_v29  ;;  %v1959_v9 = vsel %vm1585_vm4, %v1957_v48, %v7787_v53  ;;  %v1960_v27 = vsel %vm1585_vm4, %v1956_v24, %v1957_v48  ;;  %v6641_v0 = vld [vmem:[#allocation2 + $0x128] sm:$0xff] }
 0x1f4   : > { %v2099_v17 = vadd.f32 %v2067_v35, %v2031_v37  ;;  %v2303_v10 = vmul.f32 %v7763_v50, %v6552_v43  ;;  %v2003_v25 = vmul.f32 %v5210_v58, %v1960_v27  ;;  %v2004_v30 = vmul.f32 %v5210_v58, %v1959_v9 }
 0x1f5   : > { %v2415_v21 = vadd.f32 %v2383_v31, %v2333_v44  ;;  %v2416_v59 = vadd.f32 %v2384_v46, %v2334_v23  ;;  %v2100_v20 = vadd.f32 %v2068_v6, %v2032_v49  ;;  %v2109_v42 = vsel %vm1818_vm5, %v2107_v1, %v6616_v56  ;;  %v2189_v23 = vld [vmem:[#allocation2 + $0x130] sm:$0xff] }
 0x1f6   : > { %v2181_v39 = vadd.f32 %v6523_v61, %v2099_v17  ;;  %v2235_v24 = vmul.f32 %v7762_v18, %v1960_v27  ;;  %v6635_v11 = vmul.f32 %v5213_v60, %v2109_v42  ;;  %v2236_v33 = vmul.f32 %v7762_v18, %v1959_v9 }
 0x1f7   : > { %v2454_v28 = vadd.f32 %v6578_v41, %v2415_v21  ;;  %v2455_v5 = vadd.f32 %v6578_v41, %v2416_v59  ;;  %v2182_v58 = vadd.f32 %v6548_v3, %v2100_v20  ;;  %v2304_v12 = vmul.f32 %v6613_v47, %v7763_v50 }
 0x1f8   : > { %v2267_v13 = vadd.f32 %v2235_v24, %v2181_v39  ;;  %v2341_v1 = vrot.slane %v2187_v26, 1  ;;  %v2385_v19 = vmul.f32 %v6338_v52, %v2109_v42  ;;  %v2033_v31 = vadd.f32 %v2001_v16, %v6457_v14 }
 0x1f9   : > { %v2474_v61 = vpack.c.bf16 %v2455_v5, %v2454_v28  ;;  %v2034_v2 = vadd.f32 %v6567_v22, %v6443_v36  ;;  %v2268_v29 = vadd.f32 %v2236_v33, %v2182_v58  ;;  %v2069_v57 = vmul.f32 %v5200_v54, %v6499_v40 }
 0x1fa   : > { %v2335_v46 = vadd.f32 %v2303_v10, %v2267_v13  ;;  %v2348_v3 = vsel %vm1818_vm5, %v6616_v56, %v2341_v1  ;;  %v2070_v63 = vmul.f32 %v5200_v54, %v6530_v4  ;;  %v2191_v14 = vrot.slane %v2187_v26, 7 }
 0x1fb   : > { %4414 = vmatprep.mubr.msk.bf16.mxu1 %vm768_vm1, %v2474_v61  ;;  %v2350_v48 = vmul.f32 %v5175_v15, %v2348_v3  ;;  %v2192_v16 = vrot.slane %v6641_v0, 7  ;;  %v2336_v36 = vadd.f32 %v2304_v12, %v2268_v29  ;;  %v2101_v37 = vadd.f32 %v2069_v57, %v2033_v31 }
 0x1fc   : > { %v2417_v22 = vadd.f32 %v2385_v19, %v2335_v46  ;;  %v2305_v35 = vmul.f32 %v7763_v50, %v2187_v26  ;;  %v2102_v44 = vadd.f32 %v2070_v63, %v2034_v2  ;;  %v2198_v49 = vsel %vm1585_vm4, %v7787_v53, %v2191_v14  ;;  %v4866_v63 = vld [vmem:[#allocation2 + $0x138] sm:$0xff] }
 0x1fd   : > { %v2386_v6 = vmul.f32 %v6338_v52, %v2350_v48  ;;  %v2197_v40 = vsel %vm1585_vm4, %v2191_v14, %v2192_v16  ;;  %v2183_v9 = vadd.f32 %v6589_v62, %v2101_v37  ;;  %v2201_v27 = vmul.f32 %v7767_v32, %v2198_v49 }
 0x1fe   : > { %v2456_v4 = vadd.f32 %v6578_v41, %v2417_v22  ;;  %v2238_v17 = vmul.f32 %v7762_v18, %v2197_v40  ;;  %v2184_v21 = vadd.f32 %v6592_v51, %v2102_v44  ;;  %v2306_v59 = vmul.f32 %v7763_v50, %v6641_v0 }
 0x1ff   : > { %v2418_v10 = vadd.f32 %v2386_v6, %v2336_v36  ;;  %v2342_v26 = vrot.slane %v6641_v0, 1  ;;  %v2237_v20 = vmul.f32 %v7762_v18, %v2201_v27  ;;  %v2343_v42 = vrot.slane %v2189_v23, 1  ;;  %v7788_v0 = vld [vmem:[#allocation9_spill] sm:$0xff] }
 0x200   : > { %v1918_v53 = vmul.f32 %v5207_v55, %v6507_v8  ;;  %v2035_v62 = vadd.f32 %v2003_v25, %v6516_v7  ;;  %v2270_v39 = vadd.f32 %v2238_v17, %v2184_v21  ;;  %v2071_v51 = vmul.f32 %v5200_v54, %v6552_v43 }
 0x201   : > { %v2457_v32 = vadd.f32 %v6578_v41, %v2418_v10  ;;  %v2347_v24 = vsel %vm1818_vm5, %v2341_v1, %v2342_v26  ;;  %v2269_v28 = vadd.f32 %v2237_v20, %v2183_v9  ;;  %v2346_v5 = vsel %vm1818_vm5, %v2342_v26, %v2343_v42  ;;  %v6728_v26 = vld [vmem:[%s5047_s14 + $0x8] sm:$0xff]   ;;  %v6732_v20 = vld [vmem:[%s5047_s14] sm:$0xff]  }
 0x202   : > { %v2387_v33 = vmul.f32 %v6338_v52, %v2347_v24  ;;  %v1950_v58 = vadd.f32 %v1918_v53, %v6504_v45  ;;  %v2338_v8 = vadd.f32 %v2306_v59, %v2270_v39  ;;  %v2388_v7 = vmul.f32 %v6338_v52, %v2346_v5 }
 0x203   : > { %v2475_v55 = vpack.c.bf16 %v2457_v32, %v2456_v4  ;;  %v2072_v25 = vmul.f32 %v6613_v47, %v5200_v54  ;;  %v2337_v13 = vadd.f32 %v2305_v35, %v2269_v28  ;;  %v2103_v1 = vadd.f32 %v2071_v51, %v2035_v62 }
 0x204   : > { %v2036_v12 = vadd.f32 %v2004_v30, %v1950_v58  ;;  %v2113_v43 = vsel %vm1818_vm5, %v6616_v56, %v7788_v0  ;;  %v2420_v61 = vadd.f32 %v2388_v7, %v2338_v8  ;;  %v2193_v19 = vrot.slane %v2189_v23, 7  ;;  %v7789_v30 = vld [vmem:[#allocation15_spill] sm:$0xff] }
 0x205   : > { %4415 = vmatmul.mubr.msk.bf16.gmra.mrb[28].mxu1 %vm768_vm1, %v2475_v55  ;;  %v2118_v45 = vmul.f32 %v5175_v15, %v2113_v43  ;;  %v2419_v31 = vadd.f32 %v2387_v33, %v2337_v13  ;;  %v2185_v29 = vadd.f32 %v6635_v11, %v2103_v1  ;;  %v7790_v46 = vrot.slane %v7789_v30, 7  ;;  %v6768_v0 = vld [vmem:[%s5047_s14 + $0x10] sm:$0xff]  }
 0x206   : > { %v2104_v2 = vadd.f32 %v2072_v25, %v2036_v12  ;;  %v2459_v54 = vadd.f32 %v6578_v41, %v2420_v61  ;;  %v2196_v56 = vsel %vm1585_vm4, %v2192_v16, %v2193_v19  ;;  %v2344_v14 = vrot.slane %v4866_v63, 1  ;;  %v7791_v16 = vld [vmem:[#allocation11_spill] sm:$0xff]  ;;  %v6763_v12 = vld [vmem:[%s5047_s14 + $0x18] sm:$0xff]  }
 0x207   : > { %v2154_v47 = vmul.f32 %v5213_v60, %v2118_v45  ;;  %v2195_v3 = vsel %vm1585_vm4, %v2193_v19, %v7790_v46  ;;  %v2458_v57 = vadd.f32 %v6578_v41, %v2419_v31  ;;  %v2239_v48 = vmul.f32 %v7762_v18, %v2196_v56 }
 0x208   : > { %v2240_v11 = vmul.f32 %v7762_v18, %v2195_v3  ;;  %v2307_v22 = vmul.f32 %v7763_v50, %v2189_v23  ;;  %v2803_v60 = vsel %vm817_vm0, %v6535_v38, 0  ;;  %v2345_v6 = vsel %vm1818_vm5, %v2343_v42, %v2344_v14 }
 0x209   : > { %v2186_v36 = vadd.f32 %v2154_v47, %v2104_v2  ;;  %v2476_v37 = vpack.c.bf16 %v2459_v54, %v2458_v57  ;;  %v2271_v35 = vadd.f32 %v2239_v48, %v2185_v29  ;;  %v2349_v44 = vsel %vm1818_vm5, %v2344_v14, %v7791_v16  ;;  %4423 = vmatpush3.bf16.msra.mxu0 %v2803_v60 }
 0x20a   : > { %v2308_v49 = vmul.f32 %v4866_v63, %v7763_v50  ;;  %v2354_v18 = vmul.f32 %v5175_v15, %v2349_v44  ;;  %v2389_v23 = vmul.f32 %v6338_v52, %v2345_v6  ;;  %v6725_v15 = vld [vmem:[%s7558_s8] ss:$0 sm:$0xff]  ;;  %v7634_v42 = vunpack.c.l.bf16 %v6732_v20 }
 0x20b   : > { %v2272_v40 = vadd.f32 %v2240_v11, %v2186_v36  ;;  %4418 = vmatprep.mubr.msk.bf16.mxu1 %vm768_vm1, %v2476_v37  ;;  %v2339_v38 = vadd.f32 %v2307_v22, %v2271_v35  ;;  %v7635_v32 = vunpack.c.l.bf16 %v6728_v26  ;;  %v7625_v1 = vunpack.c.h.bf16 %v6763_v12  ;;  %v6800_v36 = vld [vmem:[%s5047_s14 + $0x28] sm:$0xff]   ;;  %v6804_v22 = vld [vmem:[%s5047_s14 + $0x20] sm:$0xff]  }
 0x20c   : > { %v2390_v9 = vmul.f32 %v6338_v52, %v2354_v18  ;;  %v7633_v52 = vunpack.c.h.bf16 %v6728_v26  ;;  %v7626_v43 = vunpack.c.l.bf16 %v6768_v0  ;;  %v7624_v19 = vunpack.c.h.bf16 %v6768_v0  ;;  %7792 = vst [vmem:[#allocation25_spill] sm:$0xff] %v6804_v22 }
 0x20d   : > { %v2340_v4 = vadd.f32 %v2308_v49, %v2272_v40  ;;  %v2421_v27 = vadd.f32 %v2389_v23, %v2339_v38  ;;  %v7631_v31 = vunpack.c.l.bf16 %v6763_v12  ;;  %v7621_v11 = vunpack.c.h.bf16 %v6800_v36 }
 0x20e   : > { %v7622_v60 = vunpack.c.l.bf16 %v6804_v22  ;;  %v7616_v6 = vunpack.c.h.bf16 %v6804_v22  ;;  %v7623_v16 = vunpack.c.l.bf16 %v6800_v36 }
 0x20f   : > { %v2422_v17 = vadd.f32 %v2390_v9, %v2340_v4  ;;  %v2460_v34 = vadd.f32 %v6578_v41, %v2421_v27 }
 0x211   : > { %v2461_v10 = vadd.f32 %v6578_v41, %v2422_v17  ;;  %v7632_v41 = vunpack.c.h.bf16 %v6732_v20 }
 0x213   : > { %v2477_v21 = vpack.c.bf16 %v2461_v10, %v2460_v34 }
 0x215   : > { %4419 = vmatmul.mubr.msk.bf16.gmra.mrb[32].mxu1 %vm768_vm1, %v2477_v21  ;;  %v6836_v21 = vld [vmem:[%s5047_s14 + $0x38] sm:$0xff]  }
 0x216   : > { %7795 = vst [vmem:[#allocation18_spill] sm:$0xff] %v6836_v21 }
 0x25d   : > { %v4392_v50 = vpop.f32.mrb[4].mxu1 }
 0x25e   : > { %v2571_v59 = vpop.f32.mrb[5].mxu1  ;;  %v2580_v39 = vadd.f32 %v4392_v50, %v6725_v15  ;;  %v7613_v50 = vunpack.c.h.bf16 %v6836_v21 }
 0x25f   : > { %v2572_v53 = vadd.f32 %v6725_v15, %v2571_v59  ;;  %v4393_v62 = vpop.f32.mrb[6].mxu1  ;;  %v6840_v59 = vld [vmem:[%s5047_s14 + $0x30] sm:$0xff]  }
 0x260   : > { %v2583_v24 = vadd.f32 %v4393_v62, %v6725_v15  ;;  %v2574_v51 = vpop.f32.mrb[7].mxu1  ;;  %v6755_v55 = vadd.f32 %v2580_v39, %v7635_v32  ;;  %7796 = vst [vmem:[#allocation19_spill] sm:$0xff] %v6840_v59 }
 0x261   : > { %v2575_v28 = vadd.f32 %v6725_v15, %v2574_v51  ;;  %v6747_v33 = vadd.f32 %v2572_v53, %v7634_v42  ;;  %v7614_v53 = vunpack.c.l.bf16 %v6840_v59  ;;  %v7615_v51 = vunpack.c.l.bf16 %v6836_v21 }
 0x262   : > { %v6743_v5 = vadd.f32 %v2583_v24, %v7633_v52  ;;  %v7612_v24 = vunpack.c.h.bf16 %v6840_v59 }
 0x263   : > { %v6751_v58 = vadd.f32 %v2575_v28, %v7632_v41 }
 0x264   : > { %v2731_v7 = vpack.c.bf16 %v6743_v5, %v6755_v55 }
 0x265   : > { %v2730_v8 = vpack.c.bf16 %v6751_v58, %v6747_v33 }
 0x267   : > { %v4396_v25 = vpop.f32.mrb[8].mxu1  ;;  %4424 = vmatprep.mubr.msk.bf16.mxu0 %vm768_vm1, %v2730_v8 }
 0x268   : > { %v2587_v13 = vpop.f32.mrb[9].mxu1  ;;  %4425 = vmatmul.mubr.msk.bf16.vlgmr.msra.gmra.mrb[36].mxu0 %vm768_vm1, %v2731_v7  ;;  %v2596_v2 = vadd.f32 %v4396_v25, %v6725_v15 }
 0x269   : > { %v2588_v61 = vadd.f32 %v6725_v15, %v2587_v13  ;;  %v4397_v45 = vpop.f32.mrb[10].mxu1 }
 0x26a   : > { %v2599_v29 = vadd.f32 %v4397_v45, %v6725_v15  ;;  %v2590_v54 = vpop.f32.mrb[11].mxu1  ;;  %v6791_v56 = vadd.f32 %v2596_v2, %v7631_v31 }
 0x26b   : > { %v2591_v47 = vadd.f32 %v6725_v15, %v2590_v54  ;;  %v6783_v46 = vadd.f32 %v2588_v61, %v7626_v43 }
 0x26c   : > { %v6779_v30 = vadd.f32 %v2599_v29, %v7625_v1 }
 0x26d   : > { %v6787_v3 = vadd.f32 %v2591_v47, %v7624_v19 }
 0x26e   : > { %v2733_v48 = vpack.c.bf16 %v6779_v30, %v6791_v56 }
 0x26f   : > { %v2732_v57 = vpack.c.bf16 %v6787_v3, %v6783_v46 }
 0x271   : > { %4428 = vmatprep.mubr.msk.bf16.mxu0 %vm768_vm1, %v2732_v57 }
 0x272   : > { %4429 = vmatmul.mubr.msk.bf16.gmra.mrb[40].mxu0 %vm768_vm1, %v2733_v48  ;;  %v6872_v48 = vld [vmem:[%s5047_s14 + $0x48] sm:$0xff]  }
 0x273   : > { %7801 = vst [vmem:[#allocation27_spill] sm:$0xff] %v6872_v48 }
 0x281   : > { %v4400_v63 = vpop.f32.mrb[12].mxu1 }
 0x282   : > { %v2603_v14 = vpop.f32.mrb[13].mxu1  ;;  %v2612_v44 = vadd.f32 %v4400_v63, %v6725_v15  ;;  %v7605_v63 = vunpack.c.h.bf16 %v6872_v48 }
 0x283   : > { %v2604_v37 = vadd.f32 %v6725_v15, %v2603_v14  ;;  %v4401_v35 = vpop.f32.mrb[14].mxu1  ;;  %v6876_v14 = vld [vmem:[%s5047_s14 + $0x40] sm:$0xff]  }
 0x284   : > { %v2615_v40 = vadd.f32 %v4401_v35, %v6725_v15  ;;  %v2606_v49 = vpop.f32.mrb[15].mxu1  ;;  %v6827_v9 = vadd.f32 %v2612_v44, %v7623_v16  ;;  %7802 = vst [vmem:[#allocation26_spill] sm:$0xff] %v6876_v14 }
 0x285   : > { %v2607_v18 = vadd.f32 %v6725_v15, %v2606_v49  ;;  %v6819_v23 = vadd.f32 %v2604_v37, %v7622_v60  ;;  %v7606_v37 = vunpack.c.l.bf16 %v6876_v14  ;;  %v7611_v49 = vunpack.c.l.bf16 %v6872_v48 }
 0x286   : > { %v6815_v38 = vadd.f32 %v2615_v40, %v7621_v11  ;;  %v7604_v40 = vunpack.c.h.bf16 %v6876_v14 }
 0x287   : > { %v6823_v4 = vadd.f32 %v2607_v18, %v7616_v6 }
 0x288   : > { %7793 = vst [vmem:[#allocation33_spill] sm:$0xff] %v6815_v38  ;;  %v2735_v17 = vpack.c.bf16 %v6815_v38, %v6827_v9 }
 0x289   : > { %7794 = vst [vmem:[#allocation38_spill] sm:$0xff] %v6823_v4  ;;  %v2734_v27 = vpack.c.bf16 %v6823_v4, %v6819_v23 }
 0x28b   : > { %4432 = vmatprep.mubr.msk.bf16.mxu0 %vm768_vm1, %v2734_v27 }
 0x28c   : > { %4433 = vmatmul.mubr.msk.bf16.gmra.mrb[44].mxu0 %vm768_vm1, %v2735_v17 }
 0x298   : > { %v4404_v34 = vpop.f32.mrb[16].mxu1 }
 0x299   : > { %v2619_v10 = vpop.f32.mrb[17].mxu1  ;;  %v2628_v28 = vadd.f32 %v4404_v34, %v6725_v15 }
 0x29a   : > { %v2620_v62 = vadd.f32 %v6725_v15, %v2619_v10  ;;  %v4405_v39 = vpop.f32.mrb[18].mxu1 }
 0x29b   : > { %v2631_v8 = vadd.f32 %v4405_v39, %v6725_v15  ;;  %v2622_v7 = vpop.f32.mrb[19].mxu1  ;;  %v6863_v2 = vadd.f32 %v2628_v28, %v7615_v51 }
 0x29c   : > { %v2623_v25 = vadd.f32 %v6725_v15, %v2622_v7  ;;  %v6855_v61 = vadd.f32 %v2620_v62, %v7614_v53 }
 0x29d   : > { %v6851_v13 = vadd.f32 %v2631_v8, %v7613_v50  ;;  %7800 = vst [vmem:[#allocation36_spill] sm:$0xff] %v6863_v2 }
 0x29e   : > { %7798 = vst [vmem:[#allocation20_spill] sm:$0xff] %v6855_v61  ;;  %v6859_v45 = vadd.f32 %v2623_v25, %v7612_v24 }
 0x29f   : > { %7797 = vst [vmem:[#allocation35_spill] sm:$0xff] %v6851_v13  ;;  %v2737_v54 = vpack.c.bf16 %v6851_v13, %v6863_v2 }
 0x2a0   : > { %7799 = vst [vmem:[#allocation22_spill] sm:$0xff] %v6859_v45  ;;  %v2736_v29 = vpack.c.bf16 %v6859_v45, %v6855_v61 }
 0x2a2   : > { %4436 = vmatprep.mubr.msk.bf16.mxu0 %vm768_vm1, %v2736_v29 }
 0x2a3   : > { %4437 = vmatmul.mubr.msk.bf16.gmra.mrb[48].mxu0 %vm768_vm1, %v2737_v54  ;;  %v6908_v54 = vld [vmem:[%s5047_s14 + $0x58] sm:$0xff]  }
 0x2a4   : > { %7807 = vst [vmem:[#allocation30_spill] sm:$0xff] %v6908_v54 }
 0x2af   : > { %v4408_v47 = vpop.f32.mrb[20].mxu1 }
 0x2b0   : > { %v2635_v57 = vpop.f32.mrb[21].mxu1  ;;  %v2644_v18 = vadd.f32 %v4408_v47, %v6725_v15  ;;  %v7607_v47 = vunpack.c.h.bf16 %v6908_v54 }
 0x2b1   : > { %v2636_v35 = vadd.f32 %v6725_v15, %v2635_v57  ;;  %v4409_v44 = vpop.f32.mrb[22].mxu1  ;;  %v6912_v57 = vld [vmem:[%s5047_s14 + $0x50] sm:$0xff]  }
 0x2b2   : > { %v2647_v27 = vadd.f32 %v4409_v44, %v6725_v15  ;;  %v2638_v17 = vpop.f32.mrb[23].mxu1  ;;  %v6899_v28 = vadd.f32 %v2644_v18, %v7611_v49  ;;  %7808 = vst [vmem:[#allocation32_spill] sm:$0xff] %v6912_v57 }
 0x2b3   : > { %v2639_v34 = vadd.f32 %v6725_v15, %v2638_v17  ;;  %v6891_v62 = vadd.f32 %v2636_v35, %v7606_v37  ;;  %v7609_v35 = vunpack.c.l.bf16 %v6912_v57  ;;  %v7610_v17 = vunpack.c.l.bf16 %v6908_v54 }
 0x2b4   : > { %v6887_v10 = vadd.f32 %v2647_v27, %v7605_v63  ;;  %7806 = vst [vmem:[#allocation21_spill] sm:$0xff] %v6899_v28  ;;  %v7608_v27 = vunpack.c.h.bf16 %v6912_v57 }
 0x2b5   : > { %7804 = vst [vmem:[#allocation37_spill] sm:$0xff] %v6891_v62  ;;  %v6895_v39 = vadd.f32 %v2639_v34, %v7604_v40 }
 0x2b6   : > { %7803 = vst [vmem:[#allocation23_spill] sm:$0xff] %v6887_v10  ;;  %v2739_v7 = vpack.c.bf16 %v6887_v10, %v6899_v28 }
 0x2b7   : > { %7805 = vst [vmem:[#allocation10_spill] sm:$0xff] %v6895_v39  ;;  %v2738_v8 = vpack.c.bf16 %v6895_v39, %v6891_v62 }
 0x2b9   : > { %4440 = vmatprep.mubr.msk.bf16.mxu0 %vm768_vm1, %v2738_v8 }
 0x2ba   : > { %4441 = vmatmul.mubr.msk.bf16.gmra.mrb[52].mxu0 %vm768_vm1, %v2739_v7 }
 0x2c5   : > { %v4412_v25 = vpop.f32.mrb[24].mxu1 }
 0x2c6   : > { %v2651_v29 = vpop.f32.mrb[25].mxu1  ;;  %v2660_v34 = vadd.f32 %v4412_v25, %v6725_v15 }
 0x2c7   : > { %v2652_v44 = vadd.f32 %v6725_v15, %v2651_v29  ;;  %v4413_v18 = vpop.f32.mrb[26].mxu1 }
 0x2c8   : > { %v2663_v8 = vadd.f32 %v4413_v18, %v6725_v15  ;;  %v2654_v7 = vpop.f32.mrb[27].mxu1  ;;  %v6935_v25 = vadd.f32 %v2660_v34, %v7610_v17 }
 0x2c9   : > { %v2655_v40 = vadd.f32 %v6725_v15, %v2654_v7  ;;  %v6927_v29 = vadd.f32 %v2652_v44, %v7609_v35 }
 0x2ca   : > { %v6923_v63 = vadd.f32 %v2663_v8, %v7607_v47  ;;  %7812 = vst [vmem:[#allocation40_spill] sm:$0xff] %v6935_v25  ;;  %v6944_v47 = vld [vmem:[%s5047_s14 + $0x68] sm:$0xff]  }
 0x2cb   : > { %7810 = vst [vmem:[#allocation7_spill] sm:$0xff] %v6927_v29  ;;  %v6931_v37 = vadd.f32 %v2655_v40, %v7608_v27  ;;  %7813 = vst [vmem:[#allocation5_spill] sm:$0xff] %v6944_v47  ;;  %v7617_v40 = vunpack.c.h.bf16 %v6944_v47  ;;  %v6948_v27 = vld [vmem:[%s5047_s14 + $0x60] sm:$0xff]  }
 0x2cc   : > { %7809 = vst [vmem:[#allocation6_spill] sm:$0xff] %v6923_v63  ;;  %v2741_v7 = vpack.c.bf16 %v6923_v63, %v6935_v25  ;;  %7814 = vst [vmem:[#allocation13_spill] sm:$0xff] %v6948_v27  ;;  %v7619_v34 = vunpack.c.l.bf16 %v6948_v27  ;;  %v7618_v49 = vunpack.c.h.bf16 %v6948_v27 }
 0x2cd   : > { %7811 = vst [vmem:[#allocation16_spill] sm:$0xff] %v6931_v37  ;;  %v2740_v18 = vpack.c.bf16 %v6931_v37, %v6927_v29 }
 0x2cf   : > { %4444 = vmatprep.mubr.msk.bf16.mxu0 %vm768_vm1, %v2740_v18  ;;  %v7620_v18 = vunpack.c.l.bf16 %v6944_v47 }
 0x2d0   : > { %4445 = vmatmul.mubr.msk.bf16.gmra.mrb[56].mxu0 %vm768_vm1, %v2741_v7 }
 0x2d8   : > { %v4416_v44 = vpop.f32.mrb[28].mxu1 }
 0x2d9   : > { %v2667_v8 = vpop.f32.mrb[29].mxu1  ;;  %v2676_v7 = vadd.f32 %v4416_v44, %v6725_v15 }
 0x2da   : > { %v2668_v35 = vadd.f32 %v6725_v15, %v2667_v8  ;;  %v4417_v17 = vpop.f32.mrb[30].mxu1 }
 0x2db   : > { %v2679_v24 = vadd.f32 %v4417_v17, %v6725_v15  ;;  %v2670_v50 = vpop.f32.mrb[31].mxu1  ;;  %v6971_v44 = vadd.f32 %v2676_v7, %v7620_v18 }
 0x2dc   : > { %v2671_v53 = vadd.f32 %v6725_v15, %v2670_v50  ;;  %v6963_v8 = vadd.f32 %v2668_v35, %v7619_v34 }
 0x2dd   : > { %v6959_v51 = vadd.f32 %v2679_v24, %v7617_v40  ;;  %7818 = vst [vmem:[#allocation34_spill] sm:$0xff] %v6971_v44  ;;  %v6980_v40 = vld [vmem:[%s5047_s14 + $0x78] sm:$0xff]  }
 0x2de   : > { %7816 = vst [vmem:[#allocation42_spill] sm:$0xff] %v6963_v8  ;;  %v6967_v6 = vadd.f32 %v2671_v53, %v7618_v49  ;;  %7819 = vst [vmem:[#allocation43_spill] sm:$0xff] %v6980_v40  ;;  %v7628_v53 = vunpack.c.h.bf16 %v6980_v40  ;;  %v6984_v49 = vld [vmem:[%s5047_s14 + $0x70] sm:$0xff]   ;;  %v7630_v60 = vunpack.c.l.bf16 %v6980_v40 }
 0x2df   : > { %7815 = vst [vmem:[#allocation14_spill] sm:$0xff] %v6959_v51  ;;  %v2743_v50 = vpack.c.bf16 %v6959_v51, %v6971_v44  ;;  %7820 = vst [vmem:[#allocation45_spill] sm:$0xff] %v6984_v49  ;;  %v7629_v7 = vunpack.c.l.bf16 %v6984_v49  ;;  %v7627_v11 = vunpack.c.h.bf16 %v6984_v49 }
 0x2e0   : > { %7817 = vst [vmem:[#allocation24_spill] sm:$0xff] %v6967_v6  ;;  %v2742_v17 = vpack.c.bf16 %v6967_v6, %v6963_v8 }
 0x2e2   : > { %4448 = vmatprep.mubr.msk.bf16.mxu0 %vm768_vm1, %v2742_v17 }
 0x2e3   : > { %4449 = vmatmul.mubr.msk.bf16.gmra.mrb[60].mxu0 %vm768_vm1, %v2743_v50 }
 0x2e8   : > { %v4420_v24 = vpop.f32.mrb[32].mxu1 }
 0x2e9   : > { %v2683_v35 = vpop.f32.mrb[33].mxu1  ;;  %v2692_v17 = vadd.f32 %v4420_v24, %v6725_v15 }
 0x2ea   : > { %v2684_v34 = vadd.f32 %v6725_v15, %v2683_v35  ;;  %v4421_v18 = vpop.f32.mrb[34].mxu1 }
 0x2eb   : > { %v2695_v50 = vadd.f32 %v4421_v18, %v6725_v15  ;;  %v2686_v16 = vpop.f32.mrb[35].mxu1  ;;  %v7007_v24 = vadd.f32 %v2692_v17, %v7630_v60 }
 0x2ec   : > { %v2687_v19 = vadd.f32 %v6725_v15, %v2686_v16  ;;  %v6999_v43 = vadd.f32 %v2684_v34, %v7629_v7  ;;  %v7018_v16 = vld [vmem:[%s7560_s10] ss:$0 sm:$0xff] }
 0x2ed   : > { %v6995_v1 = vadd.f32 %v2695_v50, %v7628_v53  ;;  %7824 = vst [vmem:[#allocation8_spill] sm:$0xff] %v7007_v24 }
 0x2ee   : > { %7822 = vst [vmem:[#allocation29_spill] sm:$0xff] %v6999_v43  ;;  %v7003_v35 = vadd.f32 %v2687_v19, %v7627_v11 }
 0x2ef   : > { %7821 = vst [vmem:[#allocation28_spill] sm:$0xff] %v6995_v1  ;;  %v2745_v15 = vpack.c.bf16 %v6995_v1, %v7007_v24 }
 0x2f0   : > { %7823 = vst [vmem:[#allocation31_spill] sm:$0xff] %v7003_v35  ;;  %v2744_v18 = vpack.c.bf16 %v7003_v35, %v6999_v43 }
 0x2f2   : > { %4452 = vmatprep.mubr.msk.bf16.mxu0 %vm768_vm1, %v2744_v18 }
 0x2f3   : > { %4453 = vmatmul.mubr.msk.bf16.gmra.mrb[64].mxu0 %vm768_vm1, %v2745_v15 }
 0x33b   : > { %v4426_v19 = vpop.f32.mrb[36].mxu0 }
 0x33c   : > { %v2848_v34 = vadd.f32 %v4426_v19, %v7018_v16  ;;  %v2839_v17 = vpop.f32.mrb[37].mxu0 }
 0x33d   : > { %v2840_v50 = vadd.f32 %v7018_v16, %v2839_v17  ;;  %v4427_v11 = vpop.f32.mrb[38].mxu0 }
 0x33e   : > { %v4146_v53 = vmul.f32 -4.0, %v2848_v34  ;;  %v7023_v7 = vadd.f32 %v4427_v11, %v7018_v16  ;;  %v2842_v60 = vpop.f32.mrb[39].mxu0 }
 0x33f   : > { %v4144_v18 = vmul.f32 -4.0, %v2840_v50  ;;  %v7026_v15 = vadd.f32 %v7018_v16, %v2842_v60 }
 0x340   : > { %v3034_v31 = vmul.f32 1.442695, %v4146_v53  ;;  %v4147_v41 = vmul.f32 -4.0, %v7023_v7 }
 0x341   : > { %v3030_v52 = vmul.f32 1.442695, %v4144_v18  ;;  %v4145_v42 = vmul.f32 -4.0, %v7026_v15 }
 0x342   : > { %4734 = vpow2.f32 %v3034_v31  ;;  %v3036_v19 = vmul.f32 1.442695, %v4147_v41 }
 0x343   : > { %4736 = vpow2.f32 %v3030_v52  ;;  %v3032_v17 = vmul.f32 1.442695, %v4145_v42 }
 0x344   : > { %4738 = vpow2.f32 %v3036_v19 }
 0x345   : > { %4740 = vpow2.f32 %v3032_v17  ;;  %v4430_v32 = vpop.f32.mrb[40].mxu0 }
 0x346   : > { %v7031_v11 = vadd.f32 %v4430_v32, %v7018_v16  ;;  %v2855_v35 = vpop.f32.mrb[41].mxu0 }
 0x347   : > { %v7034_v60 = vadd.f32 %v7018_v16, %v2855_v35  ;;  %v4431_v53 = vpop.f32.mrb[42].mxu0 }
 0x348   : > { %v4150_v49 = vmul.f32 -4.0, %v7031_v11  ;;  %v7038_v18 = vadd.f32 %v4431_v53, %v7018_v16  ;;  %v2858_v31 = vpop.f32.mrb[43].mxu0 }
 0x349   : > { %v4148_v52 = vmul.f32 -4.0, %v7034_v60  ;;  %v7042_v42 = vadd.f32 %v7018_v16, %v2858_v31 }
 0x34a   : > { %v3042_v41 = vmul.f32 1.442695, %v4150_v49  ;;  %v4151_v32 = vmul.f32 -4.0, %v7038_v18 }
 0x34b   : > { %v3038_v19 = vmul.f32 1.442695, %v4148_v52  ;;  %v4149_v17 = vmul.f32 -4.0, %v7042_v42 }
 0x34c   : > { %v4735_v35 = vpop.eup %4734  ;;  %4742 = vpow2.f32 %v3042_v41  ;;  %v3044_v1 = vmul.f32 1.442695, %v4151_v32 }
 0x34d   : > { %v4737_v40 = vpop.eup %4736  ;;  %v3096_v43 = vadd.f32 1.0, %v4735_v35  ;;  %4744 = vpow2.f32 %v3038_v19  ;;  %v3040_v31 = vmul.f32 1.442695, %v4149_v17 }
 0x34e   : > { %v4739_v53 = vpop.eup %4738  ;;  %v3094_v24 = vadd.f32 1.0, %v4737_v40  ;;  %4746 = vpow2.f32 %v3044_v1 }
 0x34f   : > { %v4741_v6 = vpop.eup %4740  ;;  %4748 = vrcp.f32 %v3096_v43  ;;  %v3097_v27 = vadd.f32 1.0, %v4739_v53 }
 0x350   : > { %4750 = vrcp.f32 %v3094_v24  ;;  %v3095_v49 = vadd.f32 1.0, %v4741_v6 }
 0x351   : > { %4752 = vrcp.f32 %v3097_v27 }
 0x352   : > { %4754 = vrcp.f32 %v3095_v49 }
 0x353   : > { %4756 = vpow2.f32 %v3040_v31 }
 0x356   : > { %v4743_v52 = vpop.eup %4742 }
 0x357   : > { %v4745_v51 = vpop.eup %4744  ;;  %v3100_v41 = vadd.f32 1.0, %v4743_v52 }
 0x358   : > { %v4747_v47 = vpop.eup %4746  ;;  %v3098_v32 = vadd.f32 1.0, %v4745_v51 }
 0x359   : > { %v4749_v8 = vpop.eup %4748  ;;  %v3101_v27 = vadd.f32 1.0, %v4747_v47 }
 0x35a   : > { %v4751_v35 = vpop.eup %4750  ;;  %4758 = vrcp.f32 %v3098_v32  ;;  %v7046_v19 = vmul.f32 %v4749_v8, %v2848_v34 }
 0x35b   : > { %v4753_v1 = vpop.eup %4752  ;;  %v7048_v40 = vmul.f32 %v4751_v35, %v2840_v50  ;;  %4760 = vrcp.f32 %v3100_v41 }
 0x35c   : > { %v4755_v43 = vpop.eup %4754  ;;  %3258 = vrot.lane.b32.xlu1 %v7046_v19, %s4924_s25  ;;  %v7055_v51 = vmul.f32 %v4753_v1, %v7023_v7 }
 0x35d   : > { %v4757_v6 = vpop.eup %4756  ;;  %3254 = vrot.lane.b32.xlu0 %v7048_v40, %s4924_s25  ;;  %v7058_v8 = vmul.f32 %v4755_v43, %v7026_v15 }
 0x35e   : > { %v3099_v24 = vadd.f32 1.0, %v4757_v6 }
 0x35f   : > { %v4434_v34 = vpop.f32.mrb[44].mxu0 }
 0x360   : > { %4762 = vrcp.f32 %v3099_v24  ;;  %v7061_v50 = vadd.f32 %v4434_v34, %v7018_v16  ;;  %v2871_v17 = vpop.f32.mrb[45].mxu0  ;;  %3260 = vrot.lane.b32.xlu1 %v7055_v51, %s4924_s25 }
 0x361   : > { %v7066_v53 = vadd.f32 %v7018_v16, %v2871_v17  ;;  %v4435_v31 = vpop.f32.mrb[46].mxu0  ;;  %3256 = vrot.lane.b32.xlu0 %v7058_v8, %s4924_s25  ;;  %4764 = vrcp.f32 %v3101_v27 }
 0x362   : > { %v4154_v47 = vmul.f32 -4.0, %v7061_v50  ;;  %v7072_v7 = vadd.f32 %v4435_v31, %v7018_v16  ;;  %v2874_v15 = vpop.f32.mrb[47].mxu0 }
 0x363   : > { %v4152_v49 = vmul.f32 -4.0, %v7066_v53  ;;  %v2875_v52 = vadd.f32 %v7018_v16, %v2874_v15 }
 0x364   : > { %v4759_v41 = vpop.eup %4758  ;;  %v3050_v32 = vmul.f32 1.442695, %v4154_v47  ;;  %v4155_v35 = vmul.f32 -4.0, %v7072_v7 }
 0x365   : > { %v7078_v1 = vmul.f32 %v4759_v41, %v7034_v60  ;;  %v3046_v43 = vmul.f32 1.442695, %v4152_v49  ;;  %v4153_v6 = vmul.f32 -4.0, %v2875_v52  ;;  %v4761_v27 = vpop.eup %4760  ;;  %v4557_v60 = vld [vmem:[%s7561_s11] sm:$0xff]  }
 0x366   : > { %4766 = vpow2.f32 %v3050_v32  ;;  %v3052_v24 = vmul.f32 1.442695, %v4155_v35  ;;  %v7083_v17 = vmul.f32 %v4761_v27, %v7031_v11  ;;  %4456 = vmatprep.subr.bf16.mxu1 %v4557_v60 }
 0x367   : > { %4768 = vpow2.f32 %v3046_v43  ;;  %v3048_v34 = vmul.f32 1.442695, %v4153_v6  ;;  %3262 = vrot.lane.b32.xlu0 %v7078_v1, %s4924_s25  ;;  %4457 = vmatpush3.bf16.msra.mxu1 %v4557_v60 }
 0x368   : > { %4770 = vpow2.f32 %v3052_v24 }
 0x369   : > { %4772 = vpow2.f32 %v3048_v34 }
 0x36a   : > { %v4763_v31 = vpop.eup %4762 }
 0x36b   : > { %v7089_v47 = vmul.f32 %v4763_v31, %v7042_v42  ;;  %3266 = vrot.lane.b32.xlu0 %v7083_v17, %s4924_s25  ;;  %v4765_v15 = vpop.eup %4764 }
 0x36c   : > { %v7096_v11 = vmul.f32 %v4765_v15, %v7038_v18 }
 0x36d   : > { %3264 = vrot.lane.b32.xlu1 %v7089_v47, %s4924_s25 }
 0x370   : > { %v4767_v49 = vpop.eup %4766 }
 0x371   : > { %v4769_v41 = vpop.eup %4768  ;;  %v3104_v32 = vadd.f32 1.0, %v4767_v49  ;;  %3268 = vrot.lane.b32.xlu1 %v7096_v11, %s4924_s25 }
 0x372   : > { %v4771_v42 = vpop.eup %4770  ;;  %v3102_v35 = vadd.f32 1.0, %v4769_v41 }
 0x373   : > { %v4773_v43 = vpop.eup %4772  ;;  %v3105_v6 = vadd.f32 1.0, %v4771_v42 }
 0x374   : > { %4774 = vrcp.f32 %v3102_v35  ;;  %v3103_v27 = vadd.f32 1.0, %v4773_v43 }
 0x375   : > { %4776 = vrcp.f32 %v3104_v32 }
 0x376   : > { %4778 = vrcp.f32 %v3103_v27  ;;  %v4438_v24 = vpop.f32.mrb[48].mxu0 }
 0x377   : > { %v7101_v34 = vadd.f32 %v4438_v24, %v7018_v16  ;;  %v2887_v18 = vpop.f32.mrb[49].mxu0  ;;  %4780 = vrcp.f32 %v3105_v6 }
 0x378   : > { %v2888_v31 = vadd.f32 %v7018_v16, %v2887_v18  ;;  %v4439_v60 = vpop.f32.mrb[50].mxu0 }
 0x379   : > { %v4158_v15 = vmul.f32 -4.0, %v7101_v34  ;;  %v7106_v49 = vadd.f32 %v4439_v60, %v7018_v16  ;;  %v2890_v41 = vpop.f32.mrb[51].mxu0 }
 0x37a   : > { %v4156_v35 = vmul.f32 -4.0, %v2888_v31  ;;  %v2891_v42 = vadd.f32 %v7018_v16, %v2890_v41 }
 0x37b   : > { %v3058_v32 = vmul.f32 1.442695, %v4158_v15  ;;  %v4159_v43 = vmul.f32 -4.0, %v7106_v49 }
 0x37c   : > { %v3054_v27 = vmul.f32 1.442695, %v4156_v35  ;;  %v4157_v24 = vmul.f32 -4.0, %v2891_v42 }
 0x37d   : > { %4782 = vpow2.f32 %v3058_v32  ;;  %v3060_v44 = vmul.f32 1.442695, %v4159_v43 }
 0x37e   : > { %v4775_v6 = vpop.eup %4774  ;;  %4784 = vpow2.f32 %v3054_v27  ;;  %v3056_v18 = vmul.f32 1.442695, %v4157_v24 }
 0x37f   : > { %v4777_v37 = vpop.eup %4776  ;;  %v7111_v57 = vmul.f32 %v4775_v6, %v7066_v53  ;;  %4786 = vpow2.f32 %v3060_v44 }
 0x380   : > { %v4779_v60 = vpop.eup %4778  ;;  %4788 = vpow2.f32 %v3056_v18  ;;  %v7118_v41 = vmul.f32 %v4777_v37, %v7061_v50 }
 0x381   : > { %v7113_v63 = vmul.f32 %v4779_v60, %v2875_v52  ;;  %3270 = vrot.lane.b32.xlu0 %v7111_v57, %s4924_s25  ;;  %v4781_v15 = vpop.eup %4780 }
 0x382   : > { %v7123_v35 = vmul.f32 %v4781_v15, %v7072_v7 }
 0x383   : > { %3272 = vrot.lane.b32.xlu1 %v7113_v63, %s4924_s25 }
 0x385   : > { %3274 = vrot.lane.b32.xlu0 %v7118_v41, %s4924_s25 }
 0x387   : > { %v4783_v44 = vpop.eup %4782  ;;  %3276 = vrot.lane.b32.xlu1 %v7123_v35, %s4924_s25 }
 0x388   : > { %v4785_v53 = vpop.eup %4784  ;;  %v3108_v52 = vadd.f32 1.0, %v4783_v44 }
 0x389   : > { %v4787_v32 = vpop.eup %4786  ;;  %v3106_v43 = vadd.f32 1.0, %v4785_v53 }
 0x38a   : > { %v4789_v27 = vpop.eup %4788  ;;  %v3109_v37 = vadd.f32 1.0, %v4787_v32 }
 0x38b   : > { %4790 = vrcp.f32 %v3106_v43  ;;  %v3107_v50 = vadd.f32 1.0, %v4789_v27 }
 0x38c   : > { %4792 = vrcp.f32 %v3108_v52 }
 0x38d   : > { %4794 = vrcp.f32 %v3107_v50  ;;  %v4442_v24 = vpop.f32.mrb[52].mxu0 }
 0x38e   : > { %v7130_v7 = vadd.f32 %v4442_v24, %v7018_v16  ;;  %v2903_v6 = vpop.f32.mrb[53].mxu0  ;;  %4796 = vrcp.f32 %v3109_v37 }
 0x38f   : > { %v7133_v18 = vadd.f32 %v7018_v16, %v2903_v6  ;;  %v4443_v60 = vpop.f32.mrb[54].mxu0 }
 0x390   : > { %v4162_v15 = vmul.f32 -4.0, %v7130_v7  ;;  %v7137_v44 = vadd.f32 %v4443_v60, %v7018_v16  ;;  %v2906_v53 = vpop.f32.mrb[55].mxu0 }
 0x391   : > { %v4160_v32 = vmul.f32 -4.0, %v7133_v18  ;;  %v2907_v52 = vadd.f32 %v7018_v16, %v2906_v53 }
 0x392   : > { %v3066_v43 = vmul.f32 1.442695, %v4162_v15  ;;  %v4163_v27 = vmul.f32 -4.0, %v7137_v44 }
 0x393   : > { %v3062_v50 = vmul.f32 1.442695, %v4160_v32  ;;  %v4161_v24 = vmul.f32 -4.0, %v2907_v52 }
 0x394   : > { %4798 = vpow2.f32 %v3066_v43  ;;  %v3068_v37 = vmul.f32 1.442695, %v4163_v27 }
 0x395   : > { %v4791_v6 = vpop.eup %4790  ;;  %4800 = vpow2.f32 %v3062_v50  ;;  %v3064_v54 = vmul.f32 1.442695, %v4161_v24 }
 0x396   : > { %v4793_v29 = vpop.eup %4792  ;;  %v7142_v25 = vmul.f32 %v4791_v6, %v2888_v31  ;;  %4802 = vpow2.f32 %v3068_v37 }
 0x397   : > { %v4795_v60 = vpop.eup %4794  ;;  %4804 = vpow2.f32 %v3064_v54  ;;  %v7149_v53 = vmul.f32 %v4793_v29, %v7101_v34 }
 0x398   : > { %v7144_v39 = vmul.f32 %v4795_v60, %v2891_v42  ;;  %3278 = vrot.lane.b32.xlu0 %v7142_v25, %s4924_s25  ;;  %v4797_v15 = vpop.eup %4796 }
 0x399   : > { %v7154_v32 = vmul.f32 %v4797_v15, %v7106_v49 }
 0x39a   : > { %3280 = vrot.lane.b32.xlu1 %v7144_v39, %s4924_s25 }
 0x39c   : > { %3282 = vrot.lane.b32.xlu0 %v7149_v53, %s4924_s25 }
 0x39e   : > { %v4799_v31 = vpop.eup %4798  ;;  %3284 = vrot.lane.b32.xlu1 %v7154_v32, %s4924_s25 }
 0x39f   : > { %v4801_v54 = vpop.eup %4800  ;;  %v3112_v42 = vadd.f32 1.0, %v4799_v31 }
 0x3a0   : > { %v4803_v43 = vpop.eup %4802  ;;  %v3110_v27 = vadd.f32 1.0, %v4801_v54 }
 0x3a1   : > { %v4805_v50 = vpop.eup %4804  ;;  %v3113_v29 = vadd.f32 1.0, %v4803_v43 }
 0x3a2   : > { %4806 = vrcp.f32 %v3110_v27  ;;  %v3111_v34 = vadd.f32 1.0, %v4805_v50 }
 0x3a3   : > { %v4446_v24 = vpop.f32.mrb[56].mxu0  ;;  %4808 = vrcp.f32 %v3112_v42 }
 0x3a4   : > { %v7161_v49 = vadd.f32 %v4446_v24, %v7018_v16  ;;  %v2919_v37 = vpop.f32.mrb[57].mxu0  ;;  %4810 = vrcp.f32 %v3111_v34 }
 0x3a5   : > { %v7164_v6 = vadd.f32 %v7018_v16, %v2919_v37  ;;  %v4447_v60 = vpop.f32.mrb[58].mxu0  ;;  %4812 = vrcp.f32 %v3113_v29 }
 0x3a6   : > { %v4166_v15 = vmul.f32 -4.0, %v7161_v49  ;;  %v7168_v31 = vadd.f32 %v4447_v60, %v7018_v16  ;;  %v2922_v54 = vpop.f32.mrb[59].mxu0 }
 0x3a7   : > { %v4164_v43 = vmul.f32 -4.0, %v7164_v6  ;;  %v2923_v42 = vadd.f32 %v7018_v16, %v2922_v54 }
 0x3a8   : > { %v3074_v27 = vmul.f32 1.442695, %v4166_v15  ;;  %v4167_v50 = vmul.f32 -4.0, %v7168_v31 }
 0x3a9   : > { %v3070_v24 = vmul.f32 1.442695, %v4164_v43  ;;  %v4165_v34 = vmul.f32 -4.0, %v2923_v42 }
 0x3aa   : > { %4814 = vpow2.f32 %v3074_v27  ;;  %v3076_v37 = vmul.f32 1.442695, %v4167_v50 }
 0x3ab   : > { %4816 = vpow2.f32 %v3070_v24  ;;  %v3072_v14 = vmul.f32 1.442695, %v4165_v34 }
 0x3ac   : > { %4818 = vpow2.f32 %v3076_v37  ;;  %v4807_v10 = vpop.eup %4806 }
 0x3ad   : > { %4820 = vpow2.f32 %v3072_v14  ;;  %v4809_v60 = vpop.eup %4808  ;;  %v7174_v48 = vmul.f32 %v4807_v10, %v7133_v18 }
 0x3ae   : > { %v4811_v29 = vpop.eup %4810  ;;  %v7181_v54 = vmul.f32 %v4809_v60, %v7130_v7 }
 0x3af   : > { %v7176_v62 = vmul.f32 %v4811_v29, %v2907_v52  ;;  %3286 = vrot.lane.b32.xlu0 %v7174_v48, %s4924_s25  ;;  %v4813_v15 = vpop.eup %4812 }
 0x3b0   : > { %v7186_v14 = vmul.f32 %v4813_v15, %v7137_v44 }
 0x3b1   : > { %3288 = vrot.lane.b32.xlu1 %v7176_v62, %s4924_s25 }
 0x3b3   : > { %3290 = vrot.lane.b32.xlu0 %v7181_v54, %s4924_s25 }
 0x3b4   : > { %v4815_v43 = vpop.eup %4814 }
 0x3b5   : > { %v4817_v10 = vpop.eup %4816  ;;  %v3116_v18 = vadd.f32 1.0, %v4815_v43  ;;  %3292 = vrot.lane.b32.xlu1 %v7186_v14, %s4924_s25 }
 0x3b6   : > { %v4819_v52 = vpop.eup %4818  ;;  %v3114_v27 = vadd.f32 1.0, %v4817_v10  ;;  %v4450_v50 = vpop.f32.mrb[60].mxu0 }
 0x3b7   : > { %v4821_v7 = vpop.eup %4820  ;;  %v7193_v24 = vadd.f32 %v4450_v50, %v7018_v16  ;;  %v2935_v34 = vpop.f32.mrb[61].mxu0  ;;  %v3117_v37 = vadd.f32 1.0, %v4819_v52 }
 0x3b8   : > { %4822 = vrcp.f32 %v3114_v27  ;;  %v3115_v44 = vadd.f32 1.0, %v4821_v7  ;;  %v7196_v60 = vadd.f32 %v7018_v16, %v2935_v34  ;;  %v4451_v29 = vpop.f32.mrb[62].mxu0 }
 0x3b9   : > { %4824 = vrcp.f32 %v3116_v18  ;;  %v4170_v15 = vmul.f32 -4.0, %v7193_v24  ;;  %v7200_v43 = vadd.f32 %v4451_v29, %v7018_v16  ;;  %v2938_v10 = vpop.f32.mrb[63].mxu0 }
 0x3ba   : > { %4826 = vrcp.f32 %v3115_v44  ;;  %v4168_v28 = vmul.f32 -4.0, %v7196_v60  ;;  %v7204_v50 = vadd.f32 %v7018_v16, %v2938_v10 }
 0x3bb   : > { %v3082_v27 = vmul.f32 1.442695, %v4170_v15  ;;  %v4171_v52 = vmul.f32 -4.0, %v7200_v43  ;;  %4828 = vrcp.f32 %v3117_v37 }
 0x3bc   : > { %v3078_v7 = vmul.f32 1.442695, %v4168_v28  ;;  %v4169_v34 = vmul.f32 -4.0, %v7204_v50 }
 0x3bd   : > { %4830 = vpow2.f32 %v3082_v27  ;;  %v3084_v18 = vmul.f32 1.442695, %v4171_v52 }
 0x3be   : > { %4832 = vpow2.f32 %v3078_v7  ;;  %v3080_v45 = vmul.f32 1.442695, %v4169_v34 }
 0x3bf   : > { %4834 = vpow2.f32 %v3084_v18 }
 0x3c0   : > { %4836 = vpow2.f32 %v3080_v45 }
 0x3c2   : > { %v4823_v29 = vpop.eup %4822 }
 0x3c3   : > { %v4825_v44 = vpop.eup %4824  ;;  %v7209_v59 = vmul.f32 %v4823_v29, %v7164_v6 }
 0x3c4   : > { %v4827_v10 = vpop.eup %4826  ;;  %v7216_v27 = vmul.f32 %v4825_v44, %v7161_v49 }
 0x3c5   : > { %v7211_v13 = vmul.f32 %v4827_v10, %v2923_v42  ;;  %3294 = vrot.lane.b32.xlu0 %v7209_v59, %s4924_s25  ;;  %v4829_v28 = vpop.eup %4828 }
 0x3c6   : > { %v4454_v37 = vpop.f32.mrb[64].mxu0  ;;  %v7227_v29 = vmul.f32 %v4829_v28, %v7168_v31 }
 0x3c7   : > { %v4831_v15 = vpop.eup %4830  ;;  %v7219_v52 = vadd.f32 %v4454_v37, %v7018_v16  ;;  %v2951_v45 = vpop.f32.mrb[65].mxu0  ;;  %3296 = vrot.lane.b32.xlu1 %v7211_v13, %s4924_s25 }
 0x3c8   : > { %v4833_v6 = vpop.eup %4832  ;;  %v3120_v7 = vadd.f32 1.0, %v4831_v15  ;;  %v7224_v42 = vadd.f32 %v7018_v16, %v2951_v45  ;;  %v4455_v34 = vpop.f32.mrb[66].mxu0 }
 0x3c9   : > { %v4835_v18 = vpop.eup %4834  ;;  %v3118_v10 = vadd.f32 1.0, %v4833_v6  ;;  %v4174_v49 = vmul.f32 -4.0, %v7219_v52  ;;  %v7231_v44 = vadd.f32 %v4455_v34, %v7018_v16  ;;  %v2954_v37 = vpop.f32.mrb[67].mxu0  ;;  %3298 = vrot.lane.b32.xlu0 %v7216_v27, %s4924_s25 }
 0x3ca   : > { %v4837_v21 = vpop.eup %4836  ;;  %4838 = vrcp.f32 %v3120_v7  ;;  %v3121_v15 = vadd.f32 1.0, %v4835_v18  ;;  %v4172_v45 = vmul.f32 -4.0, %v7224_v42  ;;  %v7237_v61 = vadd.f32 %v7018_v16, %v2954_v37 }
 0x3cb   : > { %4840 = vrcp.f32 %v3118_v10  ;;  %v3119_v31 = vadd.f32 1.0, %v4837_v21  ;;  %v3090_v28 = vmul.f32 1.442695, %v4174_v49  ;;  %v4175_v6 = vmul.f32 -4.0, %v7231_v44  ;;  %3300 = vrot.lane.b32.xlu1 %v7227_v29, %s4924_s25 }
 0x3cc   : > { %4842 = vrcp.f32 %v3121_v15  ;;  %v3086_v34 = vmul.f32 1.442695, %v4172_v45  ;;  %v4173_v2 = vmul.f32 -4.0, %v7237_v61 }
 0x3cd   : > { %4844 = vrcp.f32 %v3119_v31  ;;  %v3092_v7 = vmul.f32 1.442695, %v4175_v6 }
 0x3ce   : > { %4846 = vpow2.f32 %v3090_v28  ;;  %v3088_v18 = vmul.f32 1.442695, %v4173_v2  ;;  %v3259_v4 = vpop.permute.xlu1 %3258 }
 0x3cf   : > { %4848 = vpow2.f32 %v3086_v34  ;;  %v3255_v16 = vpop.permute.xlu0 %3254  ;;  %v3352_v2 = vadd.f32 %v3259_v4, %v7046_v19 }
 0x3d0   : > { %4850 = vpow2.f32 %v3092_v7  ;;  %v3350_v15 = vadd.f32 %v3255_v16, %v7048_v40 }
 0x3d1   : > { %4852 = vpow2.f32 %v3088_v18 }
 0x3d2   : > { %v3261_v21 = vpop.permute.xlu1 %3260 }
 0x3d3   : > { %v3353_v49 = vadd.f32 %v3261_v21, %v7055_v51  ;;  %v3257_v37 = vpop.permute.xlu0 %3256 }
 0x3d4   : > { %v4839_v10 = vpop.eup %4838  ;;  %v3351_v45 = vadd.f32 %v3257_v37, %v7058_v8 }
 0x3d5   : > { %v4841_v22 = vpop.eup %4840  ;;  %v3383_v51 = vpack.c.bf16 %v3353_v49, %v3352_v2 }
 0x3d6   : > { %v4843_v38 = vpop.eup %4842  ;;  %v7247_v31 = vmul.f32 %v4841_v22, %v7196_v60  ;;  %v3382_v6 = vpack.c.bf16 %v3351_v45, %v3350_v15  ;;  %v7257_v22 = vmul.f32 %v4839_v10, %v7193_v24 }
 0x3d7   : > { %v4845_v28 = vpop.eup %4844  ;;  %v7263_v60 = vmul.f32 %v4843_v38, %v7200_v43 }
 0x3d8   : > { %v4847_v34 = vpop.eup %4846  ;;  %v7251_v7 = vmul.f32 %v4845_v28, %v7204_v50  ;;  %3302 = vrot.lane.b32.xlu0 %v7247_v31, %s4924_s25  ;;  %4458 = vmatprep.mubr.msk.bf16.mxu1 %vm3413_vm6, %v3382_v6 }
 0x3d9   : > { %v4849_v40 = vpop.eup %4848  ;;  %v3124_v18 = vadd.f32 1.0, %v4847_v34  ;;  %4459 = vmatmul.mubr.msk.bf16.vlgmr.msra.gmra.mrb[36].mxu1 %vm3413_vm6, %v3383_v51  ;;  %v3263_v21 = vpop.permute.xlu0 %3262 }
 0x3da   : > { %v4851_v8 = vpop.eup %4850  ;;  %v3122_v4 = vadd.f32 1.0, %v4849_v40  ;;  %3304 = vrot.lane.b32.xlu1 %v7251_v7, %s4924_s25  ;;  %v3354_v10 = vadd.f32 %v3263_v21, %v7078_v1 }
 0x3db   : > { %v4853_v19 = vpop.eup %4852  ;;  %v3125_v50 = vadd.f32 1.0, %v4851_v8 }
 0x3dc   : > { %4854 = vrcp.f32 %v3122_v4  ;;  %v3123_v16 = vadd.f32 1.0, %v4853_v19  ;;  %3306 = vrot.lane.b32.xlu0 %v7257_v22, %s4924_s25 }
 0x3dd   : > { %4856 = vrcp.f32 %v3124_v18  ;;  %v3267_v38 = vpop.permute.xlu0 %3266 }
 0x3de   : > { %4858 = vrcp.f32 %v3123_v16  ;;  %3308 = vrot.lane.b32.xlu1 %v7263_v60, %s4924_s25  ;;  %v3356_v15 = vadd.f32 %v3267_v38, %v7083_v17 }
 0x3df   : > { %4860 = vrcp.f32 %v3125_v50  ;;  %v3265_v24 = vpop.permute.xlu1 %3264 }
 0x3e0   : > { %v3355_v49 = vadd.f32 %v3265_v24, %v7089_v47 }
 0x3e2   : > { %v3384_v43 = vpack.c.bf16 %v3355_v49, %v3354_v10 }
 0x3e3   : > { %v3269_v37 = vpop.permute.xlu1 %3268 }
 0x3e4   : > { %v3357_v45 = vadd.f32 %v3269_v37, %v7096_v11  ;;  %4462 = vmatprep.mubr.msk.bf16.mxu1 %vm3413_vm6, %v3384_v43 }
 0x3e6   : > { %v4855_v2 = vpop.eup %4854  ;;  %v3385_v34 = vpack.c.bf16 %v3357_v45, %v3356_v15 }
 0x3e7   : > { %v4857_v28 = vpop.eup %4856  ;;  %v7275_v6 = vmul.f32 %v4855_v2, %v7224_v42 }
 0x3e8   : > { %v4859_v51 = vpop.eup %4858  ;;  %4463 = vmatmul.mubr.msk.bf16.gmra.mrb[40].mxu1 %vm3413_vm6, %v3385_v34  ;;  %v7284_v47 = vmul.f32 %v4857_v28, %v7219_v52 }
 0x3e9   : > { %v7278_v1 = vmul.f32 %v4859_v51, %v7237_v61  ;;  %3310 = vrot.lane.b32.xlu0 %v7275_v6, %s4924_s25  ;;  %v4861_v17 = vpop.eup %4860 }
 0x3ea   : > { %v7289_v11 = vmul.f32 %v4861_v17, %v7231_v44 }
 0x3eb   : > { %3312 = vrot.lane.b32.xlu1 %v7278_v1, %s4924_s25 }
 0x3ed   : > { %3314 = vrot.lane.b32.xlu0 %v7284_v47, %s4924_s25 }
 0x3ef   : > { %3316 = vrot.lane.b32.xlu1 %v7289_v11, %s4924_s25 }
 0x3f3   : > { %v3271_v61 = vpop.permute.xlu0 %3270 }
 0x3f4   : > { %v3358_v40 = vadd.f32 %v3271_v61, %v7111_v57 }
 0x3f5   : > { %v3273_v42 = vpop.permute.xlu1 %3272 }
 0x3f6   : > { %v3359_v18 = vadd.f32 %v3273_v42, %v7113_v63 }
 0x3f7   : > { %v3275_v52 = vpop.permute.xlu0 %3274 }
 0x3f8   : > { %v3386_v8 = vpack.c.bf16 %v3359_v18, %v3358_v40  ;;  %v3360_v19 = vadd.f32 %v3275_v52, %v7118_v41 }
 0x3f9   : > { %v3277_v4 = vpop.permute.xlu1 %3276 }
 0x3fa   : > { %v3361_v44 = vadd.f32 %v3277_v4, %v7123_v35  ;;  %4466 = vmatprep.mubr.msk.bf16.mxu1 %vm3413_vm6, %v3386_v8 }
 0x3fc   : > { %v3387_v50 = vpack.c.bf16 %v3361_v44, %v3360_v19 }
 0x3fe   : > { %4467 = vmatmul.mubr.msk.bf16.gmra.mrb[44].mxu1 %vm3413_vm6, %v3387_v50 }
 0x40a   : > { %v3279_v16 = vpop.permute.xlu0 %3278 }
 0x40b   : > { %v3362_v24 = vadd.f32 %v3279_v16, %v7142_v25 }
 0x40c   : > { %v3281_v21 = vpop.permute.xlu1 %3280 }
 0x40d   : > { %v3363_v57 = vadd.f32 %v3281_v21, %v7144_v39 }
 0x40e   : > { %v3283_v10 = vpop.permute.xlu0 %3282 }
 0x40f   : > { %v3388_v63 = vpack.c.bf16 %v3363_v57, %v3362_v24  ;;  %v3364_v38 = vadd.f32 %v3283_v10, %v7149_v53 }
 0x410   : > { %v3285_v49 = vpop.permute.xlu1 %3284 }
 0x411   : > { %v3365_v41 = vadd.f32 %v3285_v49, %v7154_v32  ;;  %4470 = vmatprep.mubr.msk.bf16.mxu1 %vm3413_vm6, %v3388_v63  ;;  %v7334_v63 = vld [vmem:[%s7562_s12] ss:$0 sm:$0xff] }
 0x413   : > { %v3389_v35 = vpack.c.bf16 %v3365_v41, %v3364_v38 }
 0x415   : > { %4471 = vmatmul.mubr.msk.bf16.gmra.mrb[48].mxu1 %vm3413_vm6, %v3389_v35 }
 0x421   : > { %v3287_v43 = vpop.permute.xlu0 %3286 }
 0x422   : > { %v3366_v15 = vadd.f32 %v3287_v43, %v7174_v48 }
 0x423   : > { %v3289_v37 = vpop.permute.xlu1 %3288 }
 0x424   : > { %v3367_v25 = vadd.f32 %v3289_v37, %v7176_v62 }
 0x425   : > { %v3291_v45 = vpop.permute.xlu0 %3290 }
 0x426   : > { %v3390_v39 = vpack.c.bf16 %v3367_v25, %v3366_v15  ;;  %v3368_v28 = vadd.f32 %v3291_v45, %v7181_v54  ;;  %v7825_v15 = vunpack.c.l.bf16 %v6728_v26 }
 0x427   : > { %v3293_v2 = vpop.permute.xlu1 %3292 }
 0x428   : > { %v3369_v53 = vadd.f32 %v3293_v2, %v7186_v14  ;;  %4474 = vmatprep.mubr.msk.bf16.mxu1 %vm3413_vm6, %v3390_v39 }
 0x42a   : > { %v3391_v32 = vpack.c.bf16 %v3369_v53, %v3368_v28  ;;  %v7828_v28 = vunpack.c.h.bf16 %v6728_v26 }
 0x42c   : > { %4475 = vmatmul.mubr.msk.bf16.gmra.mrb[52].mxu1 %vm3413_vm6, %v3391_v32  ;;  %v7829_v32 = vunpack.c.h.bf16 %v6732_v20 }
 0x437   : > { %v3295_v34 = vpop.permute.xlu0 %3294 }
 0x438   : > { %v3370_v17 = vadd.f32 %v3295_v34, %v7209_v59 }
 0x439   : > { %v3297_v51 = vpop.permute.xlu1 %3296 }
 0x43a   : > { %v3371_v48 = vadd.f32 %v3297_v51, %v7211_v13 }
 0x43b   : > { %v3299_v61 = vpop.permute.xlu0 %3298 }
 0x43c   : > { %v3392_v62 = vpack.c.bf16 %v3371_v48, %v3370_v17  ;;  %v3372_v40 = vadd.f32 %v3299_v61, %v7216_v27 }
 0x43d   : > { %v3301_v42 = vpop.permute.xlu1 %3300 }
 0x43e   : > { %v3373_v54 = vadd.f32 %v3301_v42, %v7227_v29  ;;  %4478 = vmatprep.mubr.msk.bf16.mxu1 %vm3413_vm6, %v3392_v62 }
 0x440   : > { %v3393_v14 = vpack.c.bf16 %v3373_v54, %v3372_v40 }
 0x442   : > { %4479 = vmatmul.mubr.msk.bf16.gmra.mrb[56].mxu1 %vm3413_vm6, %v3393_v14 }
 0x44a   : > { %v3303_v18 = vpop.permute.xlu0 %3302 }
 0x44b   : > { %v3374_v8 = vadd.f32 %v3303_v18, %v7247_v31  ;;  %v7830_v18 = vunpack.c.l.bf16 %v6763_v12 }
 0x44c   : > { %v3305_v52 = vpop.permute.xlu1 %3304 }
 0x44d   : > { %v3375_v59 = vadd.f32 %v3305_v52, %v7251_v7 }
 0x44e   : > { %v3307_v4 = vpop.permute.xlu0 %3306 }
 0x44f   : > { %v3394_v13 = vpack.c.bf16 %v3375_v59, %v3374_v8  ;;  %v3376_v44 = vadd.f32 %v3307_v4, %v7257_v22  ;;  %v7831_v59 = vunpack.c.l.bf16 %v6768_v0 }
 0x450   : > { %v3309_v19 = vpop.permute.xlu1 %3308 }
 0x451   : > { %v3377_v27 = vadd.f32 %v3309_v19, %v7263_v60  ;;  %4482 = vmatprep.mubr.msk.bf16.mxu1 %vm3413_vm6, %v3394_v13  ;;  %v7832_v19 = vunpack.c.h.bf16 %v6763_v12 }
 0x453   : > { %v3395_v29 = vpack.c.bf16 %v3377_v27, %v3376_v44 }
 0x455   : > { %4483 = vmatmul.mubr.msk.bf16.gmra.mrb[60].mxu1 %vm3413_vm6, %v3395_v29  ;;  %v7833_v29 = vunpack.c.h.bf16 %v6768_v0 }
 0x45b   : > { %v3311_v50 = vpop.permute.xlu0 %3310 }
 0x45c   : > { %v3378_v21 = vadd.f32 %v3311_v50, %v7275_v6 }
 0x45d   : > { %v3313_v16 = vpop.permute.xlu1 %3312 }
 0x45e   : > { %v3379_v31 = vadd.f32 %v3313_v16, %v7278_v1 }
 0x45f   : > { %v3315_v24 = vpop.permute.xlu0 %3314 }
 0x460   : > { %v3396_v7 = vpack.c.bf16 %v3379_v31, %v3378_v21  ;;  %v3380_v10 = vadd.f32 %v3315_v24, %v7284_v47 }
 0x461   : > { %v3317_v57 = vpop.permute.xlu1 %3316 }
 0x462   : > { %v3381_v22 = vadd.f32 %v3317_v57, %v7289_v11  ;;  %4486 = vmatprep.mubr.msk.bf16.mxu1 %vm3413_vm6, %v3396_v7 }
 0x464   : > { %v3397_v60 = vpack.c.bf16 %v3381_v22, %v3380_v10  ;;  %v7834_v22 = vunpack.c.l.bf16 %v6800_v36 }
 0x466   : > { %4487 = vmatmul.mubr.msk.bf16.gmra.mrb[64].mxu1 %vm3413_vm6, %v3397_v60 }
 0x4ac   : > { %v4460_v6 = vpop.f32.mrb[36].mxu1 }
 0x4ad   : > { %v3505_v1 = vadd.f32 %v4460_v6, %v7334_v63  ;;  %v3496_v49 = vpop.f32.mrb[37].mxu1  ;;  %v7835_v6 = vld [vmem:[#allocation33_spill] sm:$0xff] }
 0x4ae   : > { %v3497_v38 = vadd.f32 %v7334_v63, %v3496_v49  ;;  %v4461_v47 = vpop.f32.mrb[38].mxu1  ;;  %v7836_v49 = vld [vmem:[#allocation25_spill] sm:$0xff] }
 0x4af   : > { %v3625_v11 = vadd.f32 %v3505_v1, %v6755_v55  ;;  %v3508_v41 = vadd.f32 %v4461_v47, %v7334_v63  ;;  %v3499_v35 = vpop.f32.mrb[39].mxu1 }
 0x4b0   : > { %v3623_v43 = vadd.f32 %v3497_v38, %v6747_v33  ;;  %v3500_v37 = vadd.f32 %v7334_v63, %v3499_v35  ;;  %v7827_v33 = vunpack.c.l.bf16 %v6732_v20  ;;  %v7837_v38 = vunpack.c.l.bf16 %v7836_v49 }
 0x4b1   : > { %v3657_v25 = vadd.f32 %v3625_v11, %v7825_v15  ;;  %v3626_v45 = vadd.f32 %v3508_v41, %v6743_v5  ;;  %v7838_v11 = vld [vmem:[#allocation38_spill] sm:$0xff]  ;;  %v7839_v35 = vunpack.c.h.bf16 %v6800_v36  ;;  %v7840_v15 = vunpack.c.h.bf16 %v7836_v49 }
 0x4b2   : > { %v3655_v55 = vadd.f32 %v3623_v43, %v7827_v33  ;;  %v3624_v39 = vadd.f32 %v3500_v37, %v6751_v58  ;;  %v7858_v49 = vld [vmem:[#allocation10_spill] sm:$0xff] }
 0x4b3   : > { %v4238_v2 = vpack.c.bf16 %v3657_v25, %v3657_v25  ;;  %v3658_v5 = vadd.f32 %v3626_v45, %v7828_v28  ;;  %v7841_v28 = vld [vmem:[#allocation36_spill] sm:$0xff] }
 0x4b4   : > { %v4236_v53 = vpack.c.bf16 %v3655_v55, %v3655_v55  ;;  %v3656_v34 = vadd.f32 %v3624_v39, %v7829_v32 }
 0x4b5   : > { %3818 = vst.msk [vmem:[%s7350_s15 + $0x8] sm:$0xf] %vm3815_vm7, %v4238_v2  ;;  %v4239_v51 = vpack.c.bf16 %v3658_v5, %v3658_v5 }
 0x4b6   : > { %3816 = vst.msk [vmem:[%s7350_s15] sm:$0xf] %vm3815_vm7, %v4236_v53  ;;  %v4237_v17 = vpack.c.bf16 %v3656_v34, %v3656_v34  ;;  %v7842_v34 = vld [vmem:[#allocation20_spill] sm:$0xff] }
 0x4b7   : > { %3819 = vst.msk [vmem:[%s7350_s15 + $0xc] sm:$0xf] %vm3815_vm7, %v4239_v51 }
 0x4b8   : > { %3817 = vst.msk [vmem:[%s7350_s15 + $0x4] sm:$0xf] %vm3815_vm7, %v4237_v17 }
 0x4bb   : > { %v4464_v48 = vpop.f32.mrb[40].mxu1 }
 0x4bc   : > { %v3521_v58 = vadd.f32 %v4464_v48, %v7334_v63  ;;  %v3512_v61 = vpop.f32.mrb[41].mxu1  ;;  %v7843_v48 = vld [vmem:[#allocation18_spill] sm:$0xff] }
 0x4bd   : > { %v3513_v26 = vadd.f32 %v7334_v63, %v3512_v61  ;;  %v4465_v62 = vpop.f32.mrb[42].mxu1 }
 0x4be   : > { %v3629_v20 = vadd.f32 %v3521_v58, %v6791_v56  ;;  %v3524_v42 = vadd.f32 %v4465_v62, %v7334_v63  ;;  %v3515_v40 = vpop.f32.mrb[43].mxu1  ;;  %v7844_v58 = vunpack.c.l.bf16 %v7843_v48 }
 0x4bf   : > { %v3627_v54 = vadd.f32 %v3513_v26, %v6783_v46  ;;  %v3516_v14 = vadd.f32 %v7334_v63, %v3515_v40  ;;  %v7845_v26 = vld [vmem:[#allocation35_spill] sm:$0xff] }
 0x4c0   : > { %v3661_v52 = vadd.f32 %v3629_v20, %v7830_v18  ;;  %v3630_v8 = vadd.f32 %v3524_v42, %v6779_v30  ;;  %v7846_v20 = vld [vmem:[#allocation19_spill] sm:$0xff] }
 0x4c1   : > { %v3659_v4 = vadd.f32 %v3627_v54, %v7831_v59  ;;  %v3628_v13 = vadd.f32 %v3516_v14, %v6787_v3  ;;  %v7847_v42 = vunpack.c.l.bf16 %v7846_v20  ;;  %v7848_v54 = vld [vmem:[#allocation22_spill] sm:$0xff] }
 0x4c2   : > { %v4242_v56 = vpack.c.bf16 %v3661_v52, %v3661_v52  ;;  %v3662_v44 = vadd.f32 %v3630_v8, %v7832_v19  ;;  %v7849_v52 = vunpack.c.h.bf16 %v7843_v48  ;;  %v7865_v48 = vld [vmem:[#allocation6_spill] sm:$0xff] }
 0x4c3   : > { %v4240_v27 = vpack.c.bf16 %v3659_v4, %v3659_v4  ;;  %v3660_v46 = vadd.f32 %v3628_v13, %v7833_v29  ;;  %v7850_v4 = vunpack.c.h.bf16 %v7846_v20  ;;  %v7868_v20 = vld [vmem:[#allocation16_spill] sm:$0xff] }
 0x4c4   : > { %3822 = vst.msk [vmem:[%s7350_s15 + $0x18] sm:$0xf] %vm3815_vm7, %v4242_v56  ;;  %v4243_v50 = vpack.c.bf16 %v3662_v44, %v3662_v44 }
 0x4c5   : > { %3820 = vst.msk [vmem:[%s7350_s15 + $0x10] sm:$0xf] %vm3815_vm7, %v4240_v27  ;;  %v4241_v16 = vpack.c.bf16 %v3660_v46, %v3660_v46 }
 0x4c6   : > { %3823 = vst.msk [vmem:[%s7350_s15 + $0x1c] sm:$0xf] %vm3815_vm7, %v4243_v50 }
 0x4c7   : > { %3821 = vst.msk [vmem:[%s7350_s15 + $0x14] sm:$0xf] %vm3815_vm7, %v4241_v16  ;;  %v7851_v16 = vld [vmem:[#allocation21_spill] sm:$0xff] }
 0x4d1   : > { %v4468_v30 = vpop.f32.mrb[44].mxu1 }
 0x4d2   : > { %v3537_v3 = vadd.f32 %v4468_v30, %v7334_v63  ;;  %v3528_v21 = vpop.f32.mrb[45].mxu1 }
 0x4d3   : > { %v3529_v12 = vadd.f32 %v7334_v63, %v3528_v21  ;;  %v4469_v31 = vpop.f32.mrb[46].mxu1 }
 0x4d4   : > { %v3633_v0 = vadd.f32 %v3537_v3, %v6827_v9  ;;  %v3540_v24 = vadd.f32 %v4469_v31, %v7334_v63  ;;  %v3531_v7 = vpop.f32.mrb[47].mxu1 }
 0x4d5   : > { %v3631_v57 = vadd.f32 %v3529_v12, %v6819_v23  ;;  %v3532_v10 = vadd.f32 %v7334_v63, %v3531_v7  ;;  %v7852_v12 = vld [vmem:[#allocation37_spill] sm:$0xff] }
 0x4d6   : > { %v3665_v60 = vadd.f32 %v3633_v0, %v7834_v22  ;;  %v3634_v1 = vadd.f32 %v3540_v24, %v7835_v6  ;;  %v7853_v24 = vld [vmem:[#allocation27_spill] sm:$0xff] }
 0x4d7   : > { %v3663_v47 = vadd.f32 %v3631_v57, %v7837_v38  ;;  %v3632_v41 = vadd.f32 %v3532_v10, %v7838_v11  ;;  %v7854_v7 = vunpack.c.l.bf16 %v7853_v24  ;;  %v7855_v10 = vld [vmem:[#allocation23_spill] sm:$0xff]  ;;  %v7859_v11 = vunpack.c.h.bf16 %v7853_v24  ;;  %v7875_v24 = vld [vmem:[#allocation14_spill] sm:$0xff] }
 0x4d8   : > { %v4246_v9 = vpack.c.bf16 %v3665_v60, %v3665_v60  ;;  %v3666_v43 = vadd.f32 %v3634_v1, %v7839_v35  ;;  %v7856_v60 = vld [vmem:[#allocation26_spill] sm:$0xff] }
 0x4d9   : > { %v4244_v37 = vpack.c.bf16 %v3663_v47, %v3663_v47  ;;  %v3664_v23 = vadd.f32 %v3632_v41, %v7840_v15  ;;  %v7857_v6 = vunpack.c.l.bf16 %v7856_v60  ;;  %v7860_v35 = vunpack.c.h.bf16 %v7856_v60  ;;  %v7878_v60 = vld [vmem:[#allocation24_spill] sm:$0xff] }
 0x4da   : > { %3826 = vst.msk [vmem:[%s7350_s15 + $0x28] sm:$0xf] %vm3815_vm7, %v4246_v9  ;;  %v4247_v25 = vpack.c.bf16 %v3666_v43, %v3666_v43 }
 0x4db   : > { %3824 = vst.msk [vmem:[%s7350_s15 + $0x20] sm:$0xf] %vm3815_vm7, %v4244_v37  ;;  %v4245_v45 = vpack.c.bf16 %v3664_v23, %v3664_v23 }
 0x4dc   : > { %3827 = vst.msk [vmem:[%s7350_s15 + $0x2c] sm:$0xf] %vm3815_vm7, %v4247_v25 }
 0x4dd   : > { %3825 = vst.msk [vmem:[%s7350_s15 + $0x24] sm:$0xf] %vm3815_vm7, %v4245_v45 }
 0x4e8   : > { %v4472_v33 = vpop.f32.mrb[48].mxu1 }
 0x4e9   : > { %v3553_v55 = vadd.f32 %v4472_v33, %v7334_v63  ;;  %v3544_v39 = vpop.f32.mrb[49].mxu1 }
 0x4ea   : > { %v3545_v36 = vadd.f32 %v7334_v63, %v3544_v39  ;;  %v4473_v2 = vpop.f32.mrb[50].mxu1  ;;  %v7861_v39 = vld [vmem:[#allocation40_spill] sm:$0xff] }
 0x4eb   : > { %v3637_v5 = vadd.f32 %v3553_v55, %v7841_v28  ;;  %v3556_v53 = vadd.f32 %v4473_v2, %v7334_v63  ;;  %v3547_v32 = vpop.f32.mrb[51].mxu1 }
 0x4ec   : > { %v3635_v51 = vadd.f32 %v3545_v36, %v7842_v34  ;;  %v3548_v17 = vadd.f32 %v7334_v63, %v3547_v32  ;;  %v7863_v34 = vld [vmem:[#allocation30_spill] sm:$0xff] }
 0x4ed   : > { %v3669_v61 = vadd.f32 %v3637_v5, %v7844_v58  ;;  %v3638_v62 = vadd.f32 %v3556_v53, %v7845_v26  ;;  %v7862_v5 = vld [vmem:[#allocation7_spill] sm:$0xff] }
 0x4ee   : > { %v3667_v40 = vadd.f32 %v3635_v51, %v7847_v42  ;;  %v3636_v14 = vadd.f32 %v3548_v17, %v7848_v54  ;;  %v7864_v51 = vunpack.c.l.bf16 %v7863_v34  ;;  %v7869_v54 = vunpack.c.h.bf16 %v7863_v34  ;;  %v7885_v34 = vld [vmem:[#allocation28_spill] sm:$0xff] }
 0x4ef   : > { %v4250_v18 = vpack.c.bf16 %v3669_v61, %v3669_v61  ;;  %v3670_v8 = vadd.f32 %v3638_v62, %v7849_v52  ;;  %v7866_v61 = vld [vmem:[#allocation32_spill] sm:$0xff] }
 0x4f0   : > { %v4248_v59 = vpack.c.bf16 %v3667_v40, %v3667_v40  ;;  %v3668_v13 = vadd.f32 %v3636_v14, %v7850_v4  ;;  %v7867_v26 = vunpack.c.l.bf16 %v7866_v61  ;;  %v7870_v52 = vunpack.c.h.bf16 %v7866_v61  ;;  %v7888_v61 = vld [vmem:[#allocation31_spill] sm:$0xff] }
 0x4f1   : > { %3830 = vst.msk [vmem:[%s7350_s15 + $0x38] sm:$0xf] %vm3815_vm7, %v4250_v18  ;;  %v4251_v56 = vpack.c.bf16 %v3670_v8, %v3670_v8 }
 0x4f2   : > { %3828 = vst.msk [vmem:[%s7350_s15 + $0x30] sm:$0xf] %vm3815_vm7, %v4248_v59  ;;  %v4249_v19 = vpack.c.bf16 %v3668_v13, %v3668_v13 }
 0x4f3   : > { %3831 = vst.msk [vmem:[%s7350_s15 + $0x3c] sm:$0xf] %vm3815_vm7, %v4251_v56 }
 0x4f4   : > { %3829 = vst.msk [vmem:[%s7350_s15 + $0x34] sm:$0xf] %vm3815_vm7, %v4249_v19 }
 0x4ff   : > { %v4476_v44 = vpop.f32.mrb[52].mxu1 }
 0x500   : > { %v3569_v27 = vadd.f32 %v4476_v44, %v7334_v63  ;;  %v3560_v29 = vpop.f32.mrb[53].mxu1 }
 0x501   : > { %v3561_v46 = vadd.f32 %v7334_v63, %v3560_v29  ;;  %v4477_v50 = vpop.f32.mrb[54].mxu1  ;;  %v7871_v29 = vld [vmem:[#allocation34_spill] sm:$0xff] }
 0x502   : > { %v3641_v30 = vadd.f32 %v3569_v27, %v7851_v16  ;;  %v3572_v3 = vadd.f32 %v4477_v50, %v7334_v63  ;;  %v3563_v21 = vpop.f32.mrb[55].mxu1 }
 0x503   : > { %v3639_v31 = vadd.f32 %v3561_v46, %v7852_v12  ;;  %v3564_v0 = vadd.f32 %v7334_v63, %v3563_v21  ;;  %v7873_v12 = vld [vmem:[#allocation5_spill] sm:$0xff] }
 0x504   : > { %v3673_v57 = vadd.f32 %v3641_v30, %v7854_v7  ;;  %v3642_v22 = vadd.f32 %v3572_v3, %v7855_v10  ;;  %v7872_v30 = vld [vmem:[#allocation42_spill] sm:$0xff] }
 0x505   : > { %v3671_v1 = vadd.f32 %v3639_v31, %v7857_v6  ;;  %v3640_v38 = vadd.f32 %v3564_v0, %v7858_v49  ;;  %v7874_v31 = vunpack.c.l.bf16 %v7873_v12  ;;  %v7879_v49 = vunpack.c.h.bf16 %v7873_v12 }
 0x506   : > { %v4254_v47 = vpack.c.bf16 %v3673_v57, %v3673_v57  ;;  %v3674_v41 = vadd.f32 %v3642_v22, %v7859_v11  ;;  %v7876_v57 = vld [vmem:[#allocation13_spill] sm:$0xff] }
 0x507   : > { %v4252_v9 = vpack.c.bf16 %v3671_v1, %v3671_v1  ;;  %v3672_v43 = vadd.f32 %v3640_v38, %v7860_v35  ;;  %v7877_v10 = vunpack.c.l.bf16 %v7876_v57  ;;  %v7880_v11 = vunpack.c.h.bf16 %v7876_v57 }
 0x508   : > { %3834 = vst.msk [vmem:[%s7350_s15 + $0x48] sm:$0xf] %vm3815_vm7, %v4254_v47  ;;  %v4255_v37 = vpack.c.bf16 %v3674_v41, %v3674_v41 }
 0x509   : > { %3832 = vst.msk [vmem:[%s7350_s15 + $0x40] sm:$0xf] %vm3815_vm7, %v4252_v9  ;;  %v4253_v15 = vpack.c.bf16 %v3672_v43, %v3672_v43 }
 0x50a   : > { %3835 = vst.msk [vmem:[%s7350_s15 + $0x4c] sm:$0xf] %vm3815_vm7, %v4255_v37 }
 0x50b   : > { %3833 = vst.msk [vmem:[%s7350_s15 + $0x44] sm:$0xf] %vm3815_vm7, %v4253_v15 }
 0x515   : > { %v4480_v23 = vpop.f32.mrb[56].mxu1 }
 0x516   : > { %v3585_v25 = vadd.f32 %v4480_v23, %v7334_v63  ;;  %v3576_v45 = vpop.f32.mrb[57].mxu1 }
 0x517   : > { %v3577_v33 = vadd.f32 %v7334_v63, %v3576_v45  ;;  %v4481_v55 = vpop.f32.mrb[58].mxu1  ;;  %v7881_v45 = vld [vmem:[#allocation8_spill] sm:$0xff] }
 0x518   : > { %v3645_v36 = vadd.f32 %v3585_v25, %v7861_v39  ;;  %v3588_v2 = vadd.f32 %v4481_v55, %v7334_v63  ;;  %v3579_v28 = vpop.f32.mrb[59].mxu1 }
 0x519   : > { %v3643_v53 = vadd.f32 %v3577_v33, %v7862_v5  ;;  %v3580_v32 = vadd.f32 %v7334_v63, %v3579_v28  ;;  %v7883_v5 = vld [vmem:[#allocation43_spill] sm:$0xff] }
 0x51a   : > { %v3677_v17 = vadd.f32 %v3645_v36, %v7864_v51  ;;  %v3646_v58 = vadd.f32 %v3588_v2, %v7865_v48  ;;  %v7882_v36 = vld [vmem:[#allocation29_spill] sm:$0xff] }
 0x51b   : > { %v3675_v62 = vadd.f32 %v3643_v53, %v7867_v26  ;;  %v3644_v42 = vadd.f32 %v3580_v32, %v7868_v20  ;;  %v7884_v53 = vunpack.c.l.bf16 %v7883_v5  ;;  %v7889_v20 = vunpack.c.h.bf16 %v7883_v5 }
 0x51c   : > { %v4258_v40 = vpack.c.bf16 %v3677_v17, %v3677_v17  ;;  %v3678_v14 = vadd.f32 %v3646_v58, %v7869_v54  ;;  %v7886_v17 = vld [vmem:[#allocation45_spill] sm:$0xff] }
 0x51d   : > { %v4256_v18 = vpack.c.bf16 %v3675_v62, %v3675_v62  ;;  %v3676_v8 = vadd.f32 %v3644_v42, %v7870_v52  ;;  %v7887_v48 = vunpack.c.l.bf16 %v7886_v17  ;;  %v7890_v54 = vunpack.c.h.bf16 %v7886_v17 }
 0x51e   : > { %3838 = vst.msk [vmem:[%s7350_s15 + $0x58] sm:$0xf] %vm3815_vm7, %v4258_v40  ;;  %v4259_v59 = vpack.c.bf16 %v3678_v14, %v3678_v14 }
 0x51f   : > { %3836 = vst.msk [vmem:[%s7350_s15 + $0x50] sm:$0xf] %vm3815_vm7, %v4256_v18  ;;  %v4257_v4 = vpack.c.bf16 %v3676_v8, %v3676_v8 }
 0x520   : > { %3839 = vst.msk [vmem:[%s7350_s15 + $0x5c] sm:$0xf] %vm3815_vm7, %v4259_v59 }
 0x521   : > { %3837 = vst.msk [vmem:[%s7350_s15 + $0x54] sm:$0xf] %vm3815_vm7, %v4257_v4 }
 0x528   : > { %v4484_v13 = vpop.f32.mrb[60].mxu1 }
 0x529   : > { %v3601_v56 = vadd.f32 %v4484_v13, %v7334_v63  ;;  %v3592_v19 = vpop.f32.mrb[61].mxu1 }
 0x52a   : > { %v3593_v44 = vadd.f32 %v7334_v63, %v3592_v19  ;;  %v4485_v27 = vpop.f32.mrb[62].mxu1 }
 0x52b   : > { %v3649_v46 = vadd.f32 %v3601_v56, %v7871_v29  ;;  %v3604_v50 = vadd.f32 %v4485_v27, %v7334_v63  ;;  %v3595_v16 = vpop.f32.mrb[63].mxu1 }
 0x52c   : > { %v3647_v3 = vadd.f32 %v3593_v44, %v7872_v30  ;;  %v3596_v21 = vadd.f32 %v7334_v63, %v3595_v16 }
 0x52d   : > { %v3681_v0 = vadd.f32 %v3649_v46, %v7874_v31  ;;  %v3650_v7 = vadd.f32 %v3604_v50, %v7875_v24 }
 0x52e   : > { %v3679_v22 = vadd.f32 %v3647_v3, %v7877_v10  ;;  %v3648_v6 = vadd.f32 %v3596_v21, %v7878_v60 }
 0x52f   : > { %v4262_v1 = vpack.c.bf16 %v3681_v0, %v3681_v0  ;;  %v3682_v38 = vadd.f32 %v3650_v7, %v7879_v49 }
 0x530   : > { %v4260_v47 = vpack.c.bf16 %v3679_v22, %v3679_v22  ;;  %v3680_v41 = vadd.f32 %v3648_v6, %v7880_v11 }
 0x531   : > { %3842 = vst.msk [vmem:[%s7350_s15 + $0x68] sm:$0xf] %vm3815_vm7, %v4262_v1  ;;  %v4263_v9 = vpack.c.bf16 %v3682_v38, %v3682_v38 }
 0x532   : > { %3840 = vst.msk [vmem:[%s7350_s15 + $0x60] sm:$0xf] %vm3815_vm7, %v4260_v47  ;;  %v4261_v35 = vpack.c.bf16 %v3680_v41, %v3680_v41 }
 0x533   : > { %3843 = vst.msk [vmem:[%s7350_s15 + $0x6c] sm:$0xf] %vm3815_vm7, %v4263_v9 }
 0x534   : > { %3841 = vst.msk [vmem:[%s7350_s15 + $0x64] sm:$0xf] %vm3815_vm7, %v4261_v35 }
 0x539   : > { %v4488_v43 = vpop.f32.mrb[64].mxu1 }
 0x53a   : > { %v3617_v37 = vadd.f32 %v4488_v43, %v7334_v63  ;;  %v3608_v15 = vpop.f32.mrb[65].mxu1 }
 0x53b   : > { %v3609_v23 = vadd.f32 %v7334_v63, %v3608_v15  ;;  %v4489_v25 = vpop.f32.mrb[66].mxu1 }
 0x53c   : > { %v3653_v33 = vadd.f32 %v3617_v37, %v7881_v45  ;;  %v3620_v55 = vadd.f32 %v4489_v25, %v7334_v63  ;;  %v3611_v39 = vpop.f32.mrb[67].mxu1 }
 0x53d   : > { %v3651_v2 = vadd.f32 %v3609_v23, %v7882_v36  ;;  %v3612_v28 = vadd.f32 %v7334_v63, %v3611_v39 }
 0x53e   : > { %v3685_v32 = vadd.f32 %v3653_v33, %v7884_v53  ;;  %v3654_v51 = vadd.f32 %v3620_v55, %v7885_v34 }
 0x53f   : > { %v3683_v58 = vadd.f32 %v3651_v2, %v7887_v48  ;;  %v3652_v26 = vadd.f32 %v3612_v28, %v7888_v61 }
 0x540   : > { %v4266_v62 = vpack.c.bf16 %v3685_v32, %v3685_v32  ;;  %v3686_v42 = vadd.f32 %v3654_v51, %v7889_v20 }
 0x541   : > { %v4264_v40 = vpack.c.bf16 %v3683_v58, %v3683_v58  ;;  %v3684_v14 = vadd.f32 %v3652_v26, %v7890_v54 }
 0x542   : > { %3846 = vst.msk [vmem:[%s7350_s15 + $0x78] sm:$0xf] %vm3815_vm7, %v4266_v62  ;;  %v4267_v63 = vpack.c.bf16 %v3686_v42, %v3686_v42 }
 0x543   : > { %3844 = vst.msk [vmem:[%s7350_s15 + $0x70] sm:$0xf] %vm3815_vm7, %v4264_v40  ;;  %v4265_v18 = vpack.c.bf16 %v3684_v14, %v3684_v14 }
 0x544   : > { %3847 = vst.msk [vmem:[%s7350_s15 + $0x7c] sm:$0xf] %vm3815_vm7, %v4267_v63 }
 0x545   : > { %3845 = vst.msk [vmem:[%s7350_s15 + $0x74] sm:$0xf] %vm3815_vm7, %v4265_v18 }
 0x546 PF: > { %s23_s29 = sadd.s32 1, %s4921_s29   ;;  %s7891_s24 = sld [smem:[#allocation3_spill]] }
 0x547   : > { %p20_p12 = scmp.ge.s32.totalorder %s23_s29, 10   ;;  %s7892_s30 = sld [smem:[#allocation4_spill]] }
 0x548   : > { %s7893_s25 = smov %s4913_s27  ;;  %s7894_s26 = smov %s4917_s28 }
 0x549   :  { %22 = sbr.rel (!%p20_p12) target bundleno = 4 (0x4), region = 108 }
 0x54c   : > { %s7895_s27 = smov %s7891_s24 }
 0x54d   : > { %s7896_s28 = smov %s7892_s30 }

</bundles_post_ra>
